<compile_context>
chip_gen: v6e
topology: v6e:2x2x1
jax: 0.10.0
libtpu: 0.0.40
codegen_flags: <defaults>
</compile_context>

<pallas_src>
import functools

import jax
import jax.numpy as jnp
import numpy as np
from jax.experimental import pallas as pl
from jax.experimental.pallas import tpu as pltpu

EPS = 1e-5          # nn.BatchNorm2d default
LANE = 128          # TPU lane width; output-channel dim padded to this


def _round_up(x, m):
    return (x + m - 1) // m * m


def _default_vmem_limit():
    # Scale the scoped-VMEM request with the generation (64 MiB on v7x,
    # 128 MiB on v5e/v6e) instead of a fixed constant.
    try:
        cap = pltpu.get_tpu_info().vmem_capacity_bytes
    except Exception:
        cap = 64 * 1024 * 1024
    return int(max(32 * 1024 * 1024, min(cap // 2, 96 * 1024 * 1024)))


_VMEM_LIMIT = _default_vmem_limit()


def _cparams():
    return pltpu.CompilerParams(dimension_semantics=("parallel",),
                                vmem_limit_bytes=_VMEM_LIMIT)


def _pad1d(a, n):
    return jnp.pad(a.astype(jnp.float32), (0, n - a.shape[0]))


# --------------------------- in-kernel helpers -------------------------------
def _chan_stats(y):
    """(rows, C) f32 -> (2, C) [sum, sum_sq] per channel."""
    return jnp.concatenate(
        [jnp.sum(y, axis=0, keepdims=True),
         jnp.sum(y * y, axis=0, keepdims=True)], axis=0)


# --------------------------- Pallas kernels ----------------------------------
def _conv1_kernel(x_ref, w_ref, y_ref, st_ref, *, stride, hq):
    """3x3 conv (stride s) with im2col fused in-kernel + BN partial stats.

    x_ref:  (s*s*hq, wq, Cin) bf16 -- phase-split, spatially padded image.
    w_ref:  (9, Cin, Cpad)    bf16
    y_ref:  (Ho, Wo, Cpad)    bf16
    st_ref: (2, Cpad)         f32  per-image [sum, sum_sq]
    """
    ho, wo, cpad = y_ref.shape
    cin = x_ref.shape[-1]
    s = stride
    acc = jnp.zeros((ho * wo, cpad), jnp.float32)
    for dh in range(3):
        for dw in range(3):
            p = (dh % s) * s + (dw % s)          # phase holding this tap
            r0 = p * hq + dh // s                # contiguous (un-strided) slice
            c0 = dw // s
            tap = x_ref[r0:r0 + ho, c0:c0 + wo, :].reshape(ho * wo, cin)
            acc = acc + jnp.dot(tap, w_ref[dh * 3 + dw],
                                preferred_element_type=jnp.float32)
    y_ref[...] = acc.reshape(ho, wo, cpad).astype(y_ref.dtype)
    st_ref[...] = _chan_stats(acc)               # stats from f32, pre-downcast


def _conv2_core(y1_ref, aff1_ref, w2_ref, pad_ref):
    """Fused BN1-apply + ReLU + spatial pad + 3x3 (stride 1) conv taps."""
    ho, wo, cpad = y1_ref.shape
    scale = aff1_ref[0:1, :].reshape(1, 1, cpad)
    shift = aff1_ref[1:2, :].reshape(1, 1, cpad)
    act = jnp.maximum(y1_ref[...].astype(jnp.float32) * scale + shift, 0.0)
    pad_ref[...] = jnp.zeros_like(pad_ref)
    pad_ref[1:ho + 1, 1:wo + 1, :] = act.astype(pad_ref.dtype)
    acc = jnp.zeros((ho * wo, cpad), jnp.float32)
    for dh in range(3):
        for dw in range(3):
            tap = pad_ref[dh:dh + ho, dw:dw + wo, :].reshape(ho * wo, cpad)
            acc = acc + jnp.dot(tap, w2_ref[dh * 3 + dw],
                                preferred_element_type=jnp.float32)
    return acc


def _conv2_kernel_id(y1_ref, aff1_ref, w2_ref, y2_ref, st2_ref, pad_ref):
    acc = _conv2_core(y1_ref, aff1_ref, w2_ref, pad_ref)
    y2_ref[...] = acc.astype(y2_ref.dtype)
    st2_ref[...] = _chan_stats(acc)


def _conv2_kernel_proj(y1_ref, aff1_ref, w2_ref, xs_ref, ws_ref,
                       y2_ref, st2_ref, sts_ref, pad_ref):
    acc = _conv2_core(y1_ref, aff1_ref, w2_ref, pad_ref)
    y2_ref[...] = acc.astype(y2_ref.dtype)
    st2_ref[...] = _chan_stats(acc)
    # Projection shortcut: compute only its BN stats here; the 1x1 GEMM result
    # is NOT stored (it is recomputed in the final apply kernel).
    ys = jnp.dot(xs_ref[...], ws_ref[...], preferred_element_type=jnp.float32)
    sts_ref[...] = _chan_stats(ys)


def _apply_id_kernel(y2_ref, res_ref, aff2_ref, o_ref):
    out = y2_ref[...].astype(jnp.float32) * aff2_ref[0:1, :] + aff2_ref[1:2, :]
    out = out + res_ref[...].astype(jnp.float32)
    o_ref[...] = jnp.maximum(out, 0.0).astype(o_ref.dtype)


def _apply_proj_kernel(y2_ref, xs_ref, ws_ref, aff2_ref, affs_ref, o_ref):
    out = y2_ref[...].astype(jnp.float32) * aff2_ref[0:1, :] + aff2_ref[1:2, :]
    ys = jnp.dot(xs_ref[...], ws_ref[...], preferred_element_type=jnp.float32)
    out = out + ys * affs_ref[0:1, :] + affs_ref[1:2, :]
    o_ref[...] = jnp.maximum(out, 0.0).astype(o_ref.dtype)


# --------------------------- pallas_call wrappers ----------------------------
def _conv1_call(x_ph, w1, *, stride, n, ho, wo, hq, wq, cin, cpad):
    nph = stride * stride
    kern = functools.partial(_conv1_kernel, stride=stride, hq=hq)
    return pl.pallas_call(
        kern,
        grid=(n,),
        in_specs=[pl.BlockSpec((None, nph * hq, wq, cin), lambda i: (i, 0, 0, 0)),
                  pl.BlockSpec((9, cin, cpad), lambda i: (0, 0, 0))],
        out_specs=(pl.BlockSpec((None, ho, wo, cpad), lambda i: (i, 0, 0, 0)),
                   pl.BlockSpec((None, 2, cpad), lambda i: (i, 0, 0))),
        out_shape=(jax.ShapeDtypeStruct((n, ho, wo, cpad), jnp.bfloat16),
                   jax.ShapeDtypeStruct((n, 2, cpad), jnp.float32)),
        compiler_params=_cparams(),
    )(x_ph, w1)


def _conv2_call(y1, aff1, w2, xs, ws, *, n, ho, wo, cpad):
    scratch = [pltpu.VMEM((ho + 2, wo + 2, cpad), jnp.bfloat16)]
    base_in = [pl.BlockSpec((None, ho, wo, cpad), lambda i: (i, 0, 0, 0)),
               pl.BlockSpec((2, cpad), lambda i: (0, 0)),
               pl.BlockSpec((9, cpad, cpad), lambda i: (0, 0, 0))]
    y2_spec = pl.BlockSpec((None, ho * wo, cpad), lambda i: (i, 0, 0))
    st_spec = pl.BlockSpec((None, 2, cpad), lambda i: (i, 0, 0))
    y2_shape = jax.ShapeDtypeStruct((n, ho * wo, cpad), jnp.bfloat16)
    st_shape = jax.ShapeDtypeStruct((n, 2, cpad), jnp.float32)
    if xs is None:
        return pl.pallas_call(
            _conv2_kernel_id, grid=(n,),
            in_specs=base_in,
            out_specs=(y2_spec, st_spec),
            out_shape=(y2_shape, st_shape),
            scratch_shapes=scratch,
            compiler_params=_cparams(),
        )(y1, aff1, w2)
    cin = xs.shape[-1]
    return pl.pallas_call(
        _conv2_kernel_proj, grid=(n,),
        in_specs=base_in + [pl.BlockSpec((None, ho * wo, cin), lambda i: (i, 0, 0)),
                            pl.BlockSpec((cin, cpad), lambda i: (0, 0))],
        out_specs=(y2_spec, st_spec, st_spec),
        out_shape=(y2_shape, st_shape, st_shape),
        scratch_shapes=scratch,
        compiler_params=_cparams(),
    )(y1, aff1, w2, xs, ws)


def _apply_id_call(y2, res, aff2, *, n, rows, cpad):
    return pl.pallas_call(
        _apply_id_kernel, grid=(n,),
        in_specs=[pl.BlockSpec((None, rows, cpad), lambda i: (i, 0, 0)),
                  pl.BlockSpec((None, rows, cpad), lambda i: (i, 0, 0)),
                  pl.BlockSpec((2, cpad), lambda i: (0, 0))],
        out_specs=pl.BlockSpec((None, rows, cpad), lambda i: (i, 0, 0)),
        out_shape=jax.ShapeDtypeStruct((n, rows, cpad), jnp.bfloat16),
        compiler_params=_cparams(),
    )(y2, res, aff2)


def _apply_proj_call(y2, xs, ws, aff2, affs, *, n, rows, cin, cpad):
    return pl.pallas_call(
        _apply_proj_kernel, grid=(n,),
        in_specs=[pl.BlockSpec((None, rows, cpad), lambda i: (i, 0, 0)),
                  pl.BlockSpec((None, rows, cin), lambda i: (i, 0, 0)),
                  pl.BlockSpec((cin, cpad), lambda i: (0, 0)),
                  pl.BlockSpec((2, cpad), lambda i: (0, 0)),
                  pl.BlockSpec((2, cpad), lambda i: (0, 0))],
        out_specs=pl.BlockSpec((None, rows, cpad), lambda i: (i, 0, 0)),
        out_shape=jax.ShapeDtypeStruct((n, rows, cpad), jnp.bfloat16),
        compiler_params=_cparams(),
    )(y2, xs, ws, aff2, affs)


# --------------------------- host-side glue ----------------------------------
def _phase_split_pad(x_bf16, stride):
    """Pad spatially by 1 and split into stride*stride phases stacked along H.

    For stride==1 this is just the padded image.  Phases are a partition of
    the padded input (no blow-up); they let the kernel read every tap with a
    contiguous static slice instead of a strided VMEM load.
    """
    n, h, w, _ = x_bf16.shape
    hp, wp = h + 2, w + 2
    hp2, wp2 = _round_up(hp, stride), _round_up(wp, stride)
    xp = jnp.pad(x_bf16, ((0, 0), (1, 1 + hp2 - hp), (1, 1 + wp2 - wp), (0, 0)))
    hq, wq = hp2 // stride, wp2 // stride
    if stride == 1:
        return xp, hq, wq
    phases = [xp[:, i::stride, j::stride, :]
              for i in range(stride) for j in range(stride)]
    return jnp.concatenate(phases, axis=1), hq, wq


def _bn_affine(stats_sum, gamma_pad, beta_pad, count):
    """(2, Cpad) [sum, sum_sq] -> (2, Cpad) [scale, shift] (batch stats)."""
    mean = stats_sum[0] / count
    var = jnp.maximum(stats_sum[1] / count - mean * mean, 0.0)  # biased, as PyTorch BN
    scale = gamma_pad * jax.lax.rsqrt(var + EPS)
    shift = beta_pad - mean * scale
    return jnp.stack([scale, shift], axis=0)


def init_params(key, in_planes, out_planes, stride):
    k1, k2, k3 = jax.random.split(key, 3)
    p = {
        # conv weights stored HWIO: (kh, kw, Cin, Cout)
        "w1": jax.random.normal(k1, (3, 3, in_planes, out_planes), jnp.float32) * 0.1,
        "g1": jnp.ones((out_planes,), jnp.float32),
        "b1": jnp.zeros((out_planes,), jnp.float32),
        "w2": jax.random.normal(k2, (3, 3, out_planes, out_planes), jnp.float32) * 0.1,
        "g2": jnp.ones((out_planes,), jnp.float32),
        "b2": jnp.zeros((out_planes,), jnp.float32),
    }
    if stride != 1:
        p["ws"] = jax.random.normal(k3, (in_planes, out_planes), jnp.float32) * 0.1
        p["gs"] = jnp.ones((out_planes,), jnp.float32)
        p["bs"] = jnp.zeros((out_planes,), jnp.float32)
    return p


def _forward_nhwc(x_nhwc, params, stride):
    n, h, w, cin = x_nhwc.shape
    cout = params["w1"].shape[-1]
    cpad = _round_up(cout, LANE)
    ho = (h - 1) // stride + 1
    wo = (w - 1) // stride + 1
    m = n * ho * wo                      # real BN element count (no M padding)
    x = x_nhwc.astype(jnp.bfloat16)

    # ---------------- conv1 (3x3, stride) + BN1 stats ------------------------
    x_ph, hq, wq = _phase_split_pad(x, stride)
    w1 = jnp.pad(params["w1"].reshape(9, cin, cout),
                 ((0, 0), (0, 0), (0, cpad - cout))).astype(jnp.bfloat16)
    y1, st1 = _conv1_call(x_ph, w1, stride=stride, n=n, ho=ho, wo=wo,
                          hq=hq, wq=wq, cin=cin, cpad=cpad)
    aff1 = _bn_affine(jnp.sum(st1, axis=0),
                      _pad1d(params["g1"], cpad), _pad1d(params["b1"], cpad), m)

    # -------- conv2 (fused BN1-apply+ReLU+pad) + BN2 (+ shortcut) stats ------
    w2 = jnp.pad(params["w2"].reshape(9, cout, cout),
                 ((0, 0), (0, cpad - cout), (0, cpad - cout))).astype(jnp.bfloat16)
    g2 = _pad1d(params["g2"], cpad)
    b2 = _pad1d(params["b2"], cpad)

    if stride != 1:
        # projection shortcut: 1x1 strided conv == strided row gather of x
        xs = x[:, ::stride, ::stride, :].reshape(n, ho * wo, cin)
        ws = jnp.pad(params["ws"],
                     ((0, 0), (0, cpad - cout))).astype(jnp.bfloat16)
        y2, st2, sts = _conv2_call(y1, aff1, w2, xs, ws,
                                   n=n, ho=ho, wo=wo, cpad=cpad)
        aff2 = _bn_affine(jnp.sum(st2, axis=0), g2, b2, m)
        affs = _bn_affine(jnp.sum(sts, axis=0),
                          _pad1d(params["gs"], cpad), _pad1d(params["bs"], cpad), m)
        out = _apply_proj_call(y2, xs, ws, aff2, affs,
                               n=n, rows=ho * wo, cin=cin, cpad=cpad)
    else:
        assert cin == cout, "identity shortcut requires in_planes == out_planes"
        y2, st2 = _conv2_call(y1, aff1, w2, None, None,
                              n=n, ho=ho, wo=wo, cpad=cpad)
        aff2 = _bn_affine(jnp.sum(st2, axis=0), g2, b2, m)
        res = jnp.pad(x, ((0, 0), (0, 0), (0, 0),
                          (0, cpad - cin))).reshape(n, ho * wo, cpad)
        out = _apply_id_call(y2, res, aff2, n=n, rows=ho * wo, cpad=cpad)

    return out.reshape(n, ho, wo, cpad)[:, :, :, :cout]     # bf16, NHWC


# NHWC-native entry point (preferred when chaining blocks: no transposes).
basic_block_forward_nhwc = jax.jit(_forward_nhwc, static_argnames=("stride",))


@functools.partial(jax.jit, static_argnames=("stride",))
def basic_block_forward(x_nchw, params, stride):
    """NCHW boundary kept only for parity with the PyTorch spec."""
    x = jnp.transpose(x_nchw, (0, 2, 3, 1))
    out = _forward_nhwc(x, params, stride)
    return jnp.transpose(out, (0, 3, 1, 2))


# --------------------------- pure-JAX reference ------------------------------
def _ref_bn(y, g, b):
    mean = jnp.mean(y, axis=(0, 2, 3), keepdims=True)
    var = jnp.mean((y - mean) ** 2, axis=(0, 2, 3), keepdims=True)
    return (y - mean) * jax.lax.rsqrt(var + EPS) * g.reshape(1, -1, 1, 1) + \
        b.reshape(1, -1, 1, 1)


def _ref_conv(x, w_hwio, stride, pad):
    w = jnp.transpose(w_hwio, (3, 2, 0, 1))  # OIHW
    return jax.lax.conv_general_dilated(
        x, w, (stride, stride), ((pad, pad), (pad, pad)),
        dimension_numbers=("NCHW", "OIHW", "NCHW"))


def ref_block(x_nchw, params, stride):
    out = jax.nn.relu(_ref_bn(_ref_conv(x_nchw, params["w1"], stride, 1),
                              params["g1"], params["b1"]))
    out = _ref_bn(_ref_conv(out, params["w2"], 1, 1), params["g2"], params["b2"])
    if stride != 1:
        w_hwio = params["ws"].reshape(1, 1, *params["ws"].shape)
        sc = _ref_bn(_ref_conv(x_nchw, w_hwio, stride, 0),
                     params["gs"], params["bs"])
    else:
        sc = x_nchw
    return jax.nn.relu(out + sc)


# --------------------------------- main ---------------------------------------
if __name__ == "__main__":
    key = jax.random.PRNGKey(0)
    kx, kp1, kp2 = jax.random.split(key, 3)

    # bf16 MXU operands / bf16 intermediates (f32 accumulation + f32 BN math)
    # => looser tolerance than a pure-f32 comparison.
    TOL = 5e-2
    x = jax.random.normal(kx, (2, 4, 16, 16), jnp.float32)

    # Case 1: stride=2, in_planes=4 -> out_planes=8 (projection shortcut).
    p1 = init_params(kp1, 4, 8, 2)
    y1 = jax.block_until_ready(basic_block_forward(x, p1, 2))
    np.testing.assert_allclose(np.asarray(y1.astype(jnp.float32)),
                               np.asarray(ref_block(x, p1, 2)),
                               rtol=TOL, atol=TOL)

    # Case 2: stride=1, identity shortcut (in_planes == out_planes == 4).
    p2 = init_params(kp2, 4, 4, 1)
    y2 = jax.block_until_ready(basic_block_forward(x, p2, 1))
    np.testing.assert_allclose(np.asarray(y2.astype(jnp.float32)),
                               np.asarray(ref_block(x, p2, 1)),
                               rtol=TOL, atol=TOL)

    print("KERNEL_OK")
</pallas_src>

<mosaic_0001>
module attributes {stable_mosaic.version = 11 : i64} {
  func.func @_conv1_kernel(%arg0: i32, %arg1: memref<1x36x9x4xbf16, #tpu.memory_space<vmem>>, %arg2: memref<9x4x128xbf16, #tpu.memory_space<vmem>>, %arg3: memref<1x8x8x128xbf16, #tpu.memory_space<vmem>>, %arg4: memref<1x2x128xf32, #tpu.memory_space<vmem>>) attributes {dimension_semantics = [#tpu.dimension_semantics<parallel>], iteration_bounds = array<i64: 2>, scalar_prefetch = 0 : i64, scratch_operands = 0 : i64, tpu.core_type = #tpu.core_type<tc>, window_params = [{transform_indices = @transform_0, window_bounds = array<i64: 1, 36, 9, 4>}, {pipeline_mode = #tpu.pipeline_mode<synchronous>, transform_indices = @transform_1, window_bounds = array<i64: 9, 4, 128>}, {transform_indices = @transform_2, window_bounds = array<i64: 1, 8, 8, 128>}, {transform_indices = @transform_3, window_bounds = array<i64: 1, 2, 128>}]} {
    %cst = arith.constant 0.000000e+00 : f32
    %0 = vector.broadcast %cst : f32 to vector<64x128xf32>
    %c0 = arith.constant 0 : index
    %c0_0 = arith.constant 0 : index
    %c0_1 = arith.constant 0 : index
    %c0_2 = arith.constant 0 : index
    %1 = vector.load %arg1[%c0, %c0_0, %c0_1, %c0_2] : memref<1x36x9x4xbf16, #tpu.memory_space<vmem>>, vector<1x8x8x4xbf16>
    %2 = vector.shape_cast %1 : vector<1x8x8x4xbf16> to vector<8x8x4xbf16>
    %3 = vector.shape_cast %2 : vector<8x8x4xbf16> to vector<64x4xbf16>
    %c0_3 = arith.constant 0 : index
    %c0_4 = arith.constant 0 : index
    %c0_5 = arith.constant 0 : index
    %4 = vector.load %arg2[%c0_3, %c0_4, %c0_5] : memref<9x4x128xbf16, #tpu.memory_space<vmem>>, vector<1x4x128xbf16>
    %5 = vector.shape_cast %4 : vector<1x4x128xbf16> to vector<4x128xbf16>
    %cst_6 = arith.constant dense<0.000000e+00> : vector<64x128xf32>
    %6 = tpu.matmul %3, %5, %cst_6 {dimension_numbers = #tpu.dot_dimension_numbers<[1], [0], [0], [1], [0, 0, 1, 1], [], []>} : vector<64x4xbf16>, vector<4x128xbf16>, vector<64x128xf32> -> vector<64x128xf32>
    %7 = arith.addf %0, %6 : vector<64x128xf32>
    %c0_7 = arith.constant 0 : index
    %c9 = arith.constant 9 : index
    %c0_8 = arith.constant 0 : index
    %c0_9 = arith.constant 0 : index
    %8 = vector.load %arg1[%c0_7, %c9, %c0_8, %c0_9] : memref<1x36x9x4xbf16, #tpu.memory_space<vmem>>, vector<1x8x8x4xbf16>
    %9 = vector.shape_cast %8 : vector<1x8x8x4xbf16> to vector<8x8x4xbf16>
    %10 = vector.shape_cast %9 : vector<8x8x4xbf16> to vector<64x4xbf16>
    %c1 = arith.constant 1 : index
    %c0_10 = arith.constant 0 : index
    %c0_11 = arith.constant 0 : index
    %11 = vector.load %arg2[%c1, %c0_10, %c0_11] : memref<9x4x128xbf16, #tpu.memory_space<vmem>>, vector<1x4x128xbf16>
    %12 = vector.shape_cast %11 : vector<1x4x128xbf16> to vector<4x128xbf16>
    %cst_12 = arith.constant dense<0.000000e+00> : vector<64x128xf32>
    %13 = tpu.matmul %10, %12, %cst_12 {dimension_numbers = #tpu.dot_dimension_numbers<[1], [0], [0], [1], [0, 0, 1, 1], [], []>} : vector<64x4xbf16>, vector<4x128xbf16>, vector<64x128xf32> -> vector<64x128xf32>
    %14 = arith.addf %7, %13 : vector<64x128xf32>
    %c0_13 = arith.constant 0 : index
    %c0_14 = arith.constant 0 : index
    %c1_15 = arith.constant 1 : index
    %c0_16 = arith.constant 0 : index
    %15 = vector.load %arg1[%c0_13, %c0_14, %c1_15, %c0_16] : memref<1x36x9x4xbf16, #tpu.memory_space<vmem>>, vector<1x8x8x4xbf16>
    %16 = vector.shape_cast %15 : vector<1x8x8x4xbf16> to vector<8x8x4xbf16>
    %17 = vector.shape_cast %16 : vector<8x8x4xbf16> to vector<64x4xbf16>
    %c2 = arith.constant 2 : index
    %c0_17 = arith.constant 0 : index
    %c0_18 = arith.constant 0 : index
    %18 = vector.load %arg2[%c2, %c0_17, %c0_18] : memref<9x4x128xbf16, #tpu.memory_space<vmem>>, vector<1x4x128xbf16>
    %19 = vector.shape_cast %18 : vector<1x4x128xbf16> to vector<4x128xbf16>
    %cst_19 = arith.constant dense<0.000000e+00> : vector<64x128xf32>
    %20 = tpu.matmul %17, %19, %cst_19 {dimension_numbers = #tpu.dot_dimension_numbers<[1], [0], [0], [1], [0, 0, 1, 1], [], []>} : vector<64x4xbf16>, vector<4x128xbf16>, vector<64x128xf32> -> vector<64x128xf32>
    %21 = arith.addf %14, %20 : vector<64x128xf32>
    %c0_20 = arith.constant 0 : index
    %c18 = arith.constant 18 : index
    %c0_21 = arith.constant 0 : index
    %c0_22 = arith.constant 0 : index
    %22 = vector.load %arg1[%c0_20, %c18, %c0_21, %c0_22] : memref<1x36x9x4xbf16, #tpu.memory_space<vmem>>, vector<1x8x8x4xbf16>
    %23 = vector.shape_cast %22 : vector<1x8x8x4xbf16> to vector<8x8x4xbf16>
    %24 = vector.shape_cast %23 : vector<8x8x4xbf16> to vector<64x4xbf16>
    %c3 = arith.constant 3 : index
    %c0_23 = arith.constant 0 : index
    %c0_24 = arith.constant 0 : index
    %25 = vector.load %arg2[%c3, %c0_23, %c0_24] : memref<9x4x128xbf16, #tpu.memory_space<vmem>>, vector<1x4x128xbf16>
    %26 = vector.shape_cast %25 : vector<1x4x128xbf16> to vector<4x128xbf16>
    %cst_25 = arith.constant dense<0.000000e+00> : vector<64x128xf32>
    %27 = tpu.matmul %24, %26, %cst_25 {dimension_numbers = #tpu.dot_dimension_numbers<[1], [0], [0], [1], [0, 0, 1, 1], [], []>} : vector<64x4xbf16>, vector<4x128xbf16>, vector<64x128xf32> -> vector<64x128xf32>
    %28 = arith.addf %21, %27 : vector<64x128xf32>
    %c0_26 = arith.constant 0 : index
    %c27 = arith.constant 27 : index
    %c0_27 = arith.constant 0 : index
    %c0_28 = arith.constant 0 : index
    %29 = vector.load %arg1[%c0_26, %c27, %c0_27, %c0_28] : memref<1x36x9x4xbf16, #tpu.memory_space<vmem>>, vector<1x8x8x4xbf16>
    %30 = vector.shape_cast %29 : vector<1x8x8x4xbf16> to vector<8x8x4xbf16>
    %31 = vector.shape_cast %30 : vector<8x8x4xbf16> to vector<64x4xbf16>
    %c4 = arith.constant 4 : index
    %c0_29 = arith.constant 0 : index
    %c0_30 = arith.constant 0 : index
    %32 = vector.load %arg2[%c4, %c0_29, %c0_30] : memref<9x4x128xbf16, #tpu.memory_space<vmem>>, vector<1x4x128xbf16>
    %33 = vector.shape_cast %32 : vector<1x4x128xbf16> to vector<4x128xbf16>
    %cst_31 = arith.constant dense<0.000000e+00> : vector<64x128xf32>
    %34 = tpu.matmul %31, %33, %cst_31 {dimension_numbers = #tpu.dot_dimension_numbers<[1], [0], [0], [1], [0, 0, 1, 1], [], []>} : vector<64x4xbf16>, vector<4x128xbf16>, vector<64x128xf32> -> vector<64x128xf32>
    %35 = arith.addf %28, %34 : vector<64x128xf32>
    %c0_32 = arith.constant 0 : index
    %c18_33 = arith.constant 18 : index
    %c1_34 = arith.constant 1 : index
    %c0_35 = arith.constant 0 : index
    %36 = vector.load %arg1[%c0_32, %c18_33, %c1_34, %c0_35] : memref<1x36x9x4xbf16, #tpu.memory_space<vmem>>, vector<1x8x8x4xbf16>
    %37 = vector.shape_cast %36 : vector<1x8x8x4xbf16> to vector<8x8x4xbf16>
    %38 = vector.shape_cast %37 : vector<8x8x4xbf16> to vector<64x4xbf16>
    %c5 = arith.constant 5 : index
    %c0_36 = arith.constant 0 : index
    %c0_37 = arith.constant 0 : index
    %39 = vector.load %arg2[%c5, %c0_36, %c0_37] : memref<9x4x128xbf16, #tpu.memory_space<vmem>>, vector<1x4x128xbf16>
    %40 = vector.shape_cast %39 : vector<1x4x128xbf16> to vector<4x128xbf16>
    %cst_38 = arith.constant dense<0.000000e+00> : vector<64x128xf32>
    %41 = tpu.matmul %38, %40, %cst_38 {dimension_numbers = #tpu.dot_dimension_numbers<[1], [0], [0], [1], [0, 0, 1, 1], [], []>} : vector<64x4xbf16>, vector<4x128xbf16>, vector<64x128xf32> -> vector<64x128xf32>
    %42 = arith.addf %35, %41 : vector<64x128xf32>
    %c0_39 = arith.constant 0 : index
    %c1_40 = arith.constant 1 : index
    %c0_41 = arith.constant 0 : index
    %c0_42 = arith.constant 0 : index
    %43 = vector.load %arg1[%c0_39, %c1_40, %c0_41, %c0_42] : memref<1x36x9x4xbf16, #tpu.memory_space<vmem>>, vector<1x8x8x4xbf16>
    %44 = vector.shape_cast %43 : vector<1x8x8x4xbf16> to vector<8x8x4xbf16>
    %45 = vector.shape_cast %44 : vector<8x8x4xbf16> to vector<64x4xbf16>
    %c6 = arith.constant 6 : index
    %c0_43 = arith.constant 0 : index
    %c0_44 = arith.constant 0 : index
    %46 = vector.load %arg2[%c6, %c0_43, %c0_44] : memref<9x4x128xbf16, #tpu.memory_space<vmem>>, vector<1x4x128xbf16>
    %47 = vector.shape_cast %46 : vector<1x4x128xbf16> to vector<4x128xbf16>
    %cst_45 = arith.constant dense<0.000000e+00> : vector<64x128xf32>
    %48 = tpu.matmul %45, %47, %cst_45 {dimension_numbers = #tpu.dot_dimension_numbers<[1], [0], [0], [1], [0, 0, 1, 1], [], []>} : vector<64x4xbf16>, vector<4x128xbf16>, vector<64x128xf32> -> vector<64x128xf32>
    %49 = arith.addf %42, %48 : vector<64x128xf32>
    %c0_46 = arith.constant 0 : index
    %c10 = arith.constant 10 : index
    %c0_47 = arith.constant 0 : index
    %c0_48 = arith.constant 0 : index
    %50 = vector.load %arg1[%c0_46, %c10, %c0_47, %c0_48] : memref<1x36x9x4xbf16, #tpu.memory_space<vmem>>, vector<1x8x8x4xbf16>
    %51 = vector.shape_cast %50 : vector<1x8x8x4xbf16> to vector<8x8x4xbf16>
    %52 = vector.shape_cast %51 : vector<8x8x4xbf16> to vector<64x4xbf16>
    %c7 = arith.constant 7 : index
    %c0_49 = arith.constant 0 : index
    %c0_50 = arith.constant 0 : index
    %53 = vector.load %arg2[%c7, %c0_49, %c0_50] : memref<9x4x128xbf16, #tpu.memory_space<vmem>>, vector<1x4x128xbf16>
    %54 = vector.shape_cast %53 : vector<1x4x128xbf16> to vector<4x128xbf16>
    %cst_51 = arith.constant dense<0.000000e+00> : vector<64x128xf32>
    %55 = tpu.matmul %52, %54, %cst_51 {dimension_numbers = #tpu.dot_dimension_numbers<[1], [0], [0], [1], [0, 0, 1, 1], [], []>} : vector<64x4xbf16>, vector<4x128xbf16>, vector<64x128xf32> -> vector<64x128xf32>
    %56 = arith.addf %49, %55 : vector<64x128xf32>
    %c0_52 = arith.constant 0 : index
    %c1_53 = arith.constant 1 : index
    %c1_54 = arith.constant 1 : index
    %c0_55 = arith.constant 0 : index
    %57 = vector.load %arg1[%c0_52, %c1_53, %c1_54, %c0_55] : memref<1x36x9x4xbf16, #tpu.memory_space<vmem>>, vector<1x8x8x4xbf16>
    %58 = vector.shape_cast %57 : vector<1x8x8x4xbf16> to vector<8x8x4xbf16>
    %59 = vector.shape_cast %58 : vector<8x8x4xbf16> to vector<64x4xbf16>
    %c8 = arith.constant 8 : index
    %c0_56 = arith.constant 0 : index
    %c0_57 = arith.constant 0 : index
    %60 = vector.load %arg2[%c8, %c0_56, %c0_57] : memref<9x4x128xbf16, #tpu.memory_space<vmem>>, vector<1x4x128xbf16>
    %61 = vector.shape_cast %60 : vector<1x4x128xbf16> to vector<4x128xbf16>
    %cst_58 = arith.constant dense<0.000000e+00> : vector<64x128xf32>
    %62 = tpu.matmul %59, %61, %cst_58 {dimension_numbers = #tpu.dot_dimension_numbers<[1], [0], [0], [1], [0, 0, 1, 1], [], []>} : vector<64x4xbf16>, vector<4x128xbf16>, vector<64x128xf32> -> vector<64x128xf32>
    %63 = arith.addf %56, %62 : vector<64x128xf32>
    %64 = vector.shape_cast %63 : vector<64x128xf32> to vector<8x8x128xf32>
    %65 = arith.truncf %64 : vector<8x8x128xf32> to vector<8x8x128xbf16>
    %c0_59 = arith.constant 0 : index
    %c0_60 = arith.constant 0 : index
    %c0_61 = arith.constant 0 : index
    %c0_62 = arith.constant 0 : index
    %66 = vector.load %arg3[%c0_59, %c0_60, %c0_61, %c0_62] : memref<1x8x8x128xbf16, #tpu.memory_space<vmem>>, vector<1x8x8x128xbf16>
    %67 = vector.shape_cast %66 : vector<1x8x8x128xbf16> to vector<8x8x128xbf16>
    %68 = vector.shape_cast %65 : vector<8x8x128xbf16> to vector<1x8x8x128xbf16>
    tpu.vector_store %arg3[%c0_59, %c0_60, %c0_61, %c0_62], %68 {strides = array<i32>} : memref<1x8x8x128xbf16, #tpu.memory_space<vmem>>, vector<1x8x8x128xbf16>,
    %cst_63 = arith.constant dense<0.000000e+00> : vector<128xf32>
    %69 = vector.multi_reduction <add>, %63, %cst_63 [0] : vector<64x128xf32> to vector<128xf32>
    %70 = vector.shape_cast %69 : vector<128xf32> to vector<1x128xf32>
    %71 = arith.mulf %63, %63 : vector<64x128xf32>
    %cst_64 = arith.constant dense<0.000000e+00> : vector<128xf32>
    %72 = vector.multi_reduction <add>, %71, %cst_64 [0] : vector<64x128xf32> to vector<128xf32>
    %73 = vector.shape_cast %72 : vector<128xf32> to vector<1x128xf32>
    %74 = tpu.concatenate %70, %73 in 0 : vector<1x128xf32>, vector<1x128xf32> -> vector<2x128xf32>
    %c0_65 = arith.constant 0 : index
    %c0_66 = arith.constant 0 : index
    %c0_67 = arith.constant 0 : index
    %75 = vector.load %arg4[%c0_65, %c0_66, %c0_67] : memref<1x2x128xf32, #tpu.memory_space<vmem>>, vector<1x2x128xf32>
    %76 = vector.shape_cast %75 : vector<1x2x128xf32> to vector<2x128xf32>
    %77 = vector.shape_cast %74 : vector<2x128xf32> to vector<1x2x128xf32>
    tpu.vector_store %arg4[%c0_65, %c0_66, %c0_67], %77 {strides = array<i32>} : memref<1x2x128xf32, #tpu.memory_space<vmem>>, vector<1x2x128xf32>,
    return
  }
  func.func @transform_0(%arg0: i32) -> (i32, i32, i32, i32) {
    %c0_i32 = arith.constant 0 : i32
    %c0_i32_0 = arith.constant 0 : i32
    %c0_i32_1 = arith.constant 0 : i32
    %c0_i32_2 = arith.constant 0 : i32
    return %arg0, %c0_i32, %c0_i32_0, %c0_i32_1 : i32, i32, i32, i32
  }
  func.func @transform_1(%arg0: i32) -> (i32, i32, i32) {
    %c0_i32 = arith.constant 0 : i32
    %c0_i32_0 = arith.constant 0 : i32
    %c0_i32_1 = arith.constant 0 : i32
    %c0_i32_2 = arith.constant 0 : i32
    return %c0_i32, %c0_i32_0, %c0_i32_1 : i32, i32, i32
  }
  func.func @transform_2(%arg0: i32) -> (i32, i32, i32, i32) {
    %c0_i32 = arith.constant 0 : i32
    %c0_i32_0 = arith.constant 0 : i32
    %c0_i32_1 = arith.constant 0 : i32
    %c0_i32_2 = arith.constant 0 : i32
    return %arg0, %c0_i32, %c0_i32_0, %c0_i32_1 : i32, i32, i32, i32
  }
  func.func @transform_3(%arg0: i32) -> (i32, i32, i32) {
    %c0_i32 = arith.constant 0 : i32
    %c0_i32_0 = arith.constant 0 : i32
    %c0_i32_1 = arith.constant 0 : i32
    return %arg0, %c0_i32, %c0_i32_0 : i32, i32, i32
  }
}

module attributes {stable_mosaic.version = 11 : i64} {
  func.func @_conv2_kernel_proj(%arg0: i32, %arg1: memref<1x8x8x128xbf16, #tpu.memory_space<vmem>>, %arg2: memref<2x128xf32, #tpu.memory_space<vmem>>, %arg3: memref<9x128x128xbf16, #tpu.memory_space<vmem>>, %arg4: memref<1x64x4xbf16, #tpu.memory_space<vmem>>, %arg5: memref<4x128xbf16, #tpu.memory_space<vmem>>, %arg6: memref<1x64x128xbf16, #tpu.memory_space<vmem>>, %arg7: memref<1x2x128xf32, #tpu.memory_space<vmem>>, %arg8: memref<1x2x128xf32, #tpu.memory_space<vmem>>, %arg9: memref<10x10x128xbf16, #tpu.memory_space<vmem>>) attributes {dimension_semantics = [#tpu.dimension_semantics<parallel>], iteration_bounds = array<i64: 2>, scalar_prefetch = 0 : i64, scratch_operands = 1 : i64, tpu.core_type = #tpu.core_type<tc>, window_params = [{transform_indices = @transform_0, window_bounds = array<i64: 1, 8, 8, 128>}, {pipeline_mode = #tpu.pipeline_mode<synchronous>, transform_indices = @transform_1, window_bounds = array<i64: 2, 128>}, {pipeline_mode = #tpu.pipeline_mode<synchronous>, transform_indices = @transform_2, window_bounds = array<i64: 9, 128, 128>}, {transform_indices = @transform_3, window_bounds = array<i64: 1, 64, 4>}, {pipeline_mode = #tpu.pipeline_mode<synchronous>, transform_indices = @transform_4, window_bounds = array<i64: 4, 128>}, {transform_indices = @transform_5, window_bounds = array<i64: 1, 64, 128>}, {transform_indices = @transform_6, window_bounds = array<i64: 1, 2, 128>}, {transform_indices = @transform_7, window_bounds = array<i64: 1, 2, 128>}]} {
    %c0 = arith.constant 0 : index
    %c0_0 = arith.constant 0 : index
    %0 = vector.load %arg2[%c0, %c0_0] : memref<2x128xf32, #tpu.memory_space<vmem>>, vector<1x128xf32>
    %1 = vector.shape_cast %0 : vector<1x128xf32> to vector<1x1x128xf32>
    %c1 = arith.constant 1 : index
    %c0_1 = arith.constant 0 : index
    %2 = vector.load %arg2[%c1, %c0_1] : memref<2x128xf32, #tpu.memory_space<vmem>>, vector<1x128xf32>
    %3 = vector.shape_cast %2 : vector<1x128xf32> to vector<1x1x128xf32>
    %c0_2 = arith.constant 0 : index
    %c0_3 = arith.constant 0 : index
    %c0_4 = arith.constant 0 : index
    %c0_5 = arith.constant 0 : index
    %4 = vector.load %arg1[%c0_2, %c0_3, %c0_4, %c0_5] : memref<1x8x8x128xbf16, #tpu.memory_space<vmem>>, vector<1x8x8x128xbf16>
    %5 = vector.shape_cast %4 : vector<1x8x8x128xbf16> to vector<8x8x128xbf16>
    %6 = arith.extf %5 : vector<8x8x128xbf16> to vector<8x8x128xf32>
    %7 = vector.broadcast %1 : vector<1x1x128xf32> to vector<8x8x128xf32>
    %8 = arith.mulf %6, %7 : vector<8x8x128xf32>
    %9 = vector.broadcast %3 : vector<1x1x128xf32> to vector<8x8x128xf32>
    %10 = arith.addf %8, %9 : vector<8x8x128xf32>
    %cst = arith.constant 0.000000e+00 : f32
    %11 = vector.broadcast %cst : f32 to vector<8x8x128xf32>
    %12 = arith.maximumf %10, %11 : vector<8x8x128xf32>
    %cst_6 = arith.constant 0.000000e+00 : bf16
    %13 = vector.broadcast %cst_6 : bf16 to vector<10x10x128xbf16>
    %c0_7 = arith.constant 0 : index
    %c0_8 = arith.constant 0 : index
    %c0_9 = arith.constant 0 : index
    %14 = vector.load %arg9[%c0_7, %c0_8, %c0_9] : memref<10x10x128xbf16, #tpu.memory_space<vmem>>, vector<10x10x128xbf16>
    tpu.vector_store %arg9[%c0_7, %c0_8, %c0_9], %13 {strides = array<i32>} : memref<10x10x128xbf16, #tpu.memory_space<vmem>>, vector<10x10x128xbf16>,
    %15 = arith.truncf %12 : vector<8x8x128xf32> to vector<8x8x128xbf16>
    %c1_10 = arith.constant 1 : index
    %c1_11 = arith.constant 1 : index
    %c0_12 = arith.constant 0 : index
    %16 = vector.load %arg9[%c1_10, %c1_11, %c0_12] : memref<10x10x128xbf16, #tpu.memory_space<vmem>>, vector<8x8x128xbf16>
    tpu.vector_store %arg9[%c1_10, %c1_11, %c0_12], %15 {strides = array<i32>} : memref<10x10x128xbf16, #tpu.memory_space<vmem>>, vector<8x8x128xbf16>,
    %cst_13 = arith.constant 0.000000e+00 : f32
    %17 = vector.broadcast %cst_13 : f32 to vector<64x128xf32>
    %c0_14 = arith.constant 0 : index
    %c0_15 = arith.constant 0 : index
    %c0_16 = arith.constant 0 : index
    %18 = vector.load %arg9[%c0_14, %c0_15, %c0_16] : memref<10x10x128xbf16, #tpu.memory_space<vmem>>, vector<8x8x128xbf16>
    %19 = vector.shape_cast %18 : vector<8x8x128xbf16> to vector<64x128xbf16>
    %c0_17 = arith.constant 0 : index
    %c0_18 = arith.constant 0 : index
    %c0_19 = arith.constant 0 : index
    %20 = vector.load %arg3[%c0_17, %c0_18, %c0_19] : memref<9x128x128xbf16, #tpu.memory_space<vmem>>, vector<1x128x128xbf16>
    %21 = vector.shape_cast %20 : vector<1x128x128xbf16> to vector<128x128xbf16>
    %cst_20 = arith.constant dense<0.000000e+00> : vector<64x128xf32>
    %22 = tpu.matmul %19, %21, %cst_20 {dimension_numbers = #tpu.dot_dimension_numbers<[1], [0], [0], [1], [0, 0, 1, 1], [], []>} : vector<64x128xbf16>, vector<128x128xbf16>, vector<64x128xf32> -> vector<64x128xf32>
    %23 = arith.addf %17, %22 : vector<64x128xf32>
    %c0_21 = arith.constant 0 : index
    %c1_22 = arith.constant 1 : index
    %c0_23 = arith.constant 0 : index
    %24 = vector.load %arg9[%c0_21, %c1_22, %c0_23] : memref<10x10x128xbf16, #tpu.memory_space<vmem>>, vector<8x8x128xbf16>
    %25 = vector.shape_cast %24 : vector<8x8x128xbf16> to vector<64x128xbf16>
    %c1_24 = arith.constant 1 : index
    %c0_25 = arith.constant 0 : index
    %c0_26 = arith.constant 0 : index
    %26 = vector.load %arg3[%c1_24, %c0_25, %c0_26] : memref<9x128x128xbf16, #tpu.memory_space<vmem>>, vector<1x128x128xbf16>
    %27 = vector.shape_cast %26 : vector<1x128x128xbf16> to vector<128x128xbf16>
    %cst_27 = arith.constant dense<0.000000e+00> : vector<64x128xf32>
    %28 = tpu.matmul %25, %27, %cst_27 {dimension_numbers = #tpu.dot_dimension_numbers<[1], [0], [0], [1], [0, 0, 1, 1], [], []>} : vector<64x128xbf16>, vector<128x128xbf16>, vector<64x128xf32> -> vector<64x128xf32>
    %29 = arith.addf %23, %28 : vector<64x128xf32>
    %c0_28 = arith.constant 0 : index
    %c2 = arith.constant 2 : index
    %c0_29 = arith.constant 0 : index
    %30 = vector.load %arg9[%c0_28, %c2, %c0_29] : memref<10x10x128xbf16, #tpu.memory_space<vmem>>, vector<8x8x128xbf16>
    %31 = vector.shape_cast %30 : vector<8x8x128xbf16> to vector<64x128xbf16>
    %c2_30 = arith.constant 2 : index
    %c0_31 = arith.constant 0 : index
    %c0_32 = arith.constant 0 : index
    %32 = vector.load %arg3[%c2_30, %c0_31, %c0_32] : memref<9x128x128xbf16, #tpu.memory_space<vmem>>, vector<1x128x128xbf16>
    %33 = vector.shape_cast %32 : vector<1x128x128xbf16> to vector<128x128xbf16>
    %cst_33 = arith.constant dense<0.000000e+00> : vector<64x128xf32>
    %34 = tpu.matmul %31, %33, %cst_33 {dimension_numbers = #tpu.dot_dimension_numbers<[1], [0], [0], [1], [0, 0, 1, 1], [], []>} : vector<64x128xbf16>, vector<128x128xbf16>, vector<64x128xf32> -> vector<64x128xf32>
    %35 = arith.addf %29, %34 : vector<64x128xf32>
    %c1_34 = arith.constant 1 : index
    %c0_35 = arith.constant 0 : index
    %c0_36 = arith.constant 0 : index
    %36 = vector.load %arg9[%c1_34, %c0_35, %c0_36] : memref<10x10x128xbf16, #tpu.memory_space<vmem>>, vector<8x8x128xbf16>
    %37 = vector.shape_cast %36 : vector<8x8x128xbf16> to vector<64x128xbf16>
    %c3 = arith.constant 3 : index
    %c0_37 = arith.constant 0 : index
    %c0_38 = arith.constant 0 : index
    %38 = vector.load %arg3[%c3, %c0_37, %c0_38] : memref<9x128x128xbf16, #tpu.memory_space<vmem>>, vector<1x128x128xbf16>
    %39 = vector.shape_cast %38 : vector<1x128x128xbf16> to vector<128x128xbf16>
    %cst_39 = arith.constant dense<0.000000e+00> : vector<64x128xf32>
    %40 = tpu.matmul %37, %39, %cst_39 {dimension_numbers = #tpu.dot_dimension_numbers<[1], [0], [0], [1], [0, 0, 1, 1], [], []>} : vector<64x128xbf16>, vector<128x128xbf16>, vector<64x128xf32> -> vector<64x128xf32>
    %41 = arith.addf %35, %40 : vector<64x128xf32>
    %c1_40 = arith.constant 1 : index
    %c1_41 = arith.constant 1 : index
    %c0_42 = arith.constant 0 : index
    %42 = vector.load %arg9[%c1_40, %c1_41, %c0_42] : memref<10x10x128xbf16, #tpu.memory_space<vmem>>, vector<8x8x128xbf16>
    %43 = vector.shape_cast %42 : vector<8x8x128xbf16> to vector<64x128xbf16>
    %c4 = arith.constant 4 : index
    %c0_43 = arith.constant 0 : index
    %c0_44 = arith.constant 0 : index
    %44 = vector.load %arg3[%c4, %c0_43, %c0_44] : memref<9x128x128xbf16, #tpu.memory_space<vmem>>, vector<1x128x128xbf16>
    %45 = vector.shape_cast %44 : vector<1x128x128xbf16> to vector<128x128xbf16>
    %cst_45 = arith.constant dense<0.000000e+00> : vector<64x128xf32>
    %46 = tpu.matmul %43, %45, %cst_45 {dimension_numbers = #tpu.dot_dimension_numbers<[1], [0], [0], [1], [0, 0, 1, 1], [], []>} : vector<64x128xbf16>, vector<128x128xbf16>, vector<64x128xf32> -> vector<64x128xf32>
    %47 = arith.addf %41, %46 : vector<64x128xf32>
    %c1_46 = arith.constant 1 : index
    %c2_47 = arith.constant 2 : index
    %c0_48 = arith.constant 0 : index
    %48 = vector.load %arg9[%c1_46, %c2_47, %c0_48] : memref<10x10x128xbf16, #tpu.memory_space<vmem>>, vector<8x8x128xbf16>
    %49 = vector.shape_cast %48 : vector<8x8x128xbf16> to vector<64x128xbf16>
    %c5 = arith.constant 5 : index
    %c0_49 = arith.constant 0 : index
    %c0_50 = arith.constant 0 : index
    %50 = vector.load %arg3[%c5, %c0_49, %c0_50] : memref<9x128x128xbf16, #tpu.memory_space<vmem>>, vector<1x128x128xbf16>
    %51 = vector.shape_cast %50 : vector<1x128x128xbf16> to vector<128x128xbf16>
    %cst_51 = arith.constant dense<0.000000e+00> : vector<64x128xf32>
    %52 = tpu.matmul %49, %51, %cst_51 {dimension_numbers = #tpu.dot_dimension_numbers<[1], [0], [0], [1], [0, 0, 1, 1], [], []>} : vector<64x128xbf16>, vector<128x128xbf16>, vector<64x128xf32> -> vector<64x128xf32>
    %53 = arith.addf %47, %52 : vector<64x128xf32>
    %c2_52 = arith.constant 2 : index
    %c0_53 = arith.constant 0 : index
    %c0_54 = arith.constant 0 : index
    %54 = vector.load %arg9[%c2_52, %c0_53, %c0_54] : memref<10x10x128xbf16, #tpu.memory_space<vmem>>, vector<8x8x128xbf16>
    %55 = vector.shape_cast %54 : vector<8x8x128xbf16> to vector<64x128xbf16>
    %c6 = arith.constant 6 : index
    %c0_55 = arith.constant 0 : index
    %c0_56 = arith.constant 0 : index
    %56 = vector.load %arg3[%c6, %c0_55, %c0_56] : memref<9x128x128xbf16, #tpu.memory_space<vmem>>, vector<1x128x128xbf16>
    %57 = vector.shape_cast %56 : vector<1x128x128xbf16> to vector<128x128xbf16>
    %cst_57 = arith.constant dense<0.000000e+00> : vector<64x128xf32>
    %58 = tpu.matmul %55, %57, %cst_57 {dimension_numbers = #tpu.dot_dimension_numbers<[1], [0], [0], [1], [0, 0, 1, 1], [], []>} : vector<64x128xbf16>, vector<128x128xbf16>, vector<64x128xf32> -> vector<64x128xf32>
    %59 = arith.addf %53, %58 : vector<64x128xf32>
    %c2_58 = arith.constant 2 : index
    %c1_59 = arith.constant 1 : index
    %c0_60 = arith.constant 0 : index
    %60 = vector.load %arg9[%c2_58, %c1_59, %c0_60] : memref<10x10x128xbf16, #tpu.memory_space<vmem>>, vector<8x8x128xbf16>
    %61 = vector.shape_cast %60 : vector<8x8x128xbf16> to vector<64x128xbf16>
    %c7 = arith.constant 7 : index
    %c0_61 = arith.constant 0 : index
    %c0_62 = arith.constant 0 : index
    %62 = vector.load %arg3[%c7, %c0_61, %c0_62] : memref<9x128x128xbf16, #tpu.memory_space<vmem>>, vector<1x128x128xbf16>
    %63 = vector.shape_cast %62 : vector<1x128x128xbf16> to vector<128x128xbf16>
    %cst_63 = arith.constant dense<0.000000e+00> : vector<64x128xf32>
    %64 = tpu.matmul %61, %63, %cst_63 {dimension_numbers = #tpu.dot_dimension_numbers<[1], [0], [0], [1], [0, 0, 1, 1], [], []>} : vector<64x128xbf16>, vector<128x128xbf16>, vector<64x128xf32> -> vector<64x128xf32>
    %65 = arith.addf %59, %64 : vector<64x128xf32>
    %c2_64 = arith.constant 2 : index
    %c2_65 = arith.constant 2 : index
    %c0_66 = arith.constant 0 : index
    %66 = vector.load %arg9[%c2_64, %c2_65, %c0_66] : memref<10x10x128xbf16, #tpu.memory_space<vmem>>, vector<8x8x128xbf16>
    %67 = vector.shape_cast %66 : vector<8x8x128xbf16> to vector<64x128xbf16>
    %c8 = arith.constant 8 : index
    %c0_67 = arith.constant 0 : index
    %c0_68 = arith.constant 0 : index
    %68 = vector.load %arg3[%c8, %c0_67, %c0_68] : memref<9x128x128xbf16, #tpu.memory_space<vmem>>, vector<1x128x128xbf16>
    %69 = vector.shape_cast %68 : vector<1x128x128xbf16> to vector<128x128xbf16>
    %cst_69 = arith.constant dense<0.000000e+00> : vector<64x128xf32>
    %70 = tpu.matmul %67, %69, %cst_69 {dimension_numbers = #tpu.dot_dimension_numbers<[1], [0], [0], [1], [0, 0, 1, 1], [], []>} : vector<64x128xbf16>, vector<128x128xbf16>, vector<64x128xf32> -> vector<64x128xf32>
    %71 = arith.addf %65, %70 : vector<64x128xf32>
    %72 = arith.truncf %71 : vector<64x128xf32> to vector<64x128xbf16>
    %c0_70 = arith.constant 0 : index
    %c0_71 = arith.constant 0 : index
    %c0_72 = arith.constant 0 : index
    %73 = vector.load %arg6[%c0_70, %c0_71, %c0_72] : memref<1x64x128xbf16, #tpu.memory_space<vmem>>, vector<1x64x128xbf16>
    %74 = vector.shape_cast %73 : vector<1x64x128xbf16> to vector<64x128xbf16>
    %75 = vector.shape_cast %72 : vector<64x128xbf16> to vector<1x64x128xbf16>
    tpu.vector_store %arg6[%c0_70, %c0_71, %c0_72], %75 {strides = array<i32>} : memref<1x64x128xbf16, #tpu.memory_space<vmem>>, vector<1x64x128xbf16>,
    %cst_73 = arith.constant dense<0.000000e+00> : vector<128xf32>
    %76 = vector.multi_reduction <add>, %71, %cst_73 [0] : vector<64x128xf32> to vector<128xf32>
    %77 = vector.shape_cast %76 : vector<128xf32> to vector<1x128xf32>
    %78 = arith.mulf %71, %71 : vector<64x128xf32>
    %cst_74 = arith.constant dense<0.000000e+00> : vector<128xf32>
    %79 = vector.multi_reduction <add>, %78, %cst_74 [0] : vector<64x128xf32> to vector<128xf32>
    %80 = vector.shape_cast %79 : vector<128xf32> to vector<1x128xf32>
    %81 = tpu.concatenate %77, %80 in 0 : vector<1x128xf32>, vector<1x128xf32> -> vector<2x128xf32>
    %c0_75 = arith.constant 0 : index
    %c0_76 = arith.constant 0 : index
    %c0_77 = arith.constant 0 : index
    %82 = vector.load %arg7[%c0_75, %c0_76, %c0_77] : memref<1x2x128xf32, #tpu.memory_space<vmem>>, vector<1x2x128xf32>
    %83 = vector.shape_cast %82 : vector<1x2x128xf32> to vector<2x128xf32>
    %84 = vector.shape_cast %81 : vector<2x128xf32> to vector<1x2x128xf32>
    tpu.vector_store %arg7[%c0_75, %c0_76, %c0_77], %84 {strides = array<i32>} : memref<1x2x128xf32, #tpu.memory_space<vmem>>, vector<1x2x128xf32>,
    %c0_78 = arith.constant 0 : index
    %c0_79 = arith.constant 0 : index
    %c0_80 = arith.constant 0 : index
    %85 = vector.load %arg4[%c0_78, %c0_79, %c0_80] : memref<1x64x4xbf16, #tpu.memory_space<vmem>>, vector<1x64x4xbf16>
    %86 = vector.shape_cast %85 : vector<1x64x4xbf16> to vector<64x4xbf16>
    %c0_81 = arith.constant 0 : index
    %c0_82 = arith.constant 0 : index
    %87 = vector.load %arg5[%c0_81, %c0_82] : memref<4x128xbf16, #tpu.memory_space<vmem>>, vector<4x128xbf16>
    %cst_83 = arith.constant dense<0.000000e+00> : vector<64x128xf32>
    %88 = tpu.matmul %86, %87, %cst_83 {dimension_numbers = #tpu.dot_dimension_numbers<[1], [0], [0], [1], [0, 0, 1, 1], [], []>} : vector<64x4xbf16>, vector<4x128xbf16>, vector<64x128xf32> -> vector<64x128xf32>
    %cst_84 = arith.constant dense<0.000000e+00> : vector<128xf32>
    %89 = vector.multi_reduction <add>, %88, %cst_84 [0] : vector<64x128xf32> to vector<128xf32>
    %90 = vector.shape_cast %89 : vector<128xf32> to vector<1x128xf32>
    %91 = arith.mulf %88, %88 : vector<64x128xf32>
    %cst_85 = arith.constant dense<0.000000e+00> : vector<128xf32>
    %92 = vector.multi_reduction <add>, %91, %cst_85 [0] : vector<64x128xf32> to vector<128xf32>
    %93 = vector.shape_cast %92 : vector<128xf32> to vector<1x128xf32>
    %94 = tpu.concatenate %90, %93 in 0 : vector<1x128xf32>, vector<1x128xf32> -> vector<2x128xf32>
    %c0_86 = arith.constant 0 : index
    %c0_87 = arith.constant 0 : index
    %c0_88 = arith.constant 0 : index
    %95 = vector.load %arg8[%c0_86, %c0_87, %c0_88] : memref<1x2x128xf32, #tpu.memory_space<vmem>>, vector<1x2x128xf32>
    %96 = vector.shape_cast %95 : vector<1x2x128xf32> to vector<2x128xf32>
    %97 = vector.shape_cast %94 : vector<2x128xf32> to vector<1x2x128xf32>
    tpu.vector_store %arg8[%c0_86, %c0_87, %c0_88], %97 {strides = array<i32>} : memref<1x2x128xf32, #tpu.memory_space<vmem>>, vector<1x2x128xf32>,
    return
  }
  func.func @transform_0(%arg0: i32) -> (i32, i32, i32, i32) {
    %c0_i32 = arith.constant 0 : i32
    %c0_i32_0 = arith.constant 0 : i32
    %c0_i32_1 = arith.constant 0 : i32
    %c0_i32_2 = arith.constant 0 : i32
    return %arg0, %c0_i32, %c0_i32_0, %c0_i32_1 : i32, i32, i32, i32
  }
  func.func @transform_1(%arg0: i32) -> (i32, i32) {
    %c0_i32 = arith.constant 0 : i32
    %c0_i32_0 = arith.constant 0 : i32
    %c0_i32_1 = arith.constant 0 : i32
    return %c0_i32, %c0_i32_0 : i32, i32
  }
  func.func @transform_2(%arg0: i32) -> (i32, i32, i32) {
    %c0_i32 = arith.constant 0 : i32
    %c0_i32_0 = arith.constant 0 : i32
    %c0_i32_1 = arith.constant 0 : i32
    %c0_i32_2 = arith.constant 0 : i32
    return %c0_i32, %c0_i32_0, %c0_i32_1 : i32, i32, i32
  }
  func.func @transform_3(%arg0: i32) -> (i32, i32, i32) {
    %c0_i32 = arith.constant 0 : i32
    %c0_i32_0 = arith.constant 0 : i32
    %c0_i32_1 = arith.constant 0 : i32
    return %arg0, %c0_i32, %c0_i32_0 : i32, i32, i32
  }
  func.func @transform_4(%arg0: i32) -> (i32, i32) {
    %c0_i32 = arith.constant 0 : i32
    %c0_i32_0 = arith.constant 0 : i32
    %c0_i32_1 = arith.constant 0 : i32
    return %c0_i32, %c0_i32_0 : i32, i32
  }
  func.func @transform_5(%arg0: i32) -> (i32, i32, i32) {
    %c0_i32 = arith.constant 0 : i32
    %c0_i32_0 = arith.constant 0 : i32
    %c0_i32_1 = arith.constant 0 : i32
    return %arg0, %c0_i32, %c0_i32_0 : i32, i32, i32
  }
  func.func @transform_6(%arg0: i32) -> (i32, i32, i32) {
    %c0_i32 = arith.constant 0 : i32
    %c0_i32_0 = arith.constant 0 : i32
    %c0_i32_1 = arith.constant 0 : i32
    return %arg0, %c0_i32, %c0_i32_0 : i32, i32, i32
  }
  func.func @transform_7(%arg0: i32) -> (i32, i32, i32) {
    %c0_i32 = arith.constant 0 : i32
    %c0_i32_0 = arith.constant 0 : i32
    %c0_i32_1 = arith.constant 0 : i32
    return %arg0, %c0_i32, %c0_i32_0 : i32, i32, i32
  }
}

module attributes {stable_mosaic.version = 11 : i64} {
  func.func @_apply_proj_kernel(%arg0: i32, %arg1: memref<1x64x128xbf16, #tpu.memory_space<vmem>>, %arg2: memref<1x64x4xbf16, #tpu.memory_space<vmem>>, %arg3: memref<4x128xbf16, #tpu.memory_space<vmem>>, %arg4: memref<2x128xf32, #tpu.memory_space<vmem>>, %arg5: memref<2x128xf32, #tpu.memory_space<vmem>>, %arg6: memref<1x64x128xbf16, #tpu.memory_space<vmem>>) attributes {dimension_semantics = [#tpu.dimension_semantics<parallel>], iteration_bounds = array<i64: 2>, scalar_prefetch = 0 : i64, scratch_operands = 0 : i64, tpu.core_type = #tpu.core_type<tc>, window_params = [{transform_indices = @transform_0, window_bounds = array<i64: 1, 64, 128>}, {transform_indices = @transform_1, window_bounds = array<i64: 1, 64, 4>}, {pipeline_mode = #tpu.pipeline_mode<synchronous>, transform_indices = @transform_2, window_bounds = array<i64: 4, 128>}, {pipeline_mode = #tpu.pipeline_mode<synchronous>, transform_indices = @transform_3, window_bounds = array<i64: 2, 128>}, {pipeline_mode = #tpu.pipeline_mode<synchronous>, transform_indices = @transform_4, window_bounds = array<i64: 2, 128>}, {transform_indices = @transform_5, window_bounds = array<i64: 1, 64, 128>}]} {
    %c0 = arith.constant 0 : index
    %c0_0 = arith.constant 0 : index
    %c0_1 = arith.constant 0 : index
    %0 = vector.load %arg1[%c0, %c0_0, %c0_1] : memref<1x64x128xbf16, #tpu.memory_space<vmem>>, vector<1x64x128xbf16>
    %1 = vector.shape_cast %0 : vector<1x64x128xbf16> to vector<64x128xbf16>
    %2 = arith.extf %1 : vector<64x128xbf16> to vector<64x128xf32>
    %c0_2 = arith.constant 0 : index
    %c0_3 = arith.constant 0 : index
    %3 = vector.load %arg4[%c0_2, %c0_3] : memref<2x128xf32, #tpu.memory_space<vmem>>, vector<1x128xf32>
    %4 = vector.broadcast %3 : vector<1x128xf32> to vector<64x128xf32>
    %5 = arith.mulf %2, %4 : vector<64x128xf32>
    %c1 = arith.constant 1 : index
    %c0_4 = arith.constant 0 : index
    %6 = vector.load %arg4[%c1, %c0_4] : memref<2x128xf32, #tpu.memory_space<vmem>>, vector<1x128xf32>
    %7 = vector.broadcast %6 : vector<1x128xf32> to vector<64x128xf32>
    %8 = arith.addf %5, %7 : vector<64x128xf32>
    %c0_5 = arith.constant 0 : index
    %c0_6 = arith.constant 0 : index
    %c0_7 = arith.constant 0 : index
    %9 = vector.load %arg2[%c0_5, %c0_6, %c0_7] : memref<1x64x4xbf16, #tpu.memory_space<vmem>>, vector<1x64x4xbf16>
    %10 = vector.shape_cast %9 : vector<1x64x4xbf16> to vector<64x4xbf16>
    %c0_8 = arith.constant 0 : index
    %c0_9 = arith.constant 0 : index
    %11 = vector.load %arg3[%c0_8, %c0_9] : memref<4x128xbf16, #tpu.memory_space<vmem>>, vector<4x128xbf16>
    %cst = arith.constant dense<0.000000e+00> : vector<64x128xf32>
    %12 = tpu.matmul %10, %11, %cst {dimension_numbers = #tpu.dot_dimension_numbers<[1], [0], [0], [1], [0, 0, 1, 1], [], []>} : vector<64x4xbf16>, vector<4x128xbf16>, vector<64x128xf32> -> vector<64x128xf32>
    %c0_10 = arith.constant 0 : index
    %c0_11 = arith.constant 0 : index
    %13 = vector.load %arg5[%c0_10, %c0_11] : memref<2x128xf32, #tpu.memory_space<vmem>>, vector<1x128xf32>
    %14 = vector.broadcast %13 : vector<1x128xf32> to vector<64x128xf32>
    %15 = arith.mulf %12, %14 : vector<64x128xf32>
    %16 = arith.addf %8, %15 : vector<64x128xf32>
    %c1_12 = arith.constant 1 : index
    %c0_13 = arith.constant 0 : index
    %17 = vector.load %arg5[%c1_12, %c0_13] : memref<2x128xf32, #tpu.memory_space<vmem>>, vector<1x128xf32>
    %18 = vector.broadcast %17 : vector<1x128xf32> to vector<64x128xf32>
    %19 = arith.addf %16, %18 : vector<64x128xf32>
    %cst_14 = arith.constant 0.000000e+00 : f32
    %20 = vector.broadcast %cst_14 : f32 to vector<64x128xf32>
    %21 = arith.maximumf %19, %20 : vector<64x128xf32>
    %22 = arith.truncf %21 : vector<64x128xf32> to vector<64x128xbf16>
    %c0_15 = arith.constant 0 : index
    %c0_16 = arith.constant 0 : index
    %c0_17 = arith.constant 0 : index
    %23 = vector.load %arg6[%c0_15, %c0_16, %c0_17] : memref<1x64x128xbf16, #tpu.memory_space<vmem>>, vector<1x64x128xbf16>
    %24 = vector.shape_cast %23 : vector<1x64x128xbf16> to vector<64x128xbf16>
    %25 = vector.shape_cast %22 : vector<64x128xbf16> to vector<1x64x128xbf16>
    tpu.vector_store %arg6[%c0_15, %c0_16, %c0_17], %25 {strides = array<i32>} : memref<1x64x128xbf16, #tpu.memory_space<vmem>>, vector<1x64x128xbf16>,
    return
  }
  func.func @transform_0(%arg0: i32) -> (i32, i32, i32) {
    %c0_i32 = arith.constant 0 : i32
    %c0_i32_0 = arith.constant 0 : i32
    %c0_i32_1 = arith.constant 0 : i32
    return %arg0, %c0_i32, %c0_i32_0 : i32, i32, i32
  }
  func.func @transform_1(%arg0: i32) -> (i32, i32, i32) {
    %c0_i32 = arith.constant 0 : i32
    %c0_i32_0 = arith.constant 0 : i32
    %c0_i32_1 = arith.constant 0 : i32
    return %arg0, %c0_i32, %c0_i32_0 : i32, i32, i32
  }
  func.func @transform_2(%arg0: i32) -> (i32, i32) {
    %c0_i32 = arith.constant 0 : i32
    %c0_i32_0 = arith.constant 0 : i32
    %c0_i32_1 = arith.constant 0 : i32
    return %c0_i32, %c0_i32_0 : i32, i32
  }
  func.func @transform_3(%arg0: i32) -> (i32, i32) {
    %c0_i32 = arith.constant 0 : i32
    %c0_i32_0 = arith.constant 0 : i32
    %c0_i32_1 = arith.constant 0 : i32
    return %c0_i32, %c0_i32_0 : i32, i32
  }
  func.func @transform_4(%arg0: i32) -> (i32, i32) {
    %c0_i32 = arith.constant 0 : i32
    %c0_i32_0 = arith.constant 0 : i32
    %c0_i32_1 = arith.constant 0 : i32
    return %c0_i32, %c0_i32_0 : i32, i32
  }
  func.func @transform_5(%arg0: i32) -> (i32, i32, i32) {
    %c0_i32 = arith.constant 0 : i32
    %c0_i32_0 = arith.constant 0 : i32
    %c0_i32_1 = arith.constant 0 : i32
    return %arg0, %c0_i32, %c0_i32_0 : i32, i32, i32
  }
}

</mosaic_0001>

<bundles_post_ra>
// kernel: basic_block_forward.5
= control target key start
LH: loop header
LB: loop body
LE: loop exit
PB: predicated region body
PF: predicated region fallthrough
CT: control target
= control target key end

     0   :  { %s703_s18 = smov 0   ;;  %s743_s0 = inlined_call_operand.vmem [shape: bf16[2,64,128], index: 0, kind: input, shape index: {}]   ;;  %s744_s1 = inlined_call_operand.vmem [shape: bf16[2,64,4], index: 1, kind: input, shape index: {}]   ;;  %s745_s2 = inlined_call_operand.vmem [shape: bf16[4,128], index: 2, kind: input, shape index: {}]   ;;  %s746_s3 = inlined_call_operand.vmem [shape: f32[2,128], index: 3, kind: input, shape index: {}]   ;;  %s747_s4 = inlined_call_operand.vmem [shape: f32[2,128], index: 4, kind: input, shape index: {}]   ;;  %s748_s5 = inlined_call_operand.vmem [shape: bf16[2,64,128], index: 5, kind: output, shape index: {}]  }
   0x1 LB: > { %s548_s19 = sadd.s32 4294967295, %s671_s18   ;;  %p552_p0 = scmp.ge.s32.totalorder %s671_s18, 1  ;;  %s671_s18 = sphi %s703_s18, %s15_s18  }
   0x2   : > { %p197_p1 = scmp.lt.s32.totalorder %s671_s18, 3 }
   0x4   : > { %p198_p2 = pnand %p552_p0, %p197_p1 }
   0x5   : > { %p230_p3 = scmp.lt.s32.totalorder (!%p198_p2), %s548_s19, 1 }
   0x6   : > { %201 = sbr.rel (%p198_p2) target bundleno = 226 (0xe2), region = 40 }
   0xb   : > { %v296_v0 = vld [vmem:[%s745_s2] sm:$0x3]  ;;  %vm330_vm0 = vcmask 1041408   ;;  %s750_s19 = smov (!%p230_p3, %s548_s19), 1  ;;  %vm317_vm1 = vcmask 31744  }
   0xc   : > { %651 = vmatprep.subr.msk.bf16.mxu0 %vm330_vm0, %v296_v0  ;;  %652 = vmatprep.subr.msk.bf16.mxu1 %vm330_vm0, %v296_v0  ;;  %v332_v1 = vsel %vm330_vm0, %v296_v0, 0  ;;  %s714_s22 = sshll.u32 %s750_s19, 5  ;;  %v559_v11 = vld [vmem:[%s746_s3] ss:$0 sm:$0xff]  ;;  %v560_v17 = vld [vmem:[%s746_s3 + $0x1] ss:$0 sm:$0xff] }
   0xd   : > { %640 = vmatpush3.bf16.msra.mxu0 %v332_v1  ;;  %650 = vmatpush3.bf16.msra.mxu1 %v332_v1  ;;  %s239_s25 = scalar_lea.vmem %s744_s1, %s714_s22  ;;  %s234_s28 = scalar_lea.vmem %s743_s0, %s714_s22  ;;  %v569_v22 = vld [vmem:[%s747_s4] ss:$0 sm:$0xff]  ;;  %v570_v42 = vld [vmem:[%s747_s4 + $0x1] ss:$0 sm:$0xff] }
   0xe   : > { %v661_v2 = vld [vmem:[%s239_s25] sm:$0xff]   ;;  %v662_v3 = vld [vmem:[%s239_s25 + $0x10] sm:$0xff]   ;;  %v663_v4 = vld [vmem:[%s239_s25 + $0x8] sm:$0xff]   ;;  %s244_s14 = scalar_lea.vmem %s748_s5, %s714_s22 }
   0xf   : > { %641 = vmatprep.mubr.msk.bf16.mxu0 %vm317_vm1, %v661_v2  ;;  %645 = vmatprep.mubr.msk.bf16.mxu1 %vm317_vm1, %v662_v3  ;;  %v664_v5 = vld [vmem:[%s239_s25 + $0x18] sm:$0xff]   ;;  %v628_v6 = vld [vmem:[%s234_s28 + $0x8] sm:$0xff]   ;;  %v593_v8 = vld [vmem:[%s234_s28] sm:$0xff]  }
  0x10   : > { %642 = vmatmul.mubr.msk.bf16.vlgmr.msra.gmra.mxu0 %vm317_vm1, %v663_v4  ;;  %646 = vmatmul.mubr.msk.bf16.vlgmr.msra.gmra.mxu1 %vm317_vm1, %v664_v5  ;;  %v630_v7 = vld [vmem:[%s234_s28 + $0x18] sm:$0xff]   ;;  %v598_v9 = vunpack.c.l.bf16 %v628_v6  ;;  %v629_v10 = vld [vmem:[%s234_s28 + $0x10] sm:$0xff]   ;;  %v594_v13 = vunpack.c.l.bf16 %v593_v8  ;;  %v599_v16 = vunpack.c.h.bf16 %v628_v6  ;;  %v595_v21 = vunpack.c.h.bf16 %v593_v8 }
  0x11   : > { %v606_v12 = vunpack.c.l.bf16 %v630_v7  ;;  %v602_v14 = vunpack.c.l.bf16 %v629_v10  ;;  %v607_v19 = vunpack.c.h.bf16 %v630_v7  ;;  %v603_v24 = vunpack.c.h.bf16 %v629_v10 }
  0x12   : > { %v269_v15 = vmul.f32 %v598_v9, %v559_v11  ;;  %v267_v20 = vmul.f32 %v594_v13, %v559_v11  ;;  %v270_v26 = vmul.f32 %v599_v16, %v559_v11  ;;  %v268_v33 = vmul.f32 %v595_v21, %v559_v11 }
  0x13   : > { %v273_v18 = vmul.f32 %v606_v12, %v559_v11  ;;  %v271_v23 = vmul.f32 %v602_v14, %v559_v11  ;;  %v274_v29 = vmul.f32 %v607_v19, %v559_v11  ;;  %v272_v37 = vmul.f32 %v603_v24, %v559_v11 }
  0x14   : > { %v282_v25 = vadd.f32 %v560_v17, %v269_v15  ;;  %v280_v32 = vadd.f32 %v560_v17, %v267_v20  ;;  %v283_v41 = vadd.f32 %v560_v17, %v270_v26  ;;  %v281_v50 = vadd.f32 %v560_v17, %v268_v33 }
  0x15   : > { %v286_v28 = vadd.f32 %v560_v17, %v273_v18  ;;  %v284_v36 = vadd.f32 %v560_v17, %v271_v23  ;;  %v287_v46 = vadd.f32 %v560_v17, %v274_v29  ;;  %v285_v54 = vadd.f32 %v560_v17, %v272_v37 }
  0xd0   : > { %v643_v27 = vpop.f32.mrf.mxu0  ;;  %v647_v31 = vpop.f32.mrf.mxu1 }
  0xd1   : > { %v406_v30 = vmul.f32 %v643_v27, %v569_v22  ;;  %v410_v34 = vmul.f32 %v647_v31, %v569_v22 }
  0xd2   : > { %v368_v35 = vpop.f32.mrf.mxu0  ;;  %v384_v40 = vpop.f32.mrf.mxu1 }
  0xd3   : > { %v414_v38 = vadd.f32 %v406_v30, %v282_v25  ;;  %v404_v39 = vmul.f32 %v569_v22, %v368_v35  ;;  %v418_v43 = vadd.f32 %v410_v34, %v286_v28  ;;  %v408_v44 = vmul.f32 %v569_v22, %v384_v40 }
  0xd4   : > { %v644_v45 = vpop.f32.mrf.mxu0  ;;  %v648_v49 = vpop.f32.mrf.mxu1 }
  0xd5   : > { %v412_v47 = vadd.f32 %v404_v39, %v280_v32  ;;  %v407_v48 = vmul.f32 %v644_v45, %v569_v22  ;;  %v416_v51 = vadd.f32 %v408_v44, %v284_v36  ;;  %v411_v52 = vmul.f32 %v648_v49, %v569_v22 }
  0xd6   : > { %v371_v53 = vpop.f32.mrf.mxu0  ;;  %v427_v55 = vadd.f32 %v570_v42, %v414_v38  ;;  %v387_v58 = vpop.f32.mrf.mxu1  ;;  %v431_v59 = vadd.f32 %v570_v42, %v418_v43 }
  0xd7   : > { %v415_v56 = vadd.f32 %v407_v48, %v283_v41  ;;  %v405_v57 = vmul.f32 %v569_v22, %v371_v53  ;;  %v419_v60 = vadd.f32 %v411_v52, %v287_v46  ;;  %v409_v61 = vmul.f32 %v569_v22, %v387_v58 }
  0xd8   : > { %v425_v62 = vadd.f32 %v570_v42, %v412_v47  ;;  %v429_v1 = vadd.f32 %v570_v42, %v416_v51  ;;  %v435_v4 = vmax.f32 %v427_v55, 0.0  ;;  %v439_v7 = vmax.f32 %v431_v59, 0.0 }
  0xd9   : > { %v428_v63 = vadd.f32 %v570_v42, %v415_v56  ;;  %v413_v0 = vadd.f32 %v405_v57, %v281_v50  ;;  %v432_v2 = vadd.f32 %v570_v42, %v419_v60  ;;  %v417_v3 = vadd.f32 %v409_v61, %v285_v54 }
  0xda   : > { %v433_v10 = vmax.f32 %v425_v62, 0.0  ;;  %v437_v13 = vmax.f32 %v429_v1, 0.0 }
  0xdb   : > { %v436_v5 = vmax.f32 %v428_v63, 0.0  ;;  %v426_v6 = vadd.f32 %v570_v42, %v413_v0  ;;  %v440_v8 = vmax.f32 %v432_v2, 0.0  ;;  %v430_v9 = vadd.f32 %v570_v42, %v417_v3 }
  0xdd   : > { %v616_v11 = vpack.c.bf16 %v436_v5, %v435_v4  ;;  %v434_v12 = vmax.f32 %v426_v6, 0.0  ;;  %v626_v14 = vpack.c.bf16 %v440_v8, %v439_v7  ;;  %v438_v15 = vmax.f32 %v430_v9, 0.0 }
  0xdf   : > { %631 = vst [vmem:[%s244_s14 + $0x8] sm:$0xff] %v616_v11   ;;  %v611_v16 = vpack.c.bf16 %v434_v12, %v433_v10  ;;  %633 = vst [vmem:[%s244_s14 + $0x18] sm:$0xff] %v626_v14   ;;  %v621_v17 = vpack.c.bf16 %v438_v15, %v437_v13 }
  0xe1   : > { %612 = vst [vmem:[%s244_s14] sm:$0xff] %v611_v16   ;;  %632 = vst [vmem:[%s244_s14 + $0x10] sm:$0xff] %v621_v17  }
  0xe2 PF: > { %s15_s18 = sadd.s32 1, %s671_s18  }
  0xe3   : > { %p12_p4 = scmp.ge.s32.totalorder %s15_s18, 4  }
  0xe5   :  { %14 = sbr.rel (!%p12_p4) target bundleno = 1 (0x1), region = 73 }

// kernel: basic_block_forward.3
= control target key start
LH: loop header
LB: loop body
LE: loop exit
PB: predicated region body
PF: predicated region fallthrough
CT: control target
= control target key end

     0   :  { %s2108_s12 = smov 0   ;;  %s2372_s0 = inlined_call_operand.vmem [shape: bf16[2,36,9,4], index: 0, kind: input, shape index: {}]   ;;  %s2373_s1 = inlined_call_operand.vmem [shape: bf16[9,4,128], index: 1, kind: input, shape index: {}]   ;;  %s2374_s2 = inlined_call_operand.vmem [shape: bf16[2,8,8,128], index: 2, kind: output, shape index: {0}]   ;;  %s2375_s3 = inlined_call_operand.vmem [shape: f32[2,2,128], index: 3, kind: output, shape index: {1}]  }
   0x1 LB: > { %s1713_s13 = sadd.s32 4294967295, %s2086_s12   ;;  %p1717_p0 = scmp.ge.s32.totalorder %s2086_s12, 1  ;;  %s2086_s12 = sphi %s2108_s12, %s14_s12  }
   0x2   : > { %p140_p1 = scmp.lt.s32.totalorder %s2086_s12, 3 }
   0x4   : > { %p141_p2 = pnand %p1717_p0, %p140_p1 }
   0x5   : > { %p168_p3 = scmp.lt.s32.totalorder (!%p141_p2), %s1713_s13, 1 }
   0x6   : > { %144 = sbr.rel (%p141_p2) target bundleno = 315 (0x13b), region = 28 }
   0xb   : > { %v1730_v0 = vld [vmem:[%s2373_s1 + $0x2] sm:$0x3]  ;;  %vm236_vm0 = vcmask 1041408   ;;  %v191_v2 = vld [vmem:[%s2373_s1] sm:$0x3]  ;;  %s2379_s13 = smov (!%p168_p3, %s1713_s13), 1 }
   0xc   : > { %2038 = vmatprep.subr.msk.bf16.mxu1 %vm236_vm0, %v1730_v0  ;;  %2037 = vmatprep.subr.msk.bf16.mxu0 %vm236_vm0, %v1730_v0  ;;  %v238_v1 = vsel %vm236_vm0, %v1730_v0, 0  ;;  %v1747_v3 = vld [vmem:[%s2373_s1 + $0x4] sm:$0x3]  ;;  %s2047_s20 = smul.u32 288, %s2379_s13  ;;  %vm223_vm1 = vcmask 31744   ;;  %v338_v4 = vsel %vm236_vm0, %v191_v2, 0 }
   0xd   : > { %2036 = vmatpush3.bf16.msra.mxu1 %v238_v1  ;;  %1946 = vmatpush3.bf16.msra.mxu0 %v238_v1  ;;  %v563_v5 = vsel %vm236_vm0, %v1747_v3, 0  ;;  %v1764_v7 = vld [vmem:[%s2373_s1 + $0x6] sm:$0x3]  ;;  %v1781_v8 = vld [vmem:[%s2373_s1 + $0x8] sm:$0x3]  ;;  %s1876_s9 = sshll.u32 %s2379_s13, 5 }
   0xe   : > { %2039 = vmatprep.subr.msk.bf16.mxu1 %vm236_vm0, %v191_v2  ;;  %2040 = vmatprep.subr.msk.bf16.mxu0 %vm236_vm0, %v1747_v3  ;;  %s2136_s23 = scalar_lea.vmem %s2372_s0, %s2047_s20  ;;  %vm421_vm2 = vsmask.f32 3328  ;;  %vm422_vm3 = vsmask.f32 7440  ;;  %v682_v13 = vsel %vm236_vm0, %v1764_v7, 0  ;;  %v2157_v14 = vsel %vm236_vm0, %v1781_v8, 0  ;;  %s2359_s14 = scalar_lea.vmem %s2374_s2, %s1876_s9 }
   0xf   : > { %v2056_v6 = vld [vmem:[%s2136_s23 + $0x48] ss:$8 sps:$4 sm:$0xff]   ;;  %v2058_v10 = vld [vmem:[%s2136_s23 + $0x58] ss:$8 sps:$4 sm:$0xff]   ;;  %v406_v16 = vld [vmem:[%s2136_s23 + $0x4] sm:$0x1] }
  0x10   : > { %v2057_v9 = vld [vmem:[%s2136_s23 + $0x68] ss:$8 sps:$4 sm:$0xff]   ;;  %1947 = vmatprep.mubr.msk.bf16.mxu0 %vm223_vm1, %v2056_v6  ;;  %v2059_v11 = vld [vmem:[%s2136_s23 + $0x78] ss:$8 sps:$4 sm:$0xff]   ;;  %v408_v19 = vld [vmem:[%s2136_s23 + $0xc] sm:$0x1] }
  0x11   : > { %1951 = vmatprep.mubr.msk.bf16.mxu1 %vm223_vm1, %v2057_v9  ;;  %1948 = vmatmul.mubr.msk.bf16.vlgmr.msra.gmra.mxu0 %vm223_vm1, %v2058_v10  ;;  %v2060_v12 = vld [vmem:[%s2136_s23] ss:$8 sps:$4 sm:$0xff]   ;;  %v2061_v18 = vld [vmem:[%s2136_s23 + $0x10] ss:$8 sps:$4 sm:$0xff]   ;;  %v434_v22 = vshll.u32 %v406_v16, 16  ;;  %v448_v25 = vshll.u32 %v408_v19, 16  ;;  %vm2178_vm4 = vmor %vm421_vm2, %vm422_vm3 }
  0x12   : > { %1952 = vmatmul.mubr.msk.bf16.vlgmr.msra.gmra.mxu1 %vm223_vm1, %v2059_v11  ;;  %1966 = vmatpush3.bf16.msra.mxu0 %v563_v5  ;;  %v405_v15 = vld [vmem:[%s2136_s23] sm:$0xf]  ;;  %v407_v17 = vld [vmem:[%s2136_s23 + $0x8] sm:$0xf]  ;;  %v409_v26 = vld [vmem:[%s2136_s23 + $0x10] sm:$0xf] }
  0x13   : > { %1956 = vmatpush3.bf16.msra.mxu1 %v338_v4  ;;  %1957 = vmatprep.mubr.msk.bf16.mxu1 %vm223_vm1, %v2060_v12  ;;  %v425_v20 = vshrl.u32 %v405_v15, 16  ;;  %v428_v21 = vshll.u32 %v405_v15, 16  ;;  %v439_v23 = vshrl.u32 %v407_v17, 16  ;;  %v442_v24 = vshll.u32 %v407_v17, 16  ;;  %v410_v27 = vld [vmem:[%s2136_s23 + $0x14] sm:$0x1] }
  0x14   : > { %2041 = vmatprep.subr.msk.bf16.mxu1 %vm236_vm0, %v1764_v7  ;;  %2042 = vmatprep.subr.msk.bf16.mxu0 %vm236_vm0, %v1781_v8  ;;  %v436_v30 = vrot.slane %v434_v22, 5  ;;  %v411_v32 = vld [vmem:[%s2136_s23 + $0x18] sm:$0xf]  ;;  %v450_v34 = vrot.slane %v448_v25, 5  ;;  %v412_v35 = vld [vmem:[%s2136_s23 + $0x1c] sm:$0x1] }
  0x15   : > { %v427_v28 = vrot.slane %v425_v20, 4  ;;  %v430_v29 = vrot.slane %v428_v21, 5  ;;  %v441_v31 = vrot.slane %v439_v23, 4  ;;  %v444_v33 = vrot.slane %v442_v24, 5  ;;  %v2174_v38 = vld [vmem:[%s2373_s1 + $0xa] sm:$0x3] }
  0x16   : > { %v453_v36 = vshrl.u32 %v409_v26, 16  ;;  %v456_v37 = vshll.u32 %v409_v26, 16  ;;  %v462_v40 = vshll.u32 %v410_v27, 16  ;;  %v467_v41 = vshrl.u32 %v411_v32, 16  ;;  %v2062_v52 = vld [vmem:[%s2136_s23 + $0x20] ss:$8 sps:$4 sm:$0xff]  }
  0x17   : > { %v431_v39 = vor.u32 %v430_v29, %v427_v28  ;;  %v470_v42 = vshll.u32 %v411_v32, 16  ;;  %v445_v44 = vor.u32 %v444_v33, %v441_v31  ;;  %v476_v47 = vshll.u32 %v412_v35, 16  ;;  %v2063_v58 = vld [vmem:[%s2136_s23 + $0x30] ss:$8 sps:$4 sm:$0xff]   ;;  %v413_v59 = vld [vmem:[%s2136_s23 + $0x20] sm:$0xf] }
  0x18   : > { %v455_v45 = vrot.slane %v453_v36, 4  ;;  %v458_v46 = vrot.slane %v456_v37, 5  ;;  %v464_v49 = vrot.slane %v462_v40, 5  ;;  %v469_v50 = vrot.slane %v467_v41, 4  ;;  %v414_v60 = vld [vmem:[%s2136_s23 + $0x24] sm:$0x1] }
  0x19   : > { %v432_v48 = vrot.slane %v431_v39, 4  ;;  %v472_v51 = vrot.slane %v470_v42, 5  ;;  %v446_v53 = vrot.slane %v445_v44, 4  ;;  %v478_v55 = vrot.slane %v476_v47, 5  ;;  %v415_v63 = vld [vmem:[%s2136_s23 + $0x28] sm:$0xf] }
  0x1a   : > { %1958 = vmatmul.mubr.msk.bf16.vlgmr.msra.gmra.mxu1 %vm223_vm1, %v2061_v18  ;;  %v459_v54 = vor.u32 %v458_v46, %v455_v45  ;;  %v416_v0 = vld [vmem:[%s2136_s23 + $0x2c] sm:$0x1]  ;;  %v481_v1 = vshrl.u32 %v413_v59, 16  ;;  %v484_v4 = vshll.u32 %v413_v59, 16  ;;  %v490_v5 = vshll.u32 %v414_v60, 16  ;;  %s1721_s15 = sshll.u32 %s2379_s13, 1 }
  0x1b   : > { %1976 = vmatpush3.bf16.msra.mxu1 %v682_v13  ;;  %v437_v56 = vsel %vm2178_vm4, %v432_v48, %v436_v30  ;;  %v473_v57 = vor.u32 %v472_v51, %v469_v50  ;;  %1961 = vmatprep.mubr.msk.bf16.mxu1 %vm223_vm1, %v2062_v52  ;;  %v451_v61 = vsel %vm2178_vm4, %v446_v53, %v450_v34  ;;  %v417_v6 = vld [vmem:[%s2136_s23 + $0x30] sm:$0xf]  ;;  %v495_v9 = vshrl.u32 %v415_v63, 16  ;;  %v418_v11 = vld [vmem:[%s2136_s23 + $0x34] sm:$0x1]  ;;  %s181_s18 = scalar_lea.vmem %s2375_s3, %s1721_s15 }
  0x1c   : > { %2043 = vmatprep.subr.msk.bf16.mxu1 %vm236_vm0, %v2174_v38  ;;  %v460_v62 = vrot.slane %v459_v54, 4  ;;  %v1748_v2 = vcombine.low %v437_v56, %v451_v61  ;;  %v483_v8 = vrot.slane %v481_v1, 4  ;;  %v498_v10 = vshll.u32 %v415_v63, 16  ;;  %v419_v17 = vld [vmem:[%s2136_s23 + $0x38] sm:$0xf] }
  0x1d   : > { %v474_v3 = vrot.slane %v473_v57, 4  ;;  %v486_v13 = vrot.slane %v484_v4, 5  ;;  %v492_v15 = vrot.slane %v490_v5, 5  ;;  %v504_v16 = vshll.u32 %v416_v0, 16  ;;  %v1823_v18 = vld [vmem:[%s2373_s1 + $0xc] sm:$0x3] }
  0x1e   : > { %v465_v7 = vsel %vm2178_vm4, %v460_v62, %v464_v49  ;;  %1967 = vmatprep.mubr.msk.bf16.mxu0 %vm223_vm1, %v1748_v2  ;;  %v497_v20 = vrot.slane %v495_v9, 4  ;;  %v500_v21 = vrot.slane %v498_v10, 5  ;;  %v420_v22 = vld [vmem:[%s2136_s23 + $0x3c] sm:$0x1]  ;;  %v509_v23 = vshrl.u32 %v417_v6, 16 }
  0x1f   : > { %v479_v12 = vsel %vm2178_vm4, %v474_v3, %v478_v55  ;;  %v487_v24 = vor.u32 %v486_v13, %v483_v8  ;;  %v506_v25 = vrot.slane %v504_v16, 5  ;;  %v512_v26 = vshll.u32 %v417_v6, 16  ;;  %v2064_v35 = vld [vmem:[%s2136_s23 + $0x90] ss:$8 sps:$4 sm:$0xff]   ;;  %v2065_v44 = vld [vmem:[%s2136_s23 + $0xa0] ss:$8 sps:$4 sm:$0xff]  }
  0x20   : > { %v1749_v19 = vcombine.low %v465_v7, %v479_v12  ;;  %v518_v27 = vshll.u32 %v418_v11, 16  ;;  %v501_v28 = vor.u32 %v500_v21, %v497_v20  ;;  %v511_v29 = vrot.slane %v509_v23, 4  ;;  %v1840_v51 = vld [vmem:[%s2373_s1 + $0xe] sm:$0x3]  ;;  %v2068_v53 = vld [vmem:[%s2136_s23 + $0xb0] ss:$8 sps:$4 sm:$0xff]  }
  0x21   : > { %v523_v30 = vshrl.u32 %v419_v17, 16  ;;  %v526_v31 = vshll.u32 %v419_v17, 16  ;;  %v488_v32 = vrot.slane %v487_v24, 4  ;;  %v514_v33 = vrot.slane %v512_v26, 5  ;;  %v2069_v57 = vld [vmem:[%s2136_s23 + $0xc0] ss:$8 sps:$4 sm:$0xff]  }
  0x22   : > { %1962 = vmatmul.mubr.msk.bf16.gmra.mxu1 %vm223_vm1, %v2063_v58  ;;  %1968 = vmatmul.mubr.msk.bf16.vlgmr.msra.gmra.mxu0 %vm223_vm1, %v1749_v19  ;;  %v532_v34 = vshll.u32 %v420_v22, 16  ;;  %v502_v36 = vrot.slane %v501_v28, 4  ;;  %v520_v42 = vrot.slane %v518_v27, 5  ;;  %v1031_v49 = vsel %vm236_vm0, %v2174_v38, 0  ;;  %v2066_v38 = vld [vmem:[%s2136_s23 + $0xd8] ss:$8 sps:$4 sm:$0xff]  }
  0x23   : > { %1986 = vmatpush3.bf16.msra.mxu0 %v2157_v14  ;;  %v525_v37 = vrot.slane %v523_v30, 4  ;;  %v528_v39 = vrot.slane %v526_v31, 5  ;;  %v493_v40 = vsel %vm2178_vm4, %v488_v32, %v492_v15  ;;  %v515_v41 = vor.u32 %v514_v33, %v511_v29  ;;  %1977 = vmatprep.mubr.msk.bf16.mxu1 %vm223_vm1, %v2064_v35  ;;  %v1790_v58 = vld [vmem:[%s2136_s23 + $0x90] sm:$0xf]  ;;  %v1791_v59 = vld [vmem:[%s2136_s23 + $0x94] sm:$0x1] }
  0x24   : > { %2044 = vmatprep.subr.msk.bf16.mxu0 %vm236_vm0, %v1823_v18  ;;  %v507_v14 = vsel %vm2178_vm4, %v502_v36, %v506_v25  ;;  %v534_v46 = vrot.slane %v532_v34, 5  ;;  %v1150_v56 = vsel %vm236_vm0, %v1823_v18, 0  ;;  %v1792_v60 = vld [vmem:[%s2136_s23 + $0x98] sm:$0xf]  ;;  %v1793_v61 = vld [vmem:[%s2136_s23 + $0x9c] sm:$0x1] }
  0x25   : > { %v529_v45 = vor.u32 %v528_v39, %v525_v37  ;;  %v1750_v47 = vcombine.low %v493_v40, %v507_v14  ;;  %v516_v48 = vrot.slane %v515_v41, 4  ;;  %v893_v62 = vshrl.u32 %v1790_v58, 16  ;;  %v1794_v2 = vld [vmem:[%s2136_s23 + $0xa0] sm:$0xf]  ;;  %v2067_v3 = vld [vmem:[%s2136_s23 + $0xe8] ss:$8 sps:$4 sm:$0xff]  }
  0x26   : > { %v896_v63 = vshll.u32 %v1790_v58, 16  ;;  %v902_v0 = vshll.u32 %v1791_v59, 16  ;;  %v907_v1 = vshrl.u32 %v1792_v60, 16  ;;  %v910_v4 = vshll.u32 %v1792_v60, 16  ;;  %v1795_v6 = vld [vmem:[%s2136_s23 + $0xa4] sm:$0x1] }
  0x27   : > { %v530_v50 = vrot.slane %v529_v45, 4  ;;  %1971 = vmatprep.mubr.msk.bf16.mxu0 %vm223_vm1, %v1750_v47  ;;  %v521_v52 = vsel %vm2178_vm4, %v516_v48, %v520_v42  ;;  %v916_v5 = vshll.u32 %v1793_v61, 16  ;;  %v1796_v7 = vld [vmem:[%s2136_s23 + $0xa8] sm:$0xf]  ;;  %v2070_v8 = vld [vmem:[%s2136_s23 + $0xf8] ss:$8 sps:$4 sm:$0xff]  }
  0x28   : > { %v895_v9 = vrot.slane %v893_v62, 4  ;;  %v898_v10 = vrot.slane %v896_v63, 5  ;;  %v904_v11 = vrot.slane %v902_v0, 5  ;;  %v909_v12 = vrot.slane %v907_v1, 4  ;;  %v1797_v13 = vld [vmem:[%s2136_s23 + $0xac] sm:$0x1] }
  0x29   : > { %v535_v54 = vsel %vm2178_vm4, %v530_v50, %v534_v46  ;;  %v912_v15 = vrot.slane %v910_v4, 5  ;;  %v918_v16 = vrot.slane %v916_v5, 5  ;;  %v921_v17 = vshrl.u32 %v1794_v2, 16  ;;  %v2252_v27 = vld [vmem:[%s2373_s1 + $0x10] sm:$0x3] }
  0x2a   : > { %1978 = vmatmul.mubr.msk.bf16.vlgmr.msra.gmra.mxu1 %vm223_vm1, %v2065_v44  ;;  %v1751_v55 = vcombine.low %v521_v52, %v535_v54  ;;  %v924_v18 = vshll.u32 %v1794_v2, 16  ;;  %v899_v19 = vor.u32 %v898_v10, %v895_v9  ;;  %v930_v20 = vshll.u32 %v1795_v6, 16  ;;  %v1798_v39 = vld [vmem:[%s2136_s23 + $0xb0] sm:$0xf]  ;;  %v1799_v40 = vld [vmem:[%s2136_s23 + $0xb4] sm:$0x1] }
  0x2b   : > { %1996 = vmatpush3.bf16.msra.mxu1 %v1031_v49  ;;  %1981 = vmatprep.mubr.msk.bf16.mxu1 %vm223_vm1, %v2068_v53  ;;  %v935_v21 = vshrl.u32 %v1796_v7, 16  ;;  %v938_v22 = vshll.u32 %v1796_v7, 16  ;;  %v913_v23 = vor.u32 %v912_v15, %v909_v12  ;;  %v923_v24 = vrot.slane %v921_v17, 4  ;;  %v1800_v41 = vld [vmem:[%s2136_s23 + $0xb8] sm:$0xf] }
  0x2c   : > { %2045 = vmatprep.subr.msk.bf16.mxu1 %vm236_vm0, %v1840_v51  ;;  %1972 = vmatmul.mubr.msk.bf16.gmra.mxu0 %vm223_vm1, %v1751_v55  ;;  %v926_v25 = vrot.slane %v924_v18, 5  ;;  %v944_v26 = vshll.u32 %v1797_v13, 16  ;;  %v900_v28 = vrot.slane %v899_v19, 4  ;;  %v1269_v31 = vsel %vm236_vm0, %v1840_v51, 0  ;;  %v2071_v42 = vld [vmem:[%s2136_s23 + $0x108] ss:$8 sps:$4 sm:$0xff]  }
  0x2d   : > { %1987 = vmatprep.mubr.msk.bf16.mxu0 %vm223_vm1, %v2066_v38  ;;  %v937_v29 = vrot.slane %v935_v21, 4  ;;  %v940_v30 = vrot.slane %v938_v22, 5  ;;  %v914_v32 = vrot.slane %v913_v23, 4  ;;  %v932_v34 = vrot.slane %v930_v20, 5  ;;  %v1801_v45 = vld [vmem:[%s2136_s23 + $0xbc] sm:$0x1] }
  0x2e   : > { %v927_v33 = vor.u32 %v926_v25, %v923_v24  ;;  %v946_v35 = vrot.slane %v944_v26, 5  ;;  %v905_v36 = vsel %vm2178_vm4, %v900_v28, %v904_v11  ;;  %v949_v46 = vshrl.u32 %v1798_v39, 16  ;;  %v2072_v50 = vld [vmem:[%s2136_s23 + $0x8] ss:$8 sps:$4 sm:$0xff]   ;;  %v1802_v53 = vld [vmem:[%s2136_s23 + $0xc0] sm:$0xf] }
  0x2f   : > { %v941_v37 = vor.u32 %v940_v30, %v937_v29  ;;  %v919_v44 = vsel %vm2178_vm4, %v914_v32, %v918_v16  ;;  %v952_v47 = vshll.u32 %v1798_v39, 16  ;;  %v958_v51 = vshll.u32 %v1799_v40, 16  ;;  %v1804_v62 = vld [vmem:[%s2136_s23 + $0xc8] sm:$0xf]  ;;  %v1805_v2 = vld [vmem:[%s2136_s23 + $0xcc] sm:$0x1] }
  0x30   : > { %v928_v14 = vrot.slane %v927_v33, 4  ;;  %v1807_v48 = vcombine.low %v905_v36, %v919_v44  ;;  %v963_v52 = vshrl.u32 %v1800_v41, 16  ;;  %v951_v38 = vrot.slane %v949_v46, 4  ;;  %v2073_v16 = vld [vmem:[%s2136_s23 + $0x18] ss:$8 sps:$4 sm:$0xff]  }
  0x31   : > { %v942_v49 = vrot.slane %v941_v37, 4  ;;  %v954_v55 = vrot.slane %v952_v47, 5  ;;  %v960_v59 = vrot.slane %v958_v51, 5  ;;  %v972_v61 = vshll.u32 %v1801_v45, 16  ;;  %v2074_v29 = vld [vmem:[%s2136_s23 + $0x28] ss:$8 sps:$4 sm:$0xff]  }
  0x32   : > { %1982 = vmatmul.mubr.msk.bf16.gmra.mxu1 %vm223_vm1, %v2069_v57  ;;  %v933_v54 = vsel %vm2178_vm4, %v928_v14, %v932_v34  ;;  %v1803_v57 = vld [vmem:[%s2136_s23 + $0xc4] sm:$0x1]  ;;  %v965_v60 = vrot.slane %v963_v52, 4  ;;  %v980_v5 = vshll.u32 %v1802_v53, 16  ;;  %v991_v7 = vshrl.u32 %v1804_v62, 16 }
  0x33   : > { %1997 = vmatprep.mubr.msk.bf16.mxu1 %vm223_vm1, %v1807_v48  ;;  %v947_v58 = vsel %vm2178_vm4, %v942_v49, %v946_v35  ;;  %v955_v0 = vor.u32 %v954_v55, %v951_v38  ;;  %v974_v4 = vrot.slane %v972_v61, 5  ;;  %v986_v6 = vshll.u32 %v1803_v57, 16  ;;  %v1849_v30 = vld [vmem:[%s2136_s23 + $0x8] sm:$0xf]  ;;  %v2076_v32 = vld [vmem:[%s2136_s23 + $0x50] ss:$8 sps:$4 sm:$0xff]  }
  0x34   : > { %1988 = vmatmul.mubr.msk.bf16.vlgmr.msra.gmra.mxu0 %vm223_vm1, %v2067_v3  ;;  %v1808_v63 = vcombine.low %v933_v54, %v947_v58  ;;  %v977_v3 = vshrl.u32 %v1802_v53, 16  ;;  %v994_v11 = vshll.u32 %v1804_v62, 16  ;;  %v982_v12 = vrot.slane %v980_v5, 5  ;;  %v1850_v33 = vld [vmem:[%s2136_s23 + $0xc] sm:$0x1] }
  0x35   : > { %2006 = vmatpush3.bf16.msra.mxu0 %v1150_v56  ;;  %1991 = vmatprep.mubr.msk.bf16.mxu0 %vm223_vm1, %v2070_v8  ;;  %v966_v56 = vshll.u32 %v1800_v41, 16  ;;  %v956_v8 = vrot.slane %v955_v0, 4  ;;  %v993_v13 = vrot.slane %v991_v7, 4  ;;  %v1000_v15 = vshll.u32 %v1805_v2, 16  ;;  %v1851_v34 = vld [vmem:[%s2136_s23 + $0x10] sm:$0xf] }
  0x36   : > { %2046 = vmatprep.subr.msk.bf16.mxu0 %vm236_vm0, %v2252_v27  ;;  %v979_v10 = vrot.slane %v977_v3, 4  ;;  %v996_v19 = vrot.slane %v994_v11, 5  ;;  %v988_v21 = vrot.slane %v986_v6, 5  ;;  %v1499_v25 = vsel %vm236_vm0, %v2252_v27, 0  ;;  %v1852_v37 = vld [vmem:[%s2136_s23 + $0x14] sm:$0x1] }
  0x37   : > { %v968_v1 = vrot.slane %v966_v56, 5  ;;  %v961_v17 = vsel %vm2178_vm4, %v956_v8, %v960_v59  ;;  %v1002_v24 = vrot.slane %v1000_v15, 5  ;;  %v1361_v35 = vshrl.u32 %v1849_v30, 16  ;;  %v1853_v45 = vld [vmem:[%s2136_s23 + $0x18] sm:$0xf] }
  0x38   : > { %v983_v20 = vor.u32 %v982_v12, %v979_v10  ;;  %v997_v23 = vor.u32 %v996_v19, %v993_v13  ;;  %v1364_v39 = vshll.u32 %v1849_v30, 16  ;;  %v1370_v27 = vshll.u32 %v1850_v33, 16  ;;  %v2075_v51 = vld [vmem:[%s2136_s23 + $0x38] ss:$8 sps:$4 sm:$0xff]   ;;  %v1856_v38 = vld [vmem:[%s2136_s23 + $0x24] sm:$0x1] }
  0x39   : > { %v969_v9 = vor.u32 %v968_v1, %v965_v60  ;;  %v1375_v40 = vshrl.u32 %v1851_v34, 16  ;;  %v1378_v44 = vshll.u32 %v1851_v34, 16  ;;  %v1384_v14 = vshll.u32 %v1852_v37, 16  ;;  %v1855_v54 = vld [vmem:[%s2136_s23 + $0x20] sm:$0xf] }
  0x3a   : > { %1998 = vmatmul.mubr.msk.bf16.vlgmr.msra.gmra.mxu1 %vm223_vm1, %v1808_v63  ;;  %v984_v28 = vrot.slane %v983_v20, 4  ;;  %v1366_v47 = vrot.slane %v1364_v39, 5  ;;  %v1372_v48 = vrot.slane %v1370_v27, 5  ;;  %v1389_v56 = vshrl.u32 %v1853_v45, 16  ;;  %v2077_v63 = vld [vmem:[%s2136_s23 + $0x60] ss:$8 sps:$4 sm:$0xff]  }
  0x3b   : > { %2016 = vmatpush3.bf16.msra.mxu1 %v1269_v31  ;;  %v970_v18 = vrot.slane %v969_v9, 4  ;;  %v998_v31 = vrot.slane %v997_v23, 4  ;;  %v1377_v49 = vrot.slane %v1375_v40, 4  ;;  %v1380_v52 = vrot.slane %v1378_v44, 5  ;;  %v2078_v6 = vld [vmem:[%s2136_s23 + $0x70] ss:$8 sps:$4 sm:$0xff]  }
  0x3c   : > { %1992 = vmatmul.mubr.msk.bf16.gmra.mxu0 %vm223_vm1, %v2071_v42  ;;  %v989_v36 = vsel %vm2178_vm4, %v984_v28, %v988_v21  ;;  %v1363_v42 = vrot.slane %v1361_v35, 4  ;;  %v1386_v53 = vrot.slane %v1384_v14, 5  ;;  %v1392_v57 = vshll.u32 %v1853_v45, 16  ;;  %v1857_v11 = vld [vmem:[%s2136_s23 + $0x28] sm:$0xf] }
  0x3d   : > { %2007 = vmatprep.mubr.msk.bf16.mxu0 %vm223_vm1, %v2072_v50  ;;  %v975_v22 = vsel %vm2178_vm4, %v970_v18, %v974_v4  ;;  %v1003_v41 = vsel %vm2178_vm4, %v998_v31, %v1002_v24  ;;  %v1854_v50 = vld [vmem:[%s2136_s23 + $0x1c] sm:$0x1]  ;;  %v1381_v59 = vor.u32 %v1380_v52, %v1377_v49  ;;  %v1403_v60 = vshrl.u32 %v1855_v54, 16  ;;  %v1858_v15 = vld [vmem:[%s2136_s23 + $0x2c] sm:$0x1] }
  0x3e   : > { %v1809_v26 = vcombine.low %v961_v17, %v975_v22  ;;  %v1810_v46 = vcombine.low %v989_v36, %v1003_v41  ;;  %v1367_v55 = vor.u32 %v1366_v47, %v1363_v42  ;;  %v1398_v58 = vshll.u32 %v1854_v50, 16  ;;  %v1860_v17 = vld [vmem:[%s2136_s23 + $0x34] sm:$0x1]  ;;  %v1861_v22 = vld [vmem:[%s2136_s23 + $0x38] sm:$0xf] }
  0x3f   : > { %v1406_v61 = vshll.u32 %v1855_v54, 16  ;;  %v1412_v62 = vshll.u32 %v1856_v38, 16  ;;  %v1391_v1 = vrot.slane %v1389_v56, 4  ;;  %v1394_v2 = vrot.slane %v1392_v57, 5  ;;  %v1862_v28 = vld [vmem:[%s2136_s23 + $0x3c] sm:$0x1] }
  0x40   : > { %2001 = vmatprep.mubr.msk.bf16.mxu1 %vm223_vm1, %v1809_v26  ;;  %v1368_v0 = vrot.slane %v1367_v55, 4  ;;  %v1382_v3 = vrot.slane %v1381_v59, 4  ;;  %v1405_v4 = vrot.slane %v1403_v60, 4  ;;  %v1400_v9 = vrot.slane %v1398_v58, 5  ;;  %v1863_v33 = vld [vmem:[%s2136_s23 + $0x40] sm:$0xf] }
  0x41   : > { %v1408_v5 = vrot.slane %v1406_v61, 5  ;;  %v1395_v8 = vor.u32 %v1394_v2, %v1391_v1  ;;  %v1414_v10 = vrot.slane %v1412_v62, 5  ;;  %v1417_v20 = vshrl.u32 %v1857_v11, 16  ;;  %v1864_v39 = vld [vmem:[%s2136_s23 + $0x44] sm:$0x1] }
  0x42   : > { %2002 = vmatmul.mubr.msk.bf16.gmra.mxu1 %vm223_vm1, %v1810_v46  ;;  %v1373_v7 = vsel %vm2178_vm4, %v1368_v0, %v1372_v48  ;;  %v1387_v12 = vsel %vm2178_vm4, %v1382_v3, %v1386_v53  ;;  %v1420_v21 = vshll.u32 %v1857_v11, 16  ;;  %v1426_v24 = vshll.u32 %v1858_v15, 16  ;;  %v2079_v47 = vld [vmem:[%s2136_s23 + $0x80] ss:$8 sps:$4 sm:$0xff]  }
  0x43   : > { %2017 = vmatprep.mubr.msk.bf16.mxu1 %vm223_vm1, %v2076_v32  ;;  %v1409_v13 = vor.u32 %v1408_v5, %v1405_v4  ;;  %v1866_v18 = vcombine.low %v1373_v7, %v1387_v12  ;;  %v1396_v19 = vrot.slane %v1395_v8, 4  ;;  %v1419_v30 = vrot.slane %v1417_v20, 4 }
  0x44   : > { %2008 = vmatmul.mubr.msk.bf16.vlgmr.msra.gmra.mxu0 %vm223_vm1, %v2073_v16  ;;  %v1859_v16 = vld [vmem:[%s2136_s23 + $0x30] sm:$0xf]  ;;  %v1422_v31 = vrot.slane %v1420_v21, 5  ;;  %v1440_v32 = vshll.u32 %v1860_v17, 16  ;;  %v1428_v35 = vrot.slane %v1426_v24, 5  ;;  %v1445_v42 = vshrl.u32 %v1861_v22, 16 }
  0x45   : > { %2026 = vmatpush3.bf16.msra.mxu0 %v1499_v25  ;;  %2011 = vmatprep.mubr.msk.bf16.mxu0 %vm223_vm1, %v2074_v29  ;;  %v1410_v23 = vrot.slane %v1409_v13, 4  ;;  %v1431_v25 = vshrl.u32 %v1859_v16, 16  ;;  %v1434_v26 = vshll.u32 %v1859_v16, 16  ;;  %v1401_v29 = vsel %vm2178_vm4, %v1396_v19, %v1400_v9 }
  0x46   : > { %v1423_v40 = vor.u32 %v1422_v31, %v1419_v30  ;;  %v1442_v41 = vrot.slane %v1440_v32, 5  ;;  %v1448_v14 = vshll.u32 %v1861_v22, 16  ;;  %v1454_v45 = vshll.u32 %v1862_v28, 16 }
  0x47   : > { %v1415_v34 = vsel %vm2178_vm4, %v1410_v23, %v1414_v10  ;;  %v1433_v36 = vrot.slane %v1431_v25, 4  ;;  %v1436_v37 = vrot.slane %v1434_v26, 5  ;;  %v1459_v46 = vshrl.u32 %v1863_v33, 16 }
  0x48   : > { %v1867_v27 = vcombine.low %v1401_v29, %v1415_v34  ;;  %v1424_v48 = vrot.slane %v1423_v40, 4  ;;  %v1447_v49 = vrot.slane %v1445_v42, 4  ;;  %v1462_v50 = vshll.u32 %v1863_v33, 16 }
  0x49   : > { %v1437_v44 = vor.u32 %v1436_v37, %v1433_v36  ;;  %v1450_v53 = vrot.slane %v1448_v14, 5  ;;  %v1461_v54 = vrot.slane %v1459_v46, 4  ;;  %v1456_v58 = vrot.slane %v1454_v45, 5 }
  0x4a   : > { %2018 = vmatmul.mubr.msk.bf16.vlgmr.msra.gmra.mxu1 %vm223_vm1, %v2077_v63  ;;  %v1429_v38 = vsel %vm2178_vm4, %v1424_v48, %v1428_v35  ;;  %v1464_v55 = vrot.slane %v1462_v50, 5  ;;  %vm1624_vm5 = vcmask 1040384  }
  0x4b   : > { %2021 = vmatprep.mubr.msk.bf16.mxu1 %vm223_vm1, %v2078_v6  ;;  %v1438_v52 = vrot.slane %v1437_v44, 4  ;;  %v1451_v57 = vor.u32 %v1450_v53, %v1447_v49 }
  0x4c   : > { %2012 = vmatmul.mubr.msk.bf16.gmra.mxu0 %vm223_vm1, %v2075_v51  ;;  %v1468_v51 = vshll.u32 %v1864_v39, 16  ;;  %v1465_v60 = vor.u32 %v1464_v55, %v1461_v54 }
  0x4d   : > { %2027 = vmatprep.mubr.msk.bf16.mxu0 %vm223_vm1, %v1866_v18  ;;  %v1443_v56 = vsel %vm2178_vm4, %v1438_v52, %v1442_v41  ;;  %v1452_v62 = vrot.slane %v1451_v57, 4 }
  0x4e   : > { %v1868_v59 = vcombine.low %v1429_v38, %v1443_v56  ;;  %v1470_v61 = vrot.slane %v1468_v51, 5  ;;  %v1466_v63 = vrot.slane %v1465_v60, 4 }
  0x4f   : > { %v1457_v0 = vsel %vm2178_vm4, %v1452_v62, %v1456_v58 }
  0x50   : > { %v1471_v1 = vsel %vm2178_vm4, %v1466_v63, %v1470_v61 }
  0x51   : > { %v1869_v2 = vcombine.low %v1457_v0, %v1471_v1 }
  0x52   : > { %2022 = vmatmul.mubr.msk.bf16.gmra.mxu1 %vm223_vm1, %v2079_v47 }
  0x54   : > { %2028 = vmatmul.mubr.msk.bf16.vlgmr.msra.gmra.mxu0 %vm223_vm1, %v1867_v27 }
  0x55   : > { %2031 = vmatprep.mubr.msk.bf16.mxu0 %vm223_vm1, %v1868_v59 }
  0x5c   : > { %2032 = vmatmul.mubr.msk.bf16.gmra.mxu0 %vm223_vm1, %v1869_v2 }
  0xd1   : > { %v1949_v5 = vpop.f32.mrf.mxu0 }
  0xd2   : > { %v2343_v3 = vpop.f32.mrf.mxu1 }
  0xd3   : > { %v274_v8 = vpop.f32.mrf.mxu0 }
  0xd4   : > { %v290_v4 = vpop.f32.mrf.mxu1 }
  0xd5   : > { %v1950_v11 = vpop.f32.mrf.mxu0 }
  0xd6   : > { %v1954_v6 = vpop.f32.mrf.mxu1 }
  0xd7   : > { %v277_v15 = vpop.f32.mrf.mxu0 }
  0xd8   : > { %v2345_v7 = vpop.f32.mrf.mxu1 }
  0xda   : > { %v1959_v9 = vpop.f32.mrf.mxu1 }
  0xdb   : > { %v383_v48 = vadd.f32 %v1959_v9, %v1949_v5 }
  0xdc   : > { %v374_v10 = vpop.f32.mrf.mxu1 }
  0xdd   : > { %v375_v46 = vadd.f32 %v374_v10, %v274_v8 }
  0xde   : > { %v1960_v12 = vpop.f32.mrf.mxu1 }
  0xdf   : > { %v386_v49 = vadd.f32 %v1960_v12, %v1950_v11 }
  0xe0   : > { %v377_v13 = vpop.f32.mrf.mxu1 }
  0xe1   : > { %v378_v52 = vadd.f32 %v377_v13, %v277_v15 }
  0xe2   : > { %v1963_v16 = vpop.f32.mrf.mxu1  ;;  %v1969_v43 = vpop.f32.mrf.mxu0 }
  0xe3   : > { %v632_v38 = vadd.f32 %v1969_v43, %v383_v48  ;;  %v399_v5 = vadd.f32 %v1963_v16, %v2343_v3 }
  0xe4   : > { %v390_v17 = vpop.f32.mrf.mxu1  ;;  %v599_v18 = vpop.f32.mrf.mxu0 }
  0xe5   : > { %v630_v53 = vadd.f32 %v599_v18, %v375_v46  ;;  %v391_v0 = vadd.f32 %v390_v17, %v290_v4 }
  0xe6   : > { %v1964_v19 = vpop.f32.mrf.mxu1  ;;  %v1970_v20 = vpop.f32.mrf.mxu0 }
  0xe7   : > { %v633_v55 = vadd.f32 %v1970_v20, %v386_v49  ;;  %v402_v8 = vadd.f32 %v1964_v19, %v1954_v6 }
  0xe8   : > { %v393_v21 = vpop.f32.mrf.mxu1  ;;  %v602_v22 = vpop.f32.mrf.mxu0 }
  0xe9   : > { %v631_v59 = vadd.f32 %v602_v22, %v378_v52  ;;  %v394_v15 = vadd.f32 %v393_v21, %v2345_v7 }
  0xea   : > { %v1979_v23 = vpop.f32.mrf.mxu1 }
  0xeb   : > { %v751_v60 = vadd.f32 %v1979_v23, %v632_v38 }
  0xec   : > { %v718_v24 = vpop.f32.mrf.mxu1  ;;  %v1973_v25 = vpop.f32.mrf.mxu0 }
  0xed   : > { %v749_v57 = vadd.f32 %v718_v24, %v630_v53  ;;  %v636_v4 = vadd.f32 %v1973_v25, %v399_v5 }
  0xee   : > { %v1980_v26 = vpop.f32.mrf.mxu1  ;;  %v615_v28 = vpop.f32.mrf.mxu0 }
  0xef   : > { %v752_v61 = vadd.f32 %v1980_v26, %v633_v55  ;;  %v634_v20 = vadd.f32 %v615_v28, %v391_v0 }
  0xf0   : > { %v721_v29 = vpop.f32.mrf.mxu1  ;;  %v1974_v30 = vpop.f32.mrf.mxu0 }
  0xf1   : > { %v750_v1 = vadd.f32 %v721_v29, %v631_v59  ;;  %v637_v17 = vadd.f32 %v1974_v30, %v402_v8 }
  0xf2   : > { %v1983_v31 = vpop.f32.mrf.mxu1  ;;  %v618_v32 = vpop.f32.mrf.mxu0 }
  0xf3   : > { %v635_v16 = vadd.f32 %v618_v32, %v394_v15  ;;  %v755_v19 = vadd.f32 %v1983_v31, %v636_v4 }
  0xf4   : > { %v734_v33 = vpop.f32.mrf.mxu1  ;;  %v1989_v34 = vpop.f32.mrf.mxu0 }
  0xf5   : > { %v870_v11 = vadd.f32 %v1989_v34, %v751_v60  ;;  %v753_v46 = vadd.f32 %v734_v33, %v634_v20 }
  0xf6   : > { %v1984_v35 = vpop.f32.mrf.mxu1  ;;  %v837_v36 = vpop.f32.mrf.mxu0 }
  0xf7   : > { %v868_v9 = vadd.f32 %v837_v36, %v749_v57  ;;  %v756_v34 = vadd.f32 %v1984_v35, %v637_v17 }
  0xf8   : > { %v1990_v37 = vpop.f32.mrf.mxu0  ;;  %v737_v39 = vpop.f32.mrf.mxu1 }
  0xf9   : > { %v871_v12 = vadd.f32 %v1990_v37, %v752_v61  ;;  %v754_v28 = vadd.f32 %v737_v39, %v635_v16 }
  0xfa   : > { %v840_v27 = vpop.f32.mrf.mxu0  ;;  %v1999_v41 = vpop.f32.mrf.mxu1 }
  0xfb   : > { %v869_v22 = vadd.f32 %v840_v27, %v750_v1  ;;  %v1100_v23 = vadd.f32 %v1999_v41, %v870_v11 }
  0xfc   : > { %v2347_v40 = vpop.f32.mrf.mxu0  ;;  %v1067_v44 = vpop.f32.mrf.mxu1 }
  0xfd   : > { %v1098_v43 = vadd.f32 %v1067_v44, %v868_v9  ;;  %v874_v33 = vadd.f32 %v2347_v40, %v755_v19 }
  0xfe   : > { %v853_v42 = vpop.f32.mrf.mxu0  ;;  %v2000_v45 = vpop.f32.mrf.mxu1 }
  0xff   : > { %v1101_v24 = vadd.f32 %v2000_v45, %v871_v12  ;;  %v872_v45 = vadd.f32 %v853_v42, %v753_v46 }
 0x100   : > { %v1994_v14 = vpop.f32.mrf.mxu0  ;;  %v1070_v50 = vpop.f32.mrf.mxu1 }
 0x101   : > { %v1099_v3 = vadd.f32 %v1070_v50, %v869_v22  ;;  %v875_v50 = vadd.f32 %v1994_v14, %v756_v34 }
 0x102   : > { %v2349_v47 = vpop.f32.mrf.mxu0  ;;  %v2003_v56 = vpop.f32.mrf.mxu1 }
 0x103   : > { %v1104_v53 = vadd.f32 %v2003_v56, %v874_v33 }
 0x104   : > { %v2009_v51 = vpop.f32.mrf.mxu0  ;;  %v1083_v62 = vpop.f32.mrf.mxu1 }
 0x105   : > { %v1219_v7 = vadd.f32 %v2009_v51, %v1100_v23  ;;  %v1102_v31 = vadd.f32 %v1083_v62, %v872_v45  ;;  %v873_v51 = vadd.f32 %v2349_v47, %v754_v28 }
 0x106   : > { %v1186_v54 = vpop.f32.mrf.mxu0  ;;  %v2004_v2 = vpop.f32.mrf.mxu1 }
 0x107   : > { %v1217_v36 = vadd.f32 %v1186_v54, %v1098_v43  ;;  %v1105_v54 = vadd.f32 %v2004_v2, %v875_v50 }
 0x108   : > { %v2010_v58 = vpop.f32.mrf.mxu0  ;;  %v1086_v13 = vpop.f32.mrf.mxu1 }
 0x109   : > { %v1220_v21 = vadd.f32 %v2010_v58, %v1101_v24  ;;  %v1103_v58 = vadd.f32 %v1086_v13, %v873_v51 }
 0x10a   : > { %v1189_v63 = vpop.f32.mrf.mxu0  ;;  %v2019_v26 = vpop.f32.mrf.mxu1 }
 0x10b   : > { %v1218_v48 = vadd.f32 %v1189_v63, %v1099_v3  ;;  %v1338_v25 = vadd.f32 %v2019_v26, %v1219_v7 }
 0x10c   : > { %v2013_v10 = vpop.f32.mrf.mxu0  ;;  %v1305_v6 = vpop.f32.mrf.mxu1 }
 0x10d   : > { %v1336_v41 = vadd.f32 %v1305_v6, %v1217_v36  ;;  %v1223_v56 = vadd.f32 %v2013_v10, %v1104_v53 }
 0x10e   : > { %v1202_v18 = vpop.f32.mrf.mxu0  ;;  %v2020_v44 = vpop.f32.mrf.mxu1 }
 0x10f   : > { %v1339_v30 = vadd.f32 %v2020_v44, %v1220_v21  ;;  %v1221_v14 = vadd.f32 %v1202_v18, %v1102_v31 }
 0x110   : > { %v2014_v29 = vpop.f32.mrf.mxu0  ;;  %v1308_v49 = vpop.f32.mrf.mxu1 }
 0x111   : > { %v1337_v35 = vadd.f32 %v1308_v49, %v1218_v48  ;;  %v1224_v61 = vadd.f32 %v2014_v29, %v1105_v54 }
 0x112   : > { %v1205_v37 = vpop.f32.mrf.mxu0  ;;  %v2023_v52 = vpop.f32.mrf.mxu1 }
 0x113   : > { %v1222_v5 = vadd.f32 %v1205_v37, %v1103_v58  ;;  %v1342_v8 = vadd.f32 %v2023_v52, %v1223_v56 }
 0x114   : > { %v2029_v27 = vpop.f32.mrf.mxu0  ;;  %v1321_v57 = vpop.f32.mrf.mxu1 }
 0x115   : > { %v1568_v55 = vadd.f32 %v2029_v27, %v1338_v25  ;;  %v1340_v2 = vadd.f32 %v1321_v57, %v1221_v14 }
 0x116   : > { %v1535_v32 = vpop.f32.mrf.mxu0  ;;  %v2024_v47 = vpop.f32.mrf.mxu1 }
 0x117   : > { %v1566_v39 = vadd.f32 %v1535_v32, %v1336_v41  ;;  %v1605_v12 = vmul.f32 %v1568_v55, %v1568_v55  ;;  %v1343_v43 = vadd.f32 %v2024_v47, %v1224_v61 }
 0x118   : > { %v2030_v38 = vpop.f32.mrf.mxu0  ;;  %v1324_v11 = vpop.f32.mrf.mxu1 }
 0x119   : > { %v1569_v42 = vadd.f32 %v2030_v38, %v1339_v30  ;;  %v1603_v62 = vmul.f32 %v1566_v39, %v1566_v39  ;;  %v1341_v24 = vadd.f32 %v1324_v11, %v1222_v5 }
 0x11a   : > { %v1538_v40 = vpop.f32.mrf.mxu0 }
 0x11b   : > { %v1885_v59 = vpack.c.bf16 %v1569_v42, %v1568_v55  ;;  %v1567_v60 = vadd.f32 %v1538_v40, %v1337_v35  ;;  %v1606_v18 = vmul.f32 %v1569_v42, %v1569_v42 }
 0x11c   : > { %v2033_v9 = vpop.f32.mrf.mxu0 }
 0x11d   : > { %1897 = vst [vmem:[%s2359_s14 + $0x8] sm:$0xff] %v1885_v59   ;;  %v1880_v63 = vpack.c.bf16 %v1567_v60, %v1566_v39  ;;  %v1590_v0 = vadd.f32 %v1567_v60, %v1566_v39  ;;  %v1604_v1 = vmul.f32 %v1567_v60, %v1567_v60  ;;  %v1572_v26 = vadd.f32 %v2033_v9, %v1342_v8 }
 0x11e   : > { %v1551_v20 = vpop.f32.mrf.mxu0 }
 0x11f   : > { %1881 = vst [vmem:[%s2359_s14] sm:$0xff] %v1880_v63   ;;  %v1591_v13 = vadd.f32 %v1590_v0, %v1568_v55  ;;  %v1611_v15 = vadd.f32 %v1604_v1, %v1603_v62  ;;  %v1570_v22 = vadd.f32 %v1551_v20, %v1340_v2  ;;  %v1609_v21 = vmul.f32 %v1572_v26, %v1572_v26 }
 0x120   : > { %v2034_v4 = vpop.f32.mrf.mxu0 }
 0x121   : > { %v1612_v10 = vadd.f32 %v1611_v15, %v1605_v12  ;;  %v1592_v23 = vadd.f32 %v1591_v13, %v1569_v42  ;;  %v1607_v29 = vmul.f32 %v1570_v22, %v1570_v22  ;;  %v1573_v3 = vadd.f32 %v2034_v4, %v1343_v43 }
 0x122   : > { %v1554_v6 = vpop.f32.mrf.mxu0 }
 0x123   : > { %v1593_v17 = vadd.f32 %v1592_v23, %v1570_v22  ;;  %v1613_v46 = vadd.f32 %v1612_v10, %v1606_v18  ;;  %v1895_v19 = vpack.c.bf16 %v1573_v3, %v1572_v26  ;;  %v1571_v34 = vadd.f32 %v1554_v6, %v1341_v24 }
 0x124   : > { %v1610_v27 = vmul.f32 %v1573_v3, %v1573_v3 }
 0x125   : > { %v1614_v16 = vadd.f32 %v1613_v46, %v1607_v29  ;;  %1899 = vst [vmem:[%s2359_s14 + $0x18] sm:$0xff] %v1895_v19   ;;  %v1890_v36 = vpack.c.bf16 %v1571_v34, %v1570_v22  ;;  %v1594_v37 = vadd.f32 %v1593_v17, %v1571_v34  ;;  %v1608_v7 = vmul.f32 %v1571_v34, %v1571_v34 }
 0x127   : > { %1898 = vst [vmem:[%s2359_s14 + $0x10] sm:$0xff] %v1890_v36   ;;  %v1595_v44 = vadd.f32 %v1594_v37, %v1572_v26  ;;  %v1615_v28 = vadd.f32 %v1614_v16, %v1608_v7 }
 0x129   : > { %v1596_v41 = vadd.f32 %v1595_v44, %v1573_v3  ;;  %v1616_v45 = vadd.f32 %v1615_v28, %v1609_v21 }
 0x12b   : > { %v1597_v48 = vrot.slane %v1596_v41, 4  ;;  %v1617_v25 = vadd.f32 %v1616_v45, %v1610_v27 }
 0x12d   : > { %v1598_v30 = vadd.f32 %v1597_v48, %v1596_v41  ;;  %v1618_v49 = vrot.slane %v1617_v25, 4 }
 0x12f   : > { %v1599_v33 = vrot.slane %v1598_v30, 2  ;;  %v1619_v50 = vadd.f32 %v1618_v49, %v1617_v25 }
 0x131   : > { %v1600_v32 = vadd.f32 %v1599_v33, %v1598_v30  ;;  %v1620_v31 = vrot.slane %v1619_v50, 2 }
 0x133   : > { %v1601_v35 = vrot.slane %v1600_v32, 1  ;;  %v1621_v52 = vadd.f32 %v1620_v31, %v1619_v50 }
 0x135   : > { %v1622_v51 = vrot.slane %v1621_v52, 1  ;;  %v1602_v53 = vadd.f32 %v1601_v35, %v1600_v32 }
 0x137   : > { %v1623_v54 = vadd.f32 %v1622_v51, %v1621_v52 }
 0x139   : > { %v1625_v39 = vsel %vm1624_vm5, %v1602_v53, %v1623_v54 }
 0x13a   : > { %1626 = vst [vmem:[%s181_s18] sm:$0x3] %v1625_v39 }
 0x13b PF: > { %s14_s12 = sadd.s32 1, %s2086_s12  }
 0x13c   : > { %p11_p4 = scmp.ge.s32.totalorder %s14_s12, 4  }
 0x13e   :  { %13 = sbr.rel (!%p11_p4) target bundleno = 1 (0x1), region = 83 }

// kernel: basic_block_forward.4
= control target key start
LH: loop header
LB: loop body
LE: loop exit
PB: predicated region body
PF: predicated region fallthrough
CT: control target
= control target key end

     0   :  { %s3727_s24 = smov 0   ;;  %s4497_s0 = inlined_call_operand.vmem [shape: bf16[2,8,8,128], index: 0, kind: input, shape index: {}]   ;;  %s4498_s1 = inlined_call_operand.vmem [shape: f32[2,128], index: 1, kind: input, shape index: {}]   ;;  %s4499_s2 = inlined_call_operand.vmem [shape: bf16[9,128,128], index: 2, kind: input, shape index: {}]   ;;  %s4500_s3 = inlined_call_operand.vmem [shape: bf16[2,64,4], index: 3, kind: input, shape index: {}]   ;;  %s4501_s4 = inlined_call_operand.vmem [shape: bf16[4,128], index: 4, kind: input, shape index: {}]   ;;  %s4502_s5 = inlined_call_operand.vmem [shape: bf16[2,64,128], index: 5, kind: output, shape index: {0}]   ;;  %s4503_s6 = inlined_call_operand.vmem [shape: f32[2,2,128], index: 6, kind: output, shape index: {1}]   ;;  %s4504_s7 = inlined_call_operand.vmem [shape: f32[2,2,128], index: 7, kind: output, shape index: {2}]  }
   0x1 LB: > { %s2879_s25 = sadd.s32 4294967295, %s3684_s24   ;;  %p2883_p0 = scmp.ge.s32.totalorder %s3684_s24, 1  ;;  %s3684_s24 = sphi %s3727_s24, %s18_s24  }
   0x2   : > { %p252_p1 = scmp.lt.s32.totalorder %s3684_s24, 3 }
   0x4   : > { %p253_p2 = pnand %p2883_p0, %p252_p1 }
   0x6   : > { %256 = sbr.rel (%p253_p2) target bundleno = 420 (0x1a4), region = 40 }
   0xb   : > { %v3590_v0 = vld [vmem:[%s4499_s2 + $0x78] sm:$0xff]   ;;  %v3592_v2 = vld [vmem:[%s4499_s2 + $0x70] sm:$0xff]   ;;  %p3746_p3 = scmp.lt.s32.totalorder %s2879_s25, 1  ;;  %v3686_v3 = vmov 0   ;;  %v3594_v5 = vld [vmem:[%s4499_s2 + $0x68] sm:$0xff]   ;;  %vm504_vm0 = vcmask 1043456  }
   0xc   : > { %v3591_v1 = vld [vmem:[%s4499_s2 + $0x38] sm:$0xff]   ;;  %3354 = vmatprep.subr.bf16.mxu0 %v3590_v0  ;;  %371 = vst [vmem:[#allocation2] sm:$0xf] %v3686_v3  ;;  %372 = vst [vmem:[#allocation2 + $0x4] sm:$0x1] %v3686_v3  ;;  %v3593_v4 = vld [vmem:[%s4499_s2 + $0x30] sm:$0xff]  }
   0xd   : > { %373 = vst [vmem:[#allocation2 + $0x8] sm:$0xf] %v3686_v3  ;;  %374 = vst [vmem:[#allocation2 + $0xc] sm:$0x1] %v3686_v3  ;;  %3378 = vmatprep.subr.bf16.mxu1 %v3591_v1  ;;  %3355 = vmatpush3.bf16.msra.mxu0 %v3590_v0  ;;  %v3595_v6 = vld [vmem:[%s4499_s2 + $0x28] sm:$0xff]   ;;  %s4529_s25 = smov (!%p3746_p3, %s2879_s25), 1 }
   0xe   : > { %375 = vst [vmem:[#allocation2 + $0x10] sm:$0xf] %v3686_v3  ;;  %376 = vst [vmem:[#allocation2 + $0x14] sm:$0x1] %v3686_v3  ;;  %3379 = vmatpush3.bf16.msra.mxu1 %v3591_v1  ;;  %3356 = vmatprep.subr.bf16.mxu0 %v3592_v2  ;;  %v3596_v7 = vld [vmem:[%s4499_s2 + $0x60] sm:$0xff]   ;;  %s3772_s20 = sshll.u32 %s4529_s25, 5 }
   0xf   : > { %377 = vst [vmem:[#allocation2 + $0x18] sm:$0xf] %v3686_v3  ;;  %378 = vst [vmem:[#allocation2 + $0x1c] sm:$0x1] %v3686_v3  ;;  %3380 = vmatprep.subr.bf16.mxu1 %v3593_v4  ;;  %v3597_v8 = vld [vmem:[%s4499_s2 + $0x20] sm:$0xff]   ;;  %v3598_v9 = vld [vmem:[%s4499_s2 + $0x58] sm:$0xff]   ;;  %s3784_s29 = scalar_lea.vmem %s4497_s0, %s3772_s20  ;;  %s4250_s17 = scalar_lea.vmem %s4500_s3, %s3772_s20 }
  0x10   : > { %379 = vst [vmem:[#allocation2 + $0x20] sm:$0xf] %v3686_v3  ;;  %380 = vst [vmem:[#allocation2 + $0x24] sm:$0x1] %v3686_v3  ;;  %v3599_v10 = vld [vmem:[%s4499_s2 + $0x18] sm:$0xff]   ;;  %v3600_v11 = vld [vmem:[%s4499_s2 + $0x50] sm:$0xff]   ;;  %s4471_s23 = scalar_lea.vmem %s4502_s5, %s3772_s20 }
  0x11   : > { %381 = vst [vmem:[#allocation2 + $0x28] sm:$0xf] %v3686_v3  ;;  %382 = vst [vmem:[#allocation2 + $0x2c] sm:$0x1] %v3686_v3  ;;  %3357 = vmatpush3.bf16.msra.mxu0 %v3592_v2  ;;  %v3792_v12 = vld [vmem:[%s4498_s1] ss:$0 sm:$0xff] }
  0x12   : > { %383 = vst [vmem:[#allocation2 + $0x30] sm:$0xf] %v3686_v3  ;;  %384 = vst [vmem:[#allocation2 + $0x34] sm:$0x1] %v3686_v3  ;;  %3381 = vmatpush3.bf16.msra.mxu1 %v3593_v4  ;;  %3358 = vmatprep.subr.bf16.mxu0 %v3594_v5  ;;  %v3200_v13 = vld [vmem:[%s3784_s29] sm:$0xff]   ;;  %v3601_v14 = vld [vmem:[%s4499_s2 + $0x10] sm:$0xff]  }
  0x13   : > { %385 = vst [vmem:[#allocation2 + $0x38] sm:$0xf] %v3686_v3  ;;  %386 = vst [vmem:[#allocation2 + $0x3c] sm:$0x1] %v3686_v3  ;;  %3382 = vmatprep.subr.bf16.mxu1 %v3595_v6  ;;  %v3201_v15 = vunpack.c.l.bf16 %v3200_v13  ;;  %v3202_v16 = vunpack.c.h.bf16 %v3200_v13  ;;  %v3801_v17 = vld [vmem:[%s4498_s1 + $0x1] ss:$0 sm:$0xff] }
  0x14   : > { %387 = vst [vmem:[#allocation2 + $0x40] sm:$0xf] %v3686_v3  ;;  %388 = vst [vmem:[#allocation2 + $0x44] sm:$0x1] %v3686_v3  ;;  %v3602_v19 = vld [vmem:[%s4499_s2 + $0x48] sm:$0xff]   ;;  %vm510_vm1 = vcmask 1040384  }
  0x15   : > { %389 = vst [vmem:[#allocation2 + $0x48] sm:$0xf] %v3686_v3  ;;  %390 = vst [vmem:[#allocation2 + $0x4c] sm:$0x1] %v3686_v3  ;;  %3359 = vmatpush3.bf16.msra.mxu0 %v3594_v5  ;;  %v343_v18 = vmul.f32 %v3201_v15, %v3792_v12  ;;  %v344_v20 = vmul.f32 %v3202_v16, %v3792_v12  ;;  %v3603_v21 = vld [vmem:[%s4499_s2 + $0x8] sm:$0xff]   ;;  %v3604_v26 = vld [vmem:[%s4499_s2 + $0x40] sm:$0xff]  }
  0x16   : > { %3383 = vmatpush3.bf16.msra.mxu1 %v3595_v6  ;;  %3360 = vmatprep.subr.bf16.mxu0 %v3596_v7  ;;  %v3812_v23 = vld [vmem:[#allocation2] sm:$0xf]  ;;  %v3235_v24 = vld [vmem:[%s3784_s29 + $0x8] sm:$0xff]   ;;  %vm505_vm2 = vsmask.f32 7938  ;;  %v3830_v43 = vld [vmem:[%s4499_s2 + $0xb8] sm:$0xff]  }
  0x17   : > { %3384 = vmatprep.subr.bf16.mxu1 %v3597_v8  ;;  %v355_v22 = vadd.f32 %v3801_v17, %v343_v18  ;;  %v356_v25 = vadd.f32 %v3801_v17, %v344_v20  ;;  %v3205_v28 = vunpack.c.l.bf16 %v3235_v24  ;;  %v3206_v29 = vunpack.c.h.bf16 %v3235_v24  ;;  %v3605_v32 = vld [vmem:[%s4499_s2] sm:$0xff]   ;;  %v507_v41 = vld [vmem:[#allocation2 + $0x8] sm:$0xf]  ;;  %v513_v42 = vld [vmem:[#allocation2 + $0xc] sm:$0x1]  ;;  %s2890_s26 = sshll.u32 %s4529_s25, 1 }
  0x18   : > { %vm511_vm3 = vsmask.f32 256  ;;  %v594_v30 = vshrl.u32 %v3812_v23, 16  ;;  %v597_v34 = vshll.u32 %v3812_v23, 16  ;;  %v3835_v44 = vld [vmem:[%s4499_s2 + $0xf8] sm:$0xff]   ;;  %vm3840_vm4 = vmand %vm504_vm0, %vm505_vm2  ;;  %v3236_v63 = vld [vmem:[%s3784_s29 + $0x10] sm:$0xff]   ;;  %s319_s28 = scalar_lea.vmem %s4504_s7, %s2890_s26  ;;  %s315_s8 = scalar_lea.vmem %s4503_s6, %s2890_s26 }
  0x19   : > { %3361 = vmatpush3.bf16.msra.mxu0 %v3596_v7  ;;  %v363_v27 = vmax.f32 %v355_v22, 0.0  ;;  %v364_v31 = vmax.f32 %v356_v25, 0.0  ;;  %v345_v35 = vmul.f32 %v3205_v28, %v3792_v12  ;;  %v346_v36 = vmul.f32 %v3206_v29, %v3792_v12  ;;  %v516_v51 = vld [vmem:[#allocation2 + $0x10] sm:$0xf]  ;;  %v519_v52 = vld [vmem:[#allocation2 + $0x14] sm:$0x1]  ;;  %vm3846_vm5 = vmand %vm510_vm1, %vm511_vm3 }
  0x1a   : > { %3385 = vmatpush3.bf16.msra.mxu1 %v3597_v8  ;;  %3362 = vmatprep.subr.bf16.mxu0 %v3598_v9  ;;  %v3850_v54 = vld [vmem:[#allocation2 + $0x4] sm:$0x1]  ;;  %vm590_vm6 = vsmask.f32 3328  ;;  %vm591_vm7 = vsmask.f32 7440  ;;  %v3209_v7 = vunpack.c.l.bf16 %v3236_v63  ;;  %v3210_v13 = vunpack.c.h.bf16 %v3236_v63 }
  0x1b   : > { %3386 = vmatprep.subr.bf16.mxu1 %v3599_v10  ;;  %v3183_v33 = vpack.c.bf16 %v363_v27, %v363_v27  ;;  %v3184_v37 = vpack.c.bf16 %v364_v31, %v364_v31  ;;  %v357_v40 = vadd.f32 %v3801_v17, %v345_v35  ;;  %v358_v47 = vadd.f32 %v3801_v17, %v346_v36  ;;  %v522_v16 = vld [vmem:[#allocation2 + $0x18] sm:$0xf]  ;;  %v525_v18 = vld [vmem:[#allocation2 + $0x1c] sm:$0x1]  ;;  %vm3884_vm8 = vmor %vm590_vm6, %vm591_vm7 }
  0x1c   : > { %v596_v58 = vrot.slane %v594_v30, 4  ;;  %v599_v60 = vrot.slane %v597_v34, 5  ;;  %v348_v25 = vmul.f32 %v3210_v13, %v3792_v12  ;;  %vm1012_vm9 = vcmask 1042432  }
  0x1d   : > { %3363 = vmatpush3.bf16.msra.mxu0 %v3598_v9  ;;  %v424_v38 = vshrl.u32 %v3183_v33, 16  ;;  %v427_v39 = vshll.u32 %v3183_v33, 16  ;;  %v432_v45 = vshrl.u32 %v3184_v37, 16  ;;  %v435_v46 = vshll.u32 %v3184_v37, 16  ;;  %v3864_v9 = vld [vmem:[%s3784_s29 + $0x18] sm:$0xff]  }
  0x1e   : > { %3387 = vmatpush3.bf16.msra.mxu1 %v3599_v10  ;;  %3364 = vmatprep.subr.bf16.mxu0 %v3600_v11  ;;  %v365_v50 = vmax.f32 %v357_v40, 0.0  ;;  %v366_v0 = vmax.f32 %v358_v47, 0.0  ;;  %v603_v10 = vshll.u32 %v3850_v54, 16  ;;  %v600_v15 = vor.u32 %v599_v60, %v596_v58 }
  0x1f   : > { %3388 = vmatprep.subr.bf16.mxu1 %v3601_v14  ;;  %v426_v48 = vrot.slane %v424_v38, 7  ;;  %v434_v55 = vrot.slane %v432_v45, 7  ;;  %v360_v31 = vadd.f32 %v3801_v17, %v348_v25  ;;  %vm1013_vm10 = vcmask 1046532   ;;  %v3670_v38 = vld [vmem:[%s4250_s17] sm:$0xff]  }
  0x20   : > { %v3185_v59 = vpack.c.bf16 %v365_v50, %v365_v50  ;;  %v3186_v8 = vpack.c.bf16 %v366_v0, %v366_v0  ;;  %v605_v33 = vrot.slane %v603_v10, 5  ;;  %vm3991_vm11 = vmor %vm1012_vm9, %vm1013_vm10  ;;  %vm2645_vm12 = vcmask 1041408  }
  0x21   : > { %3365 = vmatpush3.bf16.msra.mxu0 %v3600_v11  ;;  %v429_v56 = vor.u32 %v427_v39, %v426_v48  ;;  %v430_v57 = vrot.slane %v426_v48, 4  ;;  %v437_v61 = vor.u32 %v435_v46, %v434_v55  ;;  %v438_v62 = vrot.slane %v434_v55, 4  ;;  %v531_v48 = vld [vmem:[#allocation2 + $0x24] sm:$0x1] }
  0x22   : > { %3389 = vmatpush3.bf16.msra.mxu1 %v3601_v14  ;;  %3366 = vmatprep.subr.bf16.mxu0 %v3602_v19  ;;  %v440_v3 = vshrl.u32 %v3185_v59, 16  ;;  %v443_v4 = vshll.u32 %v3185_v59, 16  ;;  %v3213_v14 = vunpack.c.l.bf16 %v3864_v9  ;;  %v448_v20 = vshrl.u32 %v3186_v8, 16 }
  0x23   : > { %3390 = vmatprep.subr.bf16.mxu1 %v3603_v21  ;;  %v508_v1 = vsel %vm3840_vm4, %v429_v56, %v507_v41  ;;  %v514_v2 = vsel %vm3846_vm5, %v430_v57, %v513_v42  ;;  %v517_v5 = vsel %vm3840_vm4, %v437_v61, %v516_v51  ;;  %v520_v6 = vsel %vm3846_vm5, %v438_v62, %v519_v52  ;;  %v528_v41 = vld [vmem:[#allocation2 + $0x20] sm:$0xf] }
  0x24   : > { %509 = vst [vmem:[#allocation2 + $0x8] sm:$0xf] %v508_v1  ;;  %515 = vst [vmem:[#allocation2 + $0xc] sm:$0x1] %v514_v2  ;;  %v442_v11 = vrot.slane %v440_v3, 7  ;;  %v450_v28 = vrot.slane %v448_v20, 7 }
  0x25   : > { %3367 = vmatpush3.bf16.msra.mxu0 %v3602_v19  ;;  %518 = vst [vmem:[#allocation2 + $0x10] sm:$0xf] %v517_v5  ;;  %521 = vst [vmem:[#allocation2 + $0x14] sm:$0x1] %v520_v6  ;;  %v347_v19 = vmul.f32 %v3209_v7, %v3792_v12  ;;  %v368_v50 = vmax.f32 %v360_v31, 0.0  ;;  %vm2632_vm13 = vcmask 31744  }
  0x26   : > { %3391 = vmatpush3.bf16.msra.mxu1 %v3603_v21  ;;  %3368 = vmatprep.subr.bf16.mxu0 %v3604_v26  ;;  %v451_v21 = vshll.u32 %v3186_v8, 16  ;;  %v445_v22 = vor.u32 %v443_v4, %v442_v11  ;;  %v446_v24 = vrot.slane %v442_v11, 4  ;;  %v454_v40 = vrot.slane %v450_v28, 4 }
  0x27   : > { %3392 = vmatprep.subr.bf16.mxu1 %v3605_v32  ;;  %v359_v27 = vadd.f32 %v3801_v17, %v347_v19  ;;  %v3188_v11 = vpack.c.bf16 %v368_v50, %v368_v50 }
  0x28   : > { %v523_v29 = vsel %vm3840_vm4, %v445_v22, %v522_v16  ;;  %v526_v30 = vsel %vm3846_vm5, %v446_v24, %v525_v18  ;;  %v453_v39 = vor.u32 %v451_v21, %v450_v28  ;;  %v532_v10 = vsel %vm3846_vm5, %v454_v40, %v531_v48  ;;  %v534_v18 = vld [vmem:[#allocation2 + $0x28] sm:$0xf]  ;;  %v3611_v22 = vld [vmem:[%s4499_s2 + $0xf0] sm:$0xff]   ;;  %v537_v28 = vld [vmem:[#allocation2 + $0x2c] sm:$0x1] }
  0x29   : > { %3369 = vmatpush3.bf16.msra.mxu0 %v3604_v26  ;;  %v349_v26 = vmul.f32 %v3213_v14, %v3792_v12  ;;  %524 = vst [vmem:[#allocation2 + $0x18] sm:$0xf] %v523_v29  ;;  %527 = vst [vmem:[#allocation2 + $0x1c] sm:$0x1] %v526_v30  ;;  %v367_v34 = vmax.f32 %v359_v27, 0.0  ;;  %v3214_v29 = vunpack.c.h.bf16 %v3864_v9  ;;  %v467_v40 = vshll.u32 %v3188_v11, 16 }
  0x2a   : > { %3393 = vmatpush3.bf16.msra.mxu1 %v3605_v32  ;;  %3402 = vmatprep.subr.bf16.mxu0 %v3830_v43  ;;  %v601_v32 = vrot.slane %v600_v15, 4  ;;  %v529_v4 = vsel %vm3840_vm4, %v453_v39, %v528_v41  ;;  %533 = vst [vmem:[#allocation2 + $0x24] sm:$0x1] %v532_v10  ;;  %v464_v39 = vshrl.u32 %v3188_v11, 16 }
  0x2b   : > { %3426 = vmatprep.subr.bf16.mxu1 %v3835_v44  ;;  %v3878_v35 = vadd.f32 %v3801_v17, %v349_v26  ;;  %v559_v36 = vld [vmem:[#allocation2 + $0x8] sm:$0xf]  ;;  %v3880_v37 = vld [vmem:[#allocation2 + $0xc] sm:$0x1]  ;;  %v3187_v57 = vpack.c.bf16 %v367_v34, %v367_v34  ;;  %530 = vst [vmem:[#allocation2 + $0x20] sm:$0xf] %v529_v4 }
  0x2c   : > { %v608_v42 = vshrl.u32 %v559_v36, 16  ;;  %v611_v45 = vshll.u32 %v559_v36, 16  ;;  %v617_v46 = vshll.u32 %v3880_v37, 16  ;;  %v560_v47 = vld [vmem:[#allocation2 + $0x10] sm:$0xf]  ;;  %v2930_v51 = vcombine.low %v3812_v23, %v559_v36 }
  0x2d   : > { %v3890_v52 = vld [vmem:[#allocation2 + $0x14] sm:$0x1]  ;;  %v622_v55 = vshrl.u32 %v560_v47, 16  ;;  %v625_v56 = vshll.u32 %v560_v47, 16  ;;  %v606_v58 = vsel %vm3884_vm8, %v601_v32, %v605_v33  ;;  %v369_v61 = vmax.f32 %v3878_v35, 0.0  ;;  %v3613_v35 = vld [vmem:[%s4499_s2 + $0xe8] sm:$0xff]  }
  0x2e   : > { %v610_v59 = vrot.slane %v608_v42, 4  ;;  %v613_v60 = vrot.slane %v611_v45, 5  ;;  %3394 = vmatprep.mubr.bf16.mxu1 %v2930_v51  ;;  %v631_v0 = vshll.u32 %v3890_v52, 16  ;;  %v456_v1 = vshrl.u32 %v3187_v57, 16  ;;  %v540_v42 = vld [vmem:[#allocation2 + $0x30] sm:$0xf] }
  0x2f   : > { %v624_v62 = vrot.slane %v622_v55, 4  ;;  %v627_v63 = vrot.slane %v625_v56, 5  ;;  %v619_v23 = vrot.slane %v617_v46, 5  ;;  %v459_v3 = vshll.u32 %v3187_v57, 16  ;;  %v543_v45 = vld [vmem:[#allocation2 + $0x34] sm:$0x1] }
  0x30   : > { %v614_v2 = vor.u32 %v613_v60, %v610_v59  ;;  %v561_v5 = vld [vmem:[#allocation2 + $0x18] sm:$0xf]  ;;  %v3898_v6 = vld [vmem:[#allocation2 + $0x1c] sm:$0x1]  ;;  %v458_v8 = vrot.slane %v456_v1, 7  ;;  %v633_v20 = vrot.slane %v631_v0, 5  ;;  %v3189_v36 = vpack.c.bf16 %v369_v61, %v369_v61 }
  0x31   : > { %v628_v7 = vor.u32 %v627_v63, %v624_v62  ;;  %v636_v14 = vshrl.u32 %v561_v5, 16  ;;  %v639_v15 = vshll.u32 %v561_v5, 16  ;;  %v645_v16 = vshll.u32 %v3898_v6, 16  ;;  %v3610_v51 = vld [vmem:[%s4499_s2 + $0xb0] sm:$0xff]   ;;  %v3922_v55 = vld [vmem:[#allocation2 + $0x24] sm:$0x1] }
  0x32   : > { %v615_v13 = vrot.slane %v614_v2, 4  ;;  %v2931_v21 = vcombine.low %v560_v47, %v561_v5  ;;  %v461_v24 = vor.u32 %v459_v3, %v458_v8  ;;  %v462_v32 = vrot.slane %v458_v8, 4  ;;  %v3615_v0 = vld [vmem:[%s4499_s2 + $0xe0] sm:$0xff]   ;;  %v546_v4 = vld [vmem:[#allocation2 + $0x38] sm:$0xf] }
  0x33   : > { %v629_v19 = vrot.slane %v628_v7, 4  ;;  %v638_v26 = vrot.slane %v636_v14, 4  ;;  %v641_v27 = vrot.slane %v639_v15, 5  ;;  %v647_v31 = vrot.slane %v645_v16, 5  ;;  %v549_v5 = vld [vmem:[#allocation2 + $0x3c] sm:$0x1] }
  0x34   : > { %v620_v25 = vsel %vm3884_vm8, %v615_v13, %v619_v23  ;;  %3395 = vmatmul.mubr.bf16.vlgmr.msra.gmra.mxu1 %v2931_v21  ;;  %v535_v33 = vsel %vm3840_vm4, %v461_v24, %v534_v18  ;;  %v538_v41 = vsel %vm3846_vm5, %v462_v32, %v537_v28  ;;  %v466_v47 = vrot.slane %v464_v39, 7  ;;  %v3612_v13 = vld [vmem:[%s4499_s2 + $0xa8] sm:$0xff]   ;;  %v3617_v18 = vld [vmem:[%s4499_s2 + $0xd8] sm:$0xff]  }
  0x35   : > { %v2918_v30 = vcombine.low %v606_v58, %v620_v25  ;;  %v642_v34 = vor.u32 %v641_v27, %v638_v26  ;;  %3427 = vmatpush3.bf16.msra.mxu1 %v3835_v44  ;;  %536 = vst [vmem:[#allocation2 + $0x28] sm:$0xf] %v535_v33  ;;  %v634_v9 = vsel %vm3884_vm8, %v629_v19, %v633_v20  ;;  %539 = vst [vmem:[#allocation2 + $0x2c] sm:$0x1] %v538_v41  ;;  %v562_v44 = vld [vmem:[#allocation2 + $0x20] sm:$0xf] }
  0x36   : > { %3428 = vmatprep.subr.bf16.mxu1 %v3611_v22  ;;  %v472_v48 = vshrl.u32 %v3189_v36, 16  ;;  %v475_v50 = vshll.u32 %v3189_v36, 16  ;;  %v650_v56 = vshrl.u32 %v562_v44, 16  ;;  %v653_v57 = vshll.u32 %v562_v44, 16  ;;  %v988_v33 = vld [vmem:[#allocation2] sm:$0xe] }
  0x37   : > { %3370 = vmatprep.mubr.bf16.mxu0 %v2918_v30  ;;  %v643_v46 = vrot.slane %v642_v34, 4  ;;  %v350_v58 = vmul.f32 %v3214_v29, %v3792_v12  ;;  %v659_v60 = vshll.u32 %v3922_v55, 16  ;;  %v469_v61 = vor.u32 %v467_v40, %v466_v47  ;;  %v3614_v29 = vld [vmem:[%s4499_s2 + $0xa0] sm:$0xff]   ;;  %v3616_v41 = vld [vmem:[%s4499_s2 + $0x98] sm:$0xff]  }
  0x38   : > { %v470_v62 = vrot.slane %v466_v47, 4  ;;  %v652_v1 = vrot.slane %v650_v56, 4  ;;  %v655_v2 = vrot.slane %v653_v57, 5  ;;  %v474_v23 = vrot.slane %v472_v48, 7  ;;  %v3975_v56 = vld [vmem:[#allocation2 + $0x18] sm:$0xe] }
  0x39   : > { %v648_v59 = vsel %vm3884_vm8, %v643_v46, %v647_v31  ;;  %3429 = vmatpush3.bf16.msra.mxu1 %v3611_v22  ;;  %v541_v12 = vsel %vm3840_vm4, %v469_v61, %v540_v42  ;;  %v661_v20 = vrot.slane %v659_v60, 5  ;;  %v362_v22 = vadd.f32 %v3801_v17, %v350_v58  ;;  %v3621_v31 = vld [vmem:[%s4499_s2 + $0xd0] sm:$0xff]   ;;  %v989_v46 = vld [vmem:[#allocation2 + $0x8] sm:$0xe] }
  0x3a   : > { %v2919_v63 = vcombine.low %v634_v9, %v648_v59  ;;  %3430 = vmatprep.subr.bf16.mxu1 %v3613_v35  ;;  %v544_v3 = vsel %vm3846_vm5, %v470_v62, %v543_v45  ;;  %v656_v8 = vor.u32 %v655_v2, %v652_v1  ;;  %v477_v10 = vor.u32 %v475_v50, %v474_v23 }
  0x3b   : > { %v478_v11 = vrot.slane %v474_v23, 4  ;;  %542 = vst [vmem:[#allocation2 + $0x30] sm:$0xf] %v541_v12  ;;  %545 = vst [vmem:[#allocation2 + $0x34] sm:$0x1] %v544_v3  ;;  %v1017_v28 = vrot.slane %v3850_v54, 5 }
  0x3c   : > { %3371 = vmatmul.mubr.bf16.vlgmr.msra.gmra.mxu0 %v2919_v63  ;;  %v563_v7 = vld [vmem:[#allocation2 + $0x28] sm:$0xf]  ;;  %v3942_v19 = vld [vmem:[#allocation2 + $0x2c] sm:$0x1]  ;;  %v657_v24 = vrot.slane %v656_v8, 4  ;;  %v1021_v32 = vrot.slane %v3880_v37, 5 }
  0x3d   : > { %3403 = vmatpush3.bf16.msra.mxu0 %v3830_v43  ;;  %3431 = vmatpush3.bf16.msra.mxu1 %v3613_v35  ;;  %v664_v14 = vshrl.u32 %v563_v7, 16  ;;  %v667_v15 = vshll.u32 %v563_v7, 16  ;;  %v2932_v16 = vcombine.low %v562_v44, %v563_v7  ;;  %v547_v43 = vsel %vm3840_vm4, %v477_v10, %v546_v4  ;;  %v3966_v44 = vld [vmem:[#allocation2 + $0x10] sm:$0xe]  ;;  %v3987_v10 = vld [vmem:[#allocation2 + $0x20] sm:$0xe] }
  0x3e   : > { %3404 = vmatprep.subr.bf16.mxu0 %v3610_v51  ;;  %3432 = vmatprep.subr.bf16.mxu1 %v3615_v0  ;;  %v550_v21 = vsel %vm3846_vm5, %v478_v11, %v549_v5  ;;  %v673_v27 = vshll.u32 %v3942_v19, 16  ;;  %548 = vst [vmem:[#allocation2 + $0x38] sm:$0xf] %v547_v43  ;;  %v370_v34 = vmax.f32 %v362_v22, 0.0  ;;  %v1025_v35 = vrot.slane %v3890_v52, 5  ;;  %v3620_v4 = vld [vmem:[%s4499_s2 + $0x90] sm:$0xff]  }
  0x3f   : > { %v666_v25 = vrot.slane %v664_v14, 4  ;;  %v669_v26 = vrot.slane %v667_v15, 5  ;;  %3398 = vmatprep.mubr.bf16.mxu1 %v2932_v16  ;;  %551 = vst [vmem:[#allocation2 + $0x3c] sm:$0x1] %v550_v21  ;;  %v662_v36 = vsel %vm3884_vm8, %v657_v24, %v661_v20  ;;  %v1029_v47 = vrot.slane %v3898_v6, 5  ;;  %v3625_v5 = vld [vmem:[%s4499_s2 + $0xc0] sm:$0xff]  }
  0x40   : > { %v675_v17 = vrot.slane %v673_v27, 5  ;;  %v3190_v62 = vpack.c.bf16 %v370_v34, %v370_v34  ;;  %v2942_v2 = vrot.slane %v988_v33, 9  ;;  %v3626_v23 = vld [vmem:[#allocation2 + $0x8] ss:$8 sps:$4 sm:$0xff]   ;;  %v2943_v7 = vrot.slane %v989_v46, 9  ;;  %v3628_v54 = vld [vmem:[%s4499_s2 + $0x178] sm:$0xff]  }
  0x41   : > { %3405 = vmatpush3.bf16.msra.mxu0 %v3610_v51  ;;  %3433 = vmatpush3.bf16.msra.mxu1 %v3615_v0  ;;  %v670_v30 = vor.u32 %v669_v26, %v666_v25  ;;  %v3623_v51 = vld [vmem:[%s4499_s2 + $0xc8] sm:$0xff]   ;;  %v2944_v8 = vrot.slane %v3966_v44, 9  ;;  %v2945_v16 = vrot.slane %v3975_v56, 9  ;;  %v552_v25 = vld [vmem:[#allocation2 + $0x40] sm:$0xf] }
  0x42   : > { %3406 = vmatprep.subr.bf16.mxu0 %v3612_v13  ;;  %3434 = vmatprep.subr.bf16.mxu1 %v3617_v18  ;;  %v564_v40 = vld [vmem:[#allocation2 + $0x30] sm:$0xf]  ;;  %v3961_v9 = vld [vmem:[#allocation2 + $0x34] sm:$0x1]  ;;  %v480_v21 = vshrl.u32 %v3190_v62, 16  ;;  %v483_v22 = vshll.u32 %v3190_v62, 16  ;;  %v1018_v27 = vsel %vm3991_vm11, %v2942_v2, %v1017_v28 }
  0x43   : > { %v671_v39 = vrot.slane %v670_v30, 4  ;;  %v678_v42 = vshrl.u32 %v564_v40, 16  ;;  %v681_v45 = vshll.u32 %v564_v40, 16  ;;  %v687_v50 = vshll.u32 %v3961_v9, 16  ;;  %v3622_v26 = vld [vmem:[%s4499_s2 + $0x88] sm:$0xff]  }
  0x44   : > { %v1033_v30 = vrot.slane %v3922_v55, 5  ;;  %v2946_v28 = vrot.slane %v3987_v10, 9  ;;  %v3629_v37 = vld [vmem:[#allocation2 + $0x18] ss:$8 sps:$4 sm:$0xff]   ;;  %v1037_v55 = vrot.slane %v3942_v19, 5  ;;  %v4034_v44 = vsel %vm3991_vm11, %v2944_v8, %v1025_v35 }
  0x45   : > { %3407 = vmatpush3.bf16.msra.mxu0 %v3612_v13  ;;  %3435 = vmatpush3.bf16.msra.mxu1 %v3617_v18  ;;  %v676_v48 = vsel %vm3884_vm8, %v671_v39, %v675_v17  ;;  %v565_v58 = vld [vmem:[#allocation2 + $0x38] sm:$0xf]  ;;  %v680_v60 = vrot.slane %v678_v42, 4  ;;  %v683_v61 = vrot.slane %v681_v45, 5  ;;  %v689_v11 = vrot.slane %v687_v50, 5  ;;  %v3624_v42 = vld [vmem:[%s4499_s2 + $0x80] sm:$0xff]  }
  0x46   : > { %3408 = vmatprep.subr.bf16.mxu0 %v3614_v29  ;;  %v2920_v57 = vcombine.low %v662_v36, %v676_v48  ;;  %v3977_v59 = vld [vmem:[#allocation2 + $0x3c] sm:$0x1]  ;;  %3436 = vmatprep.subr.bf16.mxu1 %v3621_v31  ;;  %v692_v63 = vshrl.u32 %v565_v58, 16  ;;  %v695_v0 = vshll.u32 %v565_v58, 16  ;;  %v2933_v3 = vcombine.low %v564_v40, %v565_v58  ;;  %v993_v18 = vld [vmem:[#allocation2 + $0x28] sm:$0xe] }
  0x47   : > { %v701_v1 = vshll.u32 %v3977_v59, 16  ;;  %v684_v12 = vor.u32 %v683_v61, %v680_v60  ;;  %v4008_v17 = vrot.slane %v480_v21, 7  ;;  %v4020_v40 = vld [vmem:[#allocation2 + $0x30] sm:$0xe]  ;;  %v1371_v48 = vld [vmem:[#allocation2 + $0x8] sm:$0xf]  ;;  %v1030_v49 = vsel %vm3991_vm11, %v2945_v16, %v1029_v47 }
  0x48   : > { %3374 = vmatprep.mubr.bf16.mxu0 %v2920_v57  ;;  %v694_v13 = vrot.slane %v692_v63, 4  ;;  %v697_v14 = vrot.slane %v695_v0, 5  ;;  %3399 = vmatmul.mubr.bf16.gmra.mxu1 %v2933_v3  ;;  %v3631_v45 = vld [vmem:[%s4499_s2 + $0x170] sm:$0xff]   ;;  %v4036_v50 = vld [vmem:[#allocation2 + $0xc] sm:$0x1]  ;;  %v1388_v57 = vshrl.u32 %v1371_v48, 16  ;;  %v1034_v35 = vsel %vm3991_vm11, %v2946_v28, %v1033_v30 }
  0x49   : > { %3409 = vmatpush3.bf16.msra.mxu0 %v3614_v29  ;;  %3437 = vmatpush3.bf16.msra.mxu1 %v3621_v31  ;;  %v685_v20 = vrot.slane %v684_v12, 4  ;;  %v703_v43 = vrot.slane %v701_v1, 5  ;;  %v1022_v29 = vsel %vm3991_vm11, %v2943_v7, %v1021_v32  ;;  %v2947_v32 = vrot.slane %v993_v18, 9  ;;  %v3634_v46 = vld [vmem:[#allocation2 + $0x28] ss:$8 sps:$4 sm:$0xff]   ;;  %v3627_v12 = vld [vmem:[%s4499_s2 + $0x138] sm:$0xff]  }
  0x4a   : > { %3410 = vmatprep.subr.bf16.mxu0 %v3616_v41  ;;  %v698_v24 = vor.u32 %v697_v14, %v694_v13  ;;  %3438 = vmatprep.subr.bf16.mxu1 %v3623_v51  ;;  %v485_v34 = vor.u32 %v483_v22, %v4008_v17  ;;  %v2966_v39 = vcombine.low %v1018_v27, %v1022_v29  ;;  %v4042_v56 = vld [vmem:[#allocation2 + $0x14] sm:$0x1]  ;;  %v1391_v58 = vshll.u32 %v1371_v48, 16  ;;  %v995_v61 = vld [vmem:[#allocation2 + $0x38] sm:$0xe]  ;;  %v3633_v3 = vld [vmem:[%s4499_s2 + $0x168] sm:$0xff]  }
  0x4b   : > { %3442 = vmatprep.mubr.bf16.mxu1 %v3626_v23  ;;  %v690_v31 = vsel %vm3884_vm8, %v685_v20, %v689_v11  ;;  %v1038_v60 = vsel %vm3991_vm11, %v2947_v32, %v1037_v55  ;;  %v2948_v62 = vrot.slane %v4020_v40, 9  ;;  %v1375_v63 = vld [vmem:[#allocation2 + $0x18] sm:$0xf]  ;;  %v1390_v47 = vrot.slane %v1388_v57, 4  ;;  %v1377_v23 = vld [vmem:[#allocation2 + $0x20] sm:$0xf] }
  0x4c   : > { %v699_v33 = vrot.slane %v698_v24, 4  ;;  %v553_v19 = vsel %vm3840_vm4, %v485_v34, %v552_v25  ;;  %v1393_v0 = vrot.slane %v1391_v58, 5  ;;  %v1397_v1 = vshll.u32 %v4036_v50, 16  ;;  %v4059_v16 = vld [vmem:[#allocation2 + $0x1c] sm:$0x1]  ;;  %v3630_v20 = vld [vmem:[%s4499_s2 + $0x130] sm:$0xff]  }
  0x4d   : > { %3411 = vmatpush3.bf16.msra.mxu0 %v3616_v41  ;;  %3439 = vmatpush3.bf16.msra.mxu1 %v3623_v51  ;;  %554 = vst [vmem:[#allocation2 + $0x40] sm:$0xf] %v553_v19  ;;  %v1373_v51 = vld [vmem:[#allocation2 + $0x10] sm:$0xf]  ;;  %v1416_v7 = vshrl.u32 %v1375_v63, 16  ;;  %v1419_v8 = vshll.u32 %v1375_v63, 16  ;;  %v2967_v10 = vcombine.low %v4034_v44, %v1030_v49 }
  0x4e   : > { %3412 = vmatprep.subr.bf16.mxu0 %v3620_v4  ;;  %3440 = vmatprep.subr.bf16.mxu1 %v3625_v5  ;;  %v704_v36 = vsel %vm3884_vm8, %v699_v33, %v703_v43  ;;  %v1402_v52 = vshrl.u32 %v1373_v51, 16  ;;  %v1405_v6 = vshll.u32 %v1373_v51, 16  ;;  %v1041_v11 = vrot.slane %v3961_v9, 5  ;;  %v1653_v18 = vld [vmem:[#allocation2 + $0x8] sm:$0xe]  ;;  %v3637_v9 = vld [vmem:[%s4499_s2 + $0x160] sm:$0xff]  }
  0x4f   : > { %v2921_v41 = vcombine.low %v690_v31, %v704_v36  ;;  %v2949_v13 = vrot.slane %v995_v61, 9  ;;  %v1394_v14 = vor.u32 %v1393_v0, %v1390_v47  ;;  %v2968_v43 = vcombine.low %v1034_v35, %v1038_v60  ;;  %v1654_v31 = vld [vmem:[#allocation2 + $0x10] sm:$0xe]  ;;  %v3639_v49 = vld [vmem:[%s4499_s2 + $0x158] sm:$0xff]   ;;  %v3636_v58 = vld [vmem:[%s4499_s2 + $0x120] sm:$0xff]  }
  0x50   : > { %v1404_v2 = vrot.slane %v1402_v52, 4  ;;  %v1430_v24 = vshrl.u32 %v1377_v23, 16  ;;  %v1433_v25 = vshll.u32 %v1377_v23, 16  ;;  %v1399_v27 = vrot.slane %v1397_v1, 5  ;;  %v1379_v61 = vld [vmem:[#allocation2 + $0x28] sm:$0xf] }
  0x51   : > { %3413 = vmatpush3.bf16.msra.mxu0 %v3620_v4  ;;  %3441 = vmatpush3.bf16.msra.mxu1 %v3625_v5  ;;  %v1407_v4 = vrot.slane %v1405_v6, 5  ;;  %v1411_v5 = vshll.u32 %v4042_v56, 16  ;;  %v1418_v29 = vrot.slane %v1416_v7, 4  ;;  %v1421_v30 = vrot.slane %v1419_v8, 5  ;;  %v4103_v47 = vld [vmem:[#allocation2 + $0x2c] sm:$0x1] }
  0x52   : > { %3375 = vmatmul.mubr.bf16.gmra.mxu0 %v2921_v41  ;;  %3414 = vmatprep.subr.bf16.mxu0 %v3622_v26  ;;  %v1395_v33 = vrot.slane %v1394_v14, 4  ;;  %v1042_v32 = vsel %vm3991_vm11, %v2948_v62, %v1041_v11  ;;  %v1679_v55 = vrot.slane %v4036_v50, 5  ;;  %v1425_v34 = vshll.u32 %v4059_v16, 16  ;;  %v1381_v62 = vld [vmem:[#allocation2 + $0x30] sm:$0xf]  ;;  %v3638_v11 = vld [vmem:[%s4499_s2 + $0x118] sm:$0xff]  }
  0x53   : > { %3418 = vmatprep.mubr.bf16.mxu0 %v2966_v39  ;;  %3474 = vmatprep.subr.bf16.mxu1 %v3628_v54  ;;  %v1408_v22 = vor.u32 %v1407_v4, %v1404_v2  ;;  %v1413_v28 = vrot.slane %v1411_v5, 5  ;;  %v1432_v36 = vrot.slane %v1430_v24, 4  ;;  %v1435_v39 = vrot.slane %v1433_v25, 5  ;;  %v4105_v2 = vld [vmem:[#allocation2 + $0x34] sm:$0x1] }
  0x54   : > { %3443 = vmatmul.mubr.bf16.vlgmr.msra.gmra.mxu1 %v3629_v37  ;;  %v3635_v21 = vld [vmem:[#allocation2 + $0x38] ss:$8 sps:$4 sm:$0xff]   ;;  %v3034_v37 = vrot.slane %v1653_v18, 9  ;;  %v1683_v40 = vrot.slane %v4042_v56, 5  ;;  %v1400_v44 = vsel %vm3884_vm8, %v1395_v33, %v1399_v27  ;;  %v486_v51 = vrot.slane %v4008_v17, 4  ;;  %v3641_v17 = vld [vmem:[%s4499_s2 + $0x150] sm:$0xff]  }
  0x55   : > { %3415 = vmatpush3.bf16.msra.mxu0 %v3622_v26  ;;  %3475 = vmatpush3.bf16.msra.mxu1 %v3628_v54  ;;  %v1045_v26 = vrot.slane %v3977_v59, 5  ;;  %v1409_v54 = vrot.slane %v1408_v22, 4  ;;  %v3035_v59 = vrot.slane %v1654_v31, 9  ;;  %v4095_v52 = vrot.slane %v1425_v34, 5  ;;  %v1655_v4 = vld [vmem:[#allocation2 + $0x18] sm:$0xe] }
  0x56   : > { %3416 = vmatprep.subr.bf16.mxu0 %v3624_v42  ;;  %3476 = vmatprep.subr.bf16.mxu1 %v3631_v45  ;;  %v1680_v19 = vsel %vm3991_vm11, %v3034_v37, %v1679_v55  ;;  %v1436_v35 = vor.u32 %v1435_v39, %v1432_v36  ;;  %v1444_v0 = vshrl.u32 %v1379_v61, 16  ;;  %v1447_v1 = vshll.u32 %v1379_v61, 16  ;;  %v1656_v14 = vld [vmem:[#allocation2 + $0x20] sm:$0xe]  ;;  %v4118_v25 = vld [vmem:[#allocation2 + $0x3c] sm:$0x1] }
  0x57   : > { %3446 = vmatprep.mubr.bf16.mxu1 %v3634_v46  ;;  %v1046_v41 = vsel %vm3991_vm11, %v2949_v13, %v1045_v26  ;;  %v3632_v46 = vld [vmem:[%s4499_s2 + $0x128] sm:$0xff]   ;;  %v1414_v48 = vsel %vm3884_vm8, %v1409_v54, %v1413_v28  ;;  %v1684_v50 = vsel %vm3991_vm11, %v3035_v59, %v1683_v40  ;;  %v1458_v23 = vshrl.u32 %v1381_v62, 16  ;;  %v1385_v22 = vld [vmem:[#allocation2 + $0x40] sm:$0xf]  ;;  %v3640_v54 = vld [vmem:[%s4499_s2 + $0x110] sm:$0xff]  }
  0x58   : > { %v3058_v56 = vcombine.low %v1680_v19, %v1684_v50  ;;  %v2969_v57 = vcombine.low %v1042_v32, %v1046_v41  ;;  %v3022_v6 = vcombine.low %v1400_v44, %v1414_v48  ;;  %v1446_v5 = vrot.slane %v1444_v0, 4  ;;  %v3643_v27 = vld [vmem:[%s4499_s2 + $0x148] sm:$0xff]   ;;  %v1658_v39 = vld [vmem:[#allocation2 + $0x30] sm:$0xe] }
  0x59   : > { %3417 = vmatpush3.bf16.msra.mxu0 %v3624_v42  ;;  %3477 = vmatpush3.bf16.msra.mxu1 %v3631_v45  ;;  %v4075_v42 = vld [vmem:[#allocation2 + $0x24] sm:$0x1]  ;;  %v1422_v45 = vor.u32 %v1421_v30, %v1418_v29  ;;  %v1449_v7 = vrot.slane %v1447_v1, 5  ;;  %v1453_v18 = vshll.u32 %v4103_v47, 16  ;;  %v1467_v53 = vshll.u32 %v4105_v2, 16  ;;  %v3642_v50 = vld [vmem:[%s4499_s2 + $0x108] sm:$0xff]  }
  0x5a   : > { %3450 = vmatprep.subr.bf16.mxu0 %v3627_v12  ;;  %3478 = vmatprep.subr.bf16.mxu1 %v3633_v3  ;;  %v1439_v60 = vshll.u32 %v4075_v42, 16  ;;  %v1687_v29 = vrot.slane %v4059_v16, 5  ;;  %v1486_v31 = vshrl.u32 %v1385_v22, 16  ;;  %v1489_v33 = vshll.u32 %v1385_v22, 16  ;;  %v1657_v36 = vld [vmem:[#allocation2 + $0x28] sm:$0xe] }
  0x5b   : > { %v4101_v63 = vrot.slane %v1422_v45, 4  ;;  %v1450_v24 = vor.u32 %v1449_v7, %v1446_v5  ;;  %v3036_v28 = vrot.slane %v1655_v4, 9  ;;  %v3037_v37 = vrot.slane %v1656_v14, 9  ;;  %v3649_v4 = vld [vmem:[%s4499_s2 + $0x1f0] sm:$0xff]  }
  0x5c   : > { %3419 = vmatmul.mubr.bf16.vlgmr.msra.gmra.mxu0 %v2967_v10  ;;  %3447 = vmatmul.mubr.bf16.gmra.mxu1 %v3635_v21  ;;  %v1383_v10 = vld [vmem:[#allocation2 + $0x38] sm:$0xf]  ;;  %v4112_v13 = vrot.slane %v1439_v60, 5  ;;  %v4115_v21 = vrot.slane %v1436_v35, 4  ;;  %v1691_v32 = vrot.slane %v4075_v42, 5  ;;  %v1455_v55 = vrot.slane %v1453_v18, 5 }
  0x5d   : > { %3451 = vmatpush3.bf16.msra.mxu0 %v3627_v12  ;;  %3422 = vmatprep.mubr.bf16.mxu0 %v2968_v43  ;;  %v1461_v12 = vshll.u32 %v1381_v62, 16  ;;  %v1472_v26 = vshrl.u32 %v1383_v10, 16  ;;  %v1469_v59 = vrot.slane %v1467_v53, 5  ;;  %v1481_v34 = vshll.u32 %v4118_v25, 16  ;;  %v3645_v42 = vld [vmem:[%s4499_s2 + $0x140] sm:$0xff]   ;;  %v3651_v18 = vld [vmem:[%s4499_s2 + $0x1e8] sm:$0xff]  }
  0x5e   : > { %3452 = vmatprep.subr.bf16.mxu0 %v3630_v20  ;;  %3479 = vmatpush3.bf16.msra.mxu1 %v3633_v3  ;;  %v555_v3 = vld [vmem:[#allocation2 + $0x44] sm:$0x1]  ;;  %v1451_v16 = vrot.slane %v1450_v24, 4  ;;  %v1695_v45 = vrot.slane %v4103_v47, 5  ;;  %v1491_v44 = vrot.slane %v1489_v33, 5  ;;  %v1699_v48 = vrot.slane %v4105_v2, 5 }
  0x5f   : > { %3480 = vmatprep.subr.bf16.mxu1 %v3637_v9  ;;  %3490 = vmatprep.mubr.bf16.mxu1 %v3058_v56  ;;  %v556_v8 = vsel %vm3846_vm5, %v486_v51, %v555_v3  ;;  %v1463_v43 = vrot.slane %v1461_v12, 5  ;;  %v4129_v40 = vrot.slane %v1472_v26, 4  ;;  %v3038_v51 = vrot.slane %v1657_v36, 9  ;;  %v3647_v56 = vld [vmem:[%s4499_s2 + $0x1f8] sm:$0xff]   ;;  %v1660_v60 = vld [vmem:[#allocation2 + $0x40] sm:$0xe] }
  0x60   : > { %557 = vst [vmem:[#allocation2 + $0x44] sm:$0x1] %v556_v8  ;;  %v1692_v35 = vsel %vm3991_vm11, %v3037_v37, %v1691_v32  ;;  %v3644_v62 = vld [vmem:[%s4499_s2 + $0x100] sm:$0xff]   ;;  %v1703_v1 = vrot.slane %v4118_v25, 5  ;;  %v1428_v2 = vsel %vm3884_vm8, %v4101_v63, %v4095_v52  ;;  %v3041_v12 = vrot.slane %v1660_v60, 9  ;;  %v3646_v52 = vld [vmem:[%s4499_s2 + $0x1b8] sm:$0xff]  }
  0x61   : > { %3453 = vmatpush3.bf16.msra.mxu0 %v3630_v20  ;;  %v1460_v20 = vrot.slane %v1458_v23, 4  ;;  %v1442_v23 = vsel %vm3884_vm8, %v4115_v21, %v4112_v13  ;;  %v1456_v5 = vsel %vm3884_vm8, %v1451_v16, %v1455_v55  ;;  %v4176_v13 = vrot.slane %v1481_v34, 5  ;;  %v4185_v22 = vld [vmem:[#allocation2 + $0x14] sm:$0x1]  ;;  %v2036_v24 = vld [vmem:[#allocation2 + $0x18] sm:$0xf] }
  0x62   : > { %3454 = vmatprep.subr.bf16.mxu0 %v3632_v46  ;;  %3481 = vmatpush3.bf16.msra.mxu1 %v3637_v9  ;;  %v1475_v9 = vshll.u32 %v1383_v10, 16  ;;  %v4187_v25 = vld [vmem:[#allocation2 + $0x1c] sm:$0x1]  ;;  %v2068_v33 = vshll.u32 %v2036_v24, 16  ;;  %v3648_v34 = vld [vmem:[%s4499_s2 + $0x1b0] sm:$0xff]  }
  0x63   : > { %3482 = vmatprep.subr.bf16.mxu1 %v3639_v49  ;;  %v1464_v30 = vor.u32 %v1463_v43, %v1460_v20  ;;  %v2034_v20 = vld [vmem:[#allocation2 + $0x10] sm:$0xf]  ;;  %v2040_v16 = vld [vmem:[#allocation2 + $0x28] sm:$0xf]  ;;  %v4210_v60 = vld [vmem:[#allocation2 + $0x2c] sm:$0x1] }
  0x64   : > { %3423 = vmatmul.mubr.bf16.gmra.mxu0 %v2969_v57  ;;  %v4131_v41 = vrot.slane %v1475_v9, 5  ;;  %v1659_v57 = vld [vmem:[#allocation2 + $0x38] sm:$0xe]  ;;  %v2051_v26 = vshrl.u32 %v2034_v20, 16  ;;  %v2054_v9 = vshll.u32 %v2034_v20, 16 }
  0x65   : > { %3455 = vmatpush3.bf16.msra.mxu0 %v3632_v46  ;;  %3466 = vmatprep.mubr.bf16.mxu0 %v3022_v6  ;;  %v1465_v19 = vrot.slane %v1464_v30, 4  ;;  %v1488_v46 = vrot.slane %v1486_v31, 4  ;;  %v3040_v0 = vrot.slane %v1659_v57, 9  ;;  %v3655_v57 = vld [vmem:[%s4499_s2 + $0x1d8] sm:$0xff]  }
  0x66   : > { %3456 = vmatprep.subr.bf16.mxu0 %v3636_v58  ;;  %3483 = vmatpush3.bf16.msra.mxu1 %v3639_v49  ;;  %v3039_v49 = vrot.slane %v1658_v39, 9  ;;  %v1478_v63 = vor.u32 %v4131_v41, %v4129_v40  ;;  %v2053_v37 = vrot.slane %v2051_v26, 4  ;;  %v2056_v32 = vrot.slane %v2054_v9, 5  ;;  %v3653_v40 = vld [vmem:[%s4499_s2 + $0x1e0] sm:$0xff]  }
  0x67   : > { %3484 = vmatprep.subr.bf16.mxu1 %v3641_v17  ;;  %v1386_v61 = vld [vmem:[#allocation2 + $0x44] sm:$0x1]  ;;  %v1470_v7 = vsel %vm3884_vm8, %v1465_v19, %v1469_v59  ;;  %v1492_v10 = vor.u32 %v1491_v44, %v1488_v46  ;;  %v1704_v21 = vsel %vm3991_vm11, %v3040_v0, %v1703_v1  ;;  %v2038_v59 = vld [vmem:[#allocation2 + $0x20] sm:$0xf]  ;;  %v2070_v39 = vrot.slane %v2068_v33, 5  ;;  %v3650_v46 = vld [vmem:[%s4499_s2 + $0x1a8] sm:$0xff]  }
  0x68   : > { %v1700_v6 = vsel %vm3991_vm11, %v3039_v49, %v1699_v48  ;;  %v1707_v3 = vrot.slane %v1386_v61, 5  ;;  %v1495_v14 = vshll.u32 %v1386_v61, 16  ;;  %v3024_v43 = vcombine.low %v1456_v5, %v1470_v7  ;;  %v2044_v7 = vld [vmem:[#allocation2 + $0x38] sm:$0xf] }
  0x69   : > { %3457 = vmatpush3.bf16.msra.mxu0 %v3636_v58  ;;  %v1688_v58 = vsel %vm3991_vm11, %v3036_v28, %v1687_v29  ;;  %v2065_v29 = vshrl.u32 %v2036_v24, 16  ;;  %v1479_v30 = vrot.slane %v1478_v63, 4  ;;  %v1493_v31 = vrot.slane %v1492_v10, 4 }
  0x6a   : > { %3458 = vmatprep.subr.bf16.mxu0 %v3638_v11  ;;  %3485 = vmatpush3.bf16.msra.mxu1 %v3641_v17  ;;  %v1696_v17 = vsel %vm3991_vm11, %v3038_v51, %v1695_v45  ;;  %v3059_v47 = vcombine.low %v1688_v58, %v1692_v35  ;;  %v1708_v53 = vsel %vm3991_vm11, %v3041_v12, %v1707_v3  ;;  %v1497_v28 = vrot.slane %v1495_v14, 5  ;;  %v4208_v35 = vld [vmem:[#allocation2 + $0x24] sm:$0x1]  ;;  %v2042_v12 = vld [vmem:[#allocation2 + $0x30] sm:$0xf] }
  0x6b   : > { %3486 = vmatprep.subr.bf16.mxu1 %v3643_v27  ;;  %v3060_v8 = vcombine.low %v1696_v17, %v1700_v6  ;;  %v2067_v55 = vrot.slane %v2065_v29, 4  ;;  %v3061_v36 = vcombine.low %v1704_v21, %v1708_v53  ;;  %v2057_v41 = vor.u32 %v2056_v32, %v2053_v37  ;;  %v4216_v3 = vld [vmem:[#allocation2 + $0x34] sm:$0x1]  ;;  %v3659_v32 = vld [vmem:[%s4499_s2 + $0x1c8] sm:$0xff]  }
  0x6c   : > { %v2082_v19 = vshll.u32 %v2038_v59, 16  ;;  %v2096_v51 = vshll.u32 %v2040_v16, 16  ;;  %v1484_v49 = vsel %vm3884_vm8, %v1479_v30, %v4176_v13  ;;  %v2088_v63 = vshll.u32 %v4208_v35, 16  ;;  %v3657_v14 = vld [vmem:[%s4499_s2 + $0x1d0] sm:$0xff]   ;;  %v2046_v30 = vld [vmem:[#allocation2 + $0x40] sm:$0xf] }
  0x6d   : > { %3459 = vmatpush3.bf16.msra.mxu0 %v3638_v11  ;;  %v3023_v11 = vcombine.low %v1428_v2, %v1442_v23  ;;  %v2071_v44 = vor.u32 %v2070_v39, %v2067_v55  ;;  %v2058_v58 = vrot.slane %v2057_v41, 4  ;;  %v3662_v2 = vld [vmem:[#allocation2 + $0x10] ss:$8 sps:$4 sm:$0xff]   ;;  %v2102_v10 = vshll.u32 %v4210_v60, 16 }
  0x6e   : > { %3460 = vmatprep.subr.bf16.mxu0 %v3640_v54  ;;  %3487 = vmatpush3.bf16.msra.mxu1 %v3643_v27  ;;  %v2060_v27 = vshll.u32 %v4185_v22, 16  ;;  %v2084_v17 = vrot.slane %v2082_v19, 5  ;;  %v2121_v13 = vshrl.u32 %v2044_v7, 16  ;;  %v2124_v21 = vshll.u32 %v2044_v7, 16  ;;  %v3656_v39 = vld [vmem:[%s4499_s2 + $0x190] sm:$0xff]  }
  0x6f   : > { %3488 = vmatprep.subr.bf16.mxu1 %v3645_v42  ;;  %v2116_v24 = vshll.u32 %v4216_v3, 16  ;;  %v2104_v33 = vrot.slane %v2102_v10, 5  ;;  %v2138_v37 = vshll.u32 %v2046_v30, 16  ;;  %v4242_v19 = vld [vmem:[#allocation2 + $0x44] sm:$0x1] }
  0x70   : > { %v2062_v45 = vrot.slane %v2060_v27, 5  ;;  %v2123_v26 = vrot.slane %v2121_v13, 4  ;;  %v3654_v27 = vld [vmem:[%s4499_s2 + $0x198] sm:$0xff]   ;;  %v2126_v29 = vrot.slane %v2124_v21, 5 }
  0x71   : > { %3461 = vmatpush3.bf16.msra.mxu0 %v3640_v54  ;;  %v2074_v54 = vshll.u32 %v4187_v25, 16  ;;  %v2118_v41 = vrot.slane %v2116_v24, 5  ;;  %v3666_v21 = vld [vmem:[#allocation2 + $0x30] ss:$8 sps:$4 sm:$0xff]  }
  0x72   : > { %3462 = vmatprep.subr.bf16.mxu0 %v3642_v50  ;;  %3489 = vmatpush3.bf16.msra.mxu1 %v3645_v42  ;;  %v2079_v42 = vshrl.u32 %v2038_v59, 16  ;;  %v2063_v0 = vsel %vm3884_vm8, %v2058_v58, %v2062_v45  ;;  %v2127_v59 = vor.u32 %v2126_v29, %v2123_v26  ;;  %v3665_v24 = vld [vmem:[%s4499_s2 + $0x230] sm:$0xff]   ;;  %v2346_v29 = vrot.slane %v4187_v25, 5  ;;  %v3667_v25 = vld [vmem:[#allocation2 + $0x40] ss:$8 sps:$4 sm:$0xff]  }
  0x73   : > { %3522 = vmatprep.subr.bf16.mxu1 %v3647_v56  ;;  %v2076_v48 = vrot.slane %v2074_v54, 5  ;;  %v2048_v54 = vld [vmem:[#allocation2 + $0x48] sm:$0xf] }
  0x74   : > { %v2081_v61 = vrot.slane %v2079_v42, 4  ;;  %v3661_v42 = vld [vmem:[%s4499_s2 + $0x1c0] sm:$0xff]  }
  0x75   : > { %3463 = vmatpush3.bf16.msra.mxu0 %v3642_v50  ;;  %3491 = vmatmul.mubr.bf16.vlgmr.msra.gmra.mxu1 %v3059_v47  ;;  %v2093_v50 = vshrl.u32 %v2040_v16, 16  ;;  %v2098_v47 = vrot.slane %v2096_v51, 5 }
  0x76   : > { %3464 = vmatprep.subr.bf16.mxu0 %v3644_v62  ;;  %3523 = vmatpush3.bf16.msra.mxu1 %v3647_v56  ;;  %v1498_v56 = vsel %vm3884_vm8, %v1493_v31, %v1497_v28  ;;  %v2090_v31 = vrot.slane %v2088_v63, 5  ;;  %v2135_v28 = vshrl.u32 %v2046_v30, 16  ;;  %v3668_v30 = vld [vmem:[%s4499_s2 + $0x228] sm:$0xff]  }
  0x77   : > { %3524 = vmatprep.subr.bf16.mxu1 %v3649_v4  ;;  %3494 = vmatprep.mubr.bf16.mxu1 %v3060_v8  ;;  %v2095_v6 = vrot.slane %v2093_v50, 4  ;;  %v3025_v1 = vcombine.low %v1484_v49, %v1498_v56  ;;  %v4221_v8 = vld [vmem:[#allocation2 + $0x3c] sm:$0x1]  ;;  %v2128_v56 = vrot.slane %v2127_v59, 4 }
  0x78   : > { %v2130_v9 = vshll.u32 %v4221_v8, 16  ;;  %v3676_v59 = vld [vmem:[%s4250_s17 + $0x18] sm:$0xff]  }
  0x79   : > { %3465 = vmatpush3.bf16.msra.mxu0 %v3644_v62  ;;  %v2072_v62 = vrot.slane %v2071_v44, 4  ;;  %v2099_v20 = vor.u32 %v2098_v47, %v2095_v6  ;;  %v2137_v44 = vrot.slane %v2135_v28, 4  ;;  %v3672_v28 = vld [vmem:[%s4250_s17 + $0x8] sm:$0xff]  }
  0x7a   : > { %3498 = vmatprep.subr.bf16.mxu0 %v3646_v52  ;;  %3525 = vmatpush3.bf16.msra.mxu1 %v3649_v4  ;;  %v3652_v4 = vld [vmem:[%s4499_s2 + $0x1a0] sm:$0xff]   ;;  %v2132_v45 = vrot.slane %v2130_v9, 5  ;;  %v2342_v9 = vrot.slane %v4185_v22, 5 }
  0x7b   : > { %3526 = vmatprep.subr.bf16.mxu1 %v3651_v18  ;;  %v2077_v23 = vsel %vm3884_vm8, %v2072_v62, %v2076_v48  ;;  %v2140_v48 = vrot.slane %v2138_v37, 5  ;;  %v3674_v37 = vld [vmem:[%s4250_s17 + $0x10] sm:$0xff]  }
  0x7c   : > { %3467 = vmatmul.mubr.bf16.vlgmr.msra.gmra.mxu0 %v3023_v11  ;;  %v3114_v5 = vcombine.low %v2063_v0, %v2077_v23  ;;  %v2110_v11 = vshll.u32 %v2042_v12, 16 }
  0x7d   : > { %3499 = vmatpush3.bf16.msra.mxu0 %v3646_v52  ;;  %3470 = vmatprep.mubr.bf16.mxu0 %v3024_v43  ;;  %v2107_v52 = vshrl.u32 %v2042_v12, 16  ;;  %v2141_v6 = vor.u32 %v2140_v48, %v2137_v44  ;;  %v2354_v44 = vrot.slane %v4210_v60, 5  ;;  %v3677_v48 = vld [vmem:[%s4499_s2 + $0x200] sm:$0xff]  }
  0x7e   : > { %3500 = vmatprep.subr.bf16.mxu0 %v3648_v34  ;;  %3527 = vmatpush3.bf16.msra.mxu1 %v3651_v18  ;;  %v2085_v18 = vor.u32 %v2084_v17, %v2081_v61  ;;  %v2112_v53 = vrot.slane %v2110_v11, 5  ;;  %v2144_v61 = vshll.u32 %v4242_v19, 16  ;;  %v3664_v11 = vld [vmem:[%s4499_s2 + $0x238] sm:$0xff]  }
  0x7f   : > { %3495 = vmatmul.mubr.bf16.gmra.mxu1 %v3061_v36  ;;  %3528 = vmatprep.subr.bf16.mxu1 %v3653_v40  ;;  %v2109_v43 = vrot.slane %v2107_v52, 4  ;;  %v2152_v36 = vshll.u32 %v2048_v54, 16  ;;  %v2142_v7 = vrot.slane %v2141_v6, 4  ;;  %v2366_v6 = vrot.slane %v4242_v19, 5 }
  0x80   : > { %3538 = vmatprep.mubr.bf16.mxu1 %v3114_v5  ;;  %v2086_v16 = vrot.slane %v2085_v18, 4  ;;  %v2146_v12 = vrot.slane %v2144_v61, 5  ;;  %v2316_v18 = vld [vmem:[#allocation2 + $0x10] sm:$0xe] }
  0x81   : > { %3501 = vmatpush3.bf16.msra.mxu0 %v3648_v34  ;;  %v2113_v55 = vor.u32 %v2112_v53, %v2109_v43  ;;  %v2149_v34 = vshrl.u32 %v2048_v54, 16  ;;  %v2154_v51 = vrot.slane %v2152_v36, 5  ;;  %v3663_v43 = vld [vmem:[#allocation2 + $0x20] ss:$8 sps:$4 sm:$0xff]   ;;  %v3126_v26 = vrot.slane %v2316_v18, 9 }
  0x82   : > { %3502 = vmatprep.subr.bf16.mxu0 %v3650_v46  ;;  %3529 = vmatpush3.bf16.msra.mxu1 %v3653_v40  ;;  %v2100_v40 = vrot.slane %v2099_v20, 4  ;;  %v2091_v58 = vsel %vm3884_vm8, %v2086_v16, %v2090_v31  ;;  %v2147_v13 = vsel %vm3884_vm8, %v2142_v7, %v2146_v12  ;;  %v2317_v20 = vld [vmem:[#allocation2 + $0x18] sm:$0xe]  ;;  %v3669_v54 = vld [vmem:[%s4499_s2 + $0x220] sm:$0xff]   ;;  %v2320_v16 = vld [vmem:[#allocation2 + $0x30] sm:$0xe] }
  0x83   : > { %3530 = vmatprep.subr.bf16.mxu1 %v3655_v57  ;;  %v2151_v50 = vrot.slane %v2149_v34, 4  ;;  %v2114_v49 = vrot.slane %v2113_v55, 4  ;;  %v2343_v31 = vsel %vm3991_vm11, %v3126_v26, %v2342_v9  ;;  %v3673_v55 = vld [vmem:[%s4499_s2 + $0x210] sm:$0xff]   ;;  %v3675_v34 = vld [vmem:[%s4499_s2 + $0x208] sm:$0xff]   ;;  %v2318_v36 = vld [vmem:[#allocation2 + $0x20] sm:$0xe] }
  0x84   : > { %3471 = vmatmul.mubr.bf16.gmra.mxu0 %v3025_v1  ;;  %v2105_v17 = vsel %vm3884_vm8, %v2100_v40, %v2104_v33  ;;  %v2133_v1 = vsel %vm3884_vm8, %v2128_v56, %v2132_v45  ;;  %v2321_v40 = vld [vmem:[#allocation2 + $0x38] sm:$0xe]  ;;  %v2350_v45 = vrot.slane %v4208_v35, 5  ;;  %v2362_v56 = vrot.slane %v4221_v8, 5 }
  0x85   : > { %3503 = vmatpush3.bf16.msra.mxu0 %v3650_v46  ;;  %3514 = vmatprep.mubr.bf16.mxu0 %v3662_v2  ;;  %v4244_v46 = vld [vmem:[#allocation2 + $0x4c] sm:$0x1]  ;;  %v2155_v47 = vor.u32 %v2154_v51, %v2151_v50  ;;  %v2119_v0 = vsel %vm3884_vm8, %v2114_v49, %v2118_v41  ;;  %v2611_v2 = vld [vmem:[%s4501_s4] sm:$0x3]  ;;  %v3115_v23 = vcombine.low %v2091_v58, %v2105_v17  ;;  %v3128_v41 = vrot.slane %v2318_v36, 9 }
  0x86   : > { %3504 = vmatprep.subr.bf16.mxu0 %v3652_v4  ;;  %3531 = vmatpush3.bf16.msra.mxu1 %v3655_v57  ;;  %v3658_v57 = vld [vmem:[%s4499_s2 + $0x188] sm:$0xff]   ;;  %v2158_v62 = vshll.u32 %v4244_v46, 16  ;;  %v3116_v5 = vcombine.low %v2119_v0, %v2133_v1  ;;  %v2647_v10 = vsel %vm2645_vm12, %v2611_v2, 0  ;;  %v3130_v50 = vrot.slane %v2320_v16, 9  ;;  %v2322_v58 = vld [vmem:[#allocation2 + $0x40] sm:$0xe] }
  0x87   : > { %3532 = vmatprep.subr.bf16.mxu1 %v3657_v14  ;;  %v2156_v52 = vrot.slane %v2155_v47, 4  ;;  %v2358_v51 = vrot.slane %v4216_v3, 5  ;;  %v3131_v49 = vrot.slane %v2321_v40, 9  ;;  %v3132_v17 = vrot.slane %v2322_v58, 9 }
  0x88   : > { %v2160_v63 = vrot.slane %v2158_v62, 5  ;;  %v2323_v62 = vld [vmem:[#allocation2 + $0x48] sm:$0xe]  ;;  %v2370_v0 = vrot.slane %v4244_v46, 5 }
  0x89   : > { %3505 = vmatpush3.bf16.msra.mxu0 %v3652_v4  ;;  %v3660_v4 = vld [vmem:[%s4499_s2 + $0x180] sm:$0xff]   ;;  %v2359_v60 = vsel %vm3991_vm11, %v3130_v50, %v2358_v51  ;;  %v2363_v61 = vsel %vm3991_vm11, %v3131_v49, %v2362_v56  ;;  %v3133_v47 = vrot.slane %v2323_v62, 9  ;;  %v2367_v1 = vsel %vm3991_vm11, %v3132_v17, %v2366_v6 }
  0x8a   : > { %3506 = vmatprep.subr.bf16.mxu0 %v3654_v27  ;;  %3533 = vmatpush3.bf16.msra.mxu1 %v3657_v14  ;;  %v2161_v14 = vsel %vm3884_vm8, %v2156_v52, %v2160_v63  ;;  %v3152_v8 = vcombine.low %v2359_v60, %v2363_v61 }
  0x8b   : > { %3534 = vmatprep.subr.bf16.mxu1 %v3659_v32  ;;  %v3117_v53 = vcombine.low %v2147_v13, %v2161_v14 }
  0x8d   : > { %3507 = vmatpush3.bf16.msra.mxu0 %v3654_v27  ;;  %v3127_v27 = vrot.slane %v2317_v20, 9 }
  0x8e   : > { %3508 = vmatprep.subr.bf16.mxu0 %v3656_v39  ;;  %3535 = vmatpush3.bf16.msra.mxu1 %v3659_v32  ;;  %v3671_v32 = vld [vmem:[%s4499_s2 + $0x218] sm:$0xff]  }
  0x8f   : > { %3536 = vmatprep.subr.bf16.mxu1 %v3661_v42  ;;  %v2347_v22 = vsel %vm3991_vm11, %v3127_v27, %v2346_v29 }
  0x90   : > { %v3150_v33 = vcombine.low %v2343_v31, %v2347_v22 }
  0x91   : > { %3509 = vmatpush3.bf16.msra.mxu0 %v3656_v39  ;;  %v2319_v39 = vld [vmem:[#allocation2 + $0x28] sm:$0xe] }
  0x92   : > { %3510 = vmatprep.subr.bf16.mxu0 %v3658_v57  ;;  %3537 = vmatpush3.bf16.msra.mxu1 %v3661_v42  ;;  %v3129_v42 = vrot.slane %v2319_v39, 9 }
  0x93   : > { %3580 = vmatprep.subr.msk.bf16.mxu1 %vm2645_vm12, %v2611_v2  ;;  %v2371_v2 = vsel %vm3991_vm11, %v3133_v47, %v2370_v0 }
  0x94   : > { %v2355_v35 = vsel %vm3991_vm11, %v3129_v42, %v2354_v44 }
  0x95   : > { %3511 = vmatpush3.bf16.msra.mxu0 %v3658_v57  ;;  %3539 = vmatmul.mubr.bf16.vlgmr.msra.gmra.mxu1 %v3115_v23  ;;  %v2351_v57 = vsel %vm3991_vm11, %v3128_v41, %v2350_v45  ;;  %v3153_v23 = vcombine.low %v2367_v1, %v2371_v2 }
  0x96   : > { %3512 = vmatprep.subr.bf16.mxu0 %v3660_v4  ;;  %3542 = vmatprep.mubr.bf16.mxu1 %v3116_v5  ;;  %v3151_v3 = vcombine.low %v2351_v57, %v2355_v35 }
  0x97   : > { %3571 = vmatpush3.bf16.msra.mxu1 %v2647_v10 }
  0x99   : > { %3513 = vmatpush3.bf16.msra.mxu0 %v3660_v4 }
  0x9a   : > { %3546 = vmatprep.subr.bf16.mxu0 %v3664_v11 }
  0x9c   : > { %3515 = vmatmul.mubr.bf16.vlgmr.msra.gmra.mxu0 %v3663_v43 }
  0x9d   : > { %3547 = vmatpush3.bf16.msra.mxu0 %v3664_v11  ;;  %3518 = vmatprep.mubr.bf16.mxu0 %v3666_v21 }
  0x9e   : > { %3548 = vmatprep.subr.bf16.mxu0 %v3665_v24  ;;  %3543 = vmatmul.mubr.bf16.gmra.mxu1 %v3117_v53 }
  0x9f   : > { %3572 = vmatprep.mubr.msk.bf16.mxu1 %vm2632_vm13, %v3670_v38 }
  0xa1   : > { %3549 = vmatpush3.bf16.msra.mxu0 %v3665_v24 }
  0xa2   : > { %3550 = vmatprep.subr.bf16.mxu0 %v3668_v30 }
  0xa4   : > { %3519 = vmatmul.mubr.bf16.gmra.mxu0 %v3667_v25 }
  0xa5   : > { %3551 = vmatpush3.bf16.msra.mxu0 %v3668_v30  ;;  %3562 = vmatprep.mubr.bf16.mxu0 %v3150_v33 }
  0xa6   : > { %3552 = vmatprep.subr.bf16.mxu0 %v3669_v54  ;;  %3573 = vmatmul.mubr.msk.bf16.vlgmr.msra.gmra.mxu1 %vm2632_vm13, %v3672_v28 }
  0xa7   : > { %3576 = vmatprep.mubr.msk.bf16.mxu1 %vm2632_vm13, %v3674_v37 }
  0xa9   : > { %3553 = vmatpush3.bf16.msra.mxu0 %v3669_v54 }
  0xaa   : > { %3554 = vmatprep.subr.bf16.mxu0 %v3671_v32 }
  0xad   : > { %3555 = vmatpush3.bf16.msra.mxu0 %v3671_v32 }
  0xae   : > { %3556 = vmatprep.subr.bf16.mxu0 %v3673_v55  ;;  %3577 = vmatmul.mubr.msk.bf16.gmra.mxu1 %vm2632_vm13, %v3676_v59 }
  0xb1   : > { %3557 = vmatpush3.bf16.msra.mxu0 %v3673_v55 }
  0xb2   : > { %3558 = vmatprep.subr.bf16.mxu0 %v3675_v34 }
  0xb5   : > { %3559 = vmatpush3.bf16.msra.mxu0 %v3675_v34 }
  0xb6   : > { %3560 = vmatprep.subr.bf16.mxu0 %v3677_v48 }
  0xb9   : > { %3561 = vmatpush3.bf16.msra.mxu0 %v3677_v48 }
  0xbc   : > { %3563 = vmatmul.mubr.bf16.vlgmr.msra.gmra.mxu0 %v3151_v3 }
  0xbd   : > { %3566 = vmatprep.mubr.bf16.mxu0 %v3152_v8 }
  0xc4   : > { %3567 = vmatmul.mubr.bf16.gmra.mxu0 %v3153_v23 }
  0xf4   : > { %v3396_v12 = vpop.f32.mrf.mxu1 }
  0xf6   : > { %v957_v4 = vpop.f32.mrf.mxu1 }
  0xf8   : > { %v4333_v7 = vpop.f32.mrf.mxu1 }
  0xfa   : > { %v4335_v19 = vpop.f32.mrf.mxu1 }
  0xfc   : > { %v3372_v5 = vpop.f32.mrf.mxu0 }
  0xfd   : > { %v966_v24 = vadd.f32 %v3396_v12, %v3372_v5 }
  0xfe   : > { %v820_v52 = vpop.f32.mrf.mxu0 }
  0xff   : > { %v958_v27 = vadd.f32 %v957_v4, %v820_v52 }
 0x100   : > { %v4337_v46 = vpop.f32.mrf.mxu0 }
 0x102   : > { %v4343_v13 = vpop.f32.mrf.mxu0 }
 0x108   : > { %v3400_v63 = vpop.f32.mrf.mxu1 }
 0x10a   : > { %v4339_v10 = vpop.f32.mrf.mxu1 }
 0x10c   : > { %v4341_v11 = vpop.f32.mrf.mxu1 }
 0x10e   : > { %v4345_v14 = vpop.f32.mrf.mxu1 }
 0x112   : > { %v3376_v15 = vpop.f32.mrf.mxu0 }
 0x113   : > { %v982_v28 = vadd.f32 %v3400_v63, %v3376_v15 }
 0x114   : > { %v4347_v18 = vpop.f32.mrf.mxu0  ;;  %v3444_v20 = vpop.f32.mrf.mxu1 }
 0x116   : > { %v4349_v43 = vpop.f32.mrf.mxu0  ;;  %v1332_v21 = vpop.f32.mrf.mxu1 }
 0x118   : > { %v4351_v53 = vpop.f32.mrf.mxu0  ;;  %v4353_v9 = vpop.f32.mrf.mxu1 }
 0x11a   : > { %v4357_v25 = vpop.f32.mrf.mxu1 }
 0x11c   : > { %v3420_v26 = vpop.f32.mrf.mxu0  ;;  %v3448_v32 = vpop.f32.mrf.mxu1 }
 0x11d   : > { %v1195_v29 = vadd.f32 %v3420_v26, %v966_v24  ;;  %v969_v26 = vadd.f32 %v4333_v7, %v4337_v46  ;;  %v974_v7 = vadd.f32 %v4339_v10, %v4347_v18 }
 0x11e   : > { %v1162_v38 = vpop.f32.mrf.mxu0  ;;  %v4363_v34 = vpop.f32.mrf.mxu1 }
 0x11f   : > { %v1193_v30 = vadd.f32 %v1162_v38, %v958_v27  ;;  %v4355_v31 = vadd.f32 %v3444_v20, %v1195_v29 }
 0x120   : > { %v3421_v22 = vpop.f32.mrf.mxu0  ;;  %v4365_v36 = vpop.f32.mrf.mxu1 }
 0x121   : > { %v4359_v33 = vadd.f32 %v1332_v21, %v1193_v30 }
 0x122   : > { %v1165_v54 = vpop.f32.mrf.mxu0  ;;  %v4367_v39 = vpop.f32.mrf.mxu1 }
 0x124   : > { %v3424_v37 = vpop.f32.mrf.mxu0 }
 0x125   : > { %v1199_v55 = vadd.f32 %v3424_v37, %v982_v28  ;;  %v1196_v28 = vadd.f32 %v3421_v22, %v969_v26 }
 0x126   : > { %v1178_v16 = vpop.f32.mrf.mxu0 }
 0x127   : > { %v4361_v59 = vadd.f32 %v3448_v32, %v1199_v55 }
 0x128   : > { %v4371_v41 = vpop.f32.mrf.mxu0 }
 0x12a   : > { %v4375_v42 = vpop.f32.mrf.mxu0 }
 0x135   : > { %v4369_v40 = vpop.f32.mrf.mxu1 }
 0x137   : > { %v4373_v45 = vpop.f32.mrf.mxu1 }
 0x139   : > { %v4377_v44 = vpop.f32.mrf.mxu1 }
 0x13b   : > { %v4379_v50 = vpop.f32.mrf.mxu1 }
 0x13c   : > { %v3468_v48 = vpop.f32.mrf.mxu0 }
 0x13e   : > { %v4381_v51 = vpop.f32.mrf.mxu0 }
 0x13f   : > { %v4383_v49 = vpop.f32.mrf.mxu1 }
 0x140   : > { %v3469_v56 = vpop.f32.mrf.mxu0 }
 0x141   : > { %v4385_v57 = vpop.f32.mrf.mxu1 }
 0x142   : > { %v4387_v35 = vpop.f32.mrf.mxu0 }
 0x143   : > { %v4389_v58 = vpop.f32.mrf.mxu1 }
 0x144   : > { %v4391_v60 = vpop.f32.mrf.mxu0 }
 0x145   : > { %v4393_v61 = vpop.f32.mrf.mxu1 }
 0x146   : > { %4514 = vst [vmem:[#allocation3_spill] sm:$0xff] %v4393_v61  ;;  %v4395_v62 = vpop.f32.mrf.mxu0 }
 0x148   : > { %v4401_v8 = vpop.f32.mrf.mxu0 }
 0x14a   : > { %v4407_v0 = vpop.f32.mrf.mxu0 }
 0x155   : > { %v4397_v3 = vpop.f32.mrf.mxu1 }
 0x157   : > { %v4399_v17 = vpop.f32.mrf.mxu1 }
 0x158   : > { %4515 = vst [vmem:[#allocation4_spill] sm:$0xff] %v4399_v17 }
 0x159   : > { %v4403_v6 = vpop.f32.mrf.mxu1 }
 0x15b   : > { %v4405_v47 = vpop.f32.mrf.mxu1 }
 0x15c   : > { %4516 = vst [vmem:[#allocation5_spill] sm:$0xff] %v4405_v47  ;;  %v4409_v1 = vpop.f32.mrf.mxu0 }
 0x15e   : > { %v4411_v2 = vpop.f32.mrf.mxu1  ;;  %v4415_v12 = vpop.f32.mrf.mxu0 }
 0x15f   : > { %4517 = vst [vmem:[#allocation6_spill] sm:$0xff] %v4411_v2  ;;  %v961_v2 = vadd.f32 %v4335_v19, %v4343_v13  ;;  %v977_v19 = vadd.f32 %v4345_v14, %v4351_v53  ;;  %v1197_v13 = vadd.f32 %v1178_v16, %v974_v7 }
 0x160   : > { %v4413_v23 = vpop.f32.mrf.mxu1  ;;  %v3517_v52 = vpop.f32.mrf.mxu0 }
 0x161   : > { %4518 = vst [vmem:[#allocation7_spill] sm:$0xff] %v4413_v23  ;;  %v1194_v46 = vadd.f32 %v1165_v54, %v961_v2 }
 0x162   : > { %v4417_v4 = vpop.f32.mrf.mxu1  ;;  %v4421_v20 = vpop.f32.mrf.mxu0 }
 0x163   : > { %4519 = vst [vmem:[#allocation8_spill] sm:$0xff] %v4417_v4 }
 0x164   : > { %v4419_v5 = vpop.f32.mrf.mxu1  ;;  %v4425_v37 = vpop.f32.mrf.mxu0 }
 0x165   : > { %4520 = vst [vmem:[#allocation9_spill] sm:$0xff] %v4419_v5 }
 0x166   : > { %v3574_v63 = vpop.f32.mrf.mxu1  ;;  %v2011_v22 = vpop.f32.mrf.mxu0 }
 0x167   : > { %v2729_v29 = vmul.f32 %v3574_v63, %v3574_v63 }
 0x168   : > { %v2683_v15 = vpop.f32.mrf.mxu1 }
 0x169   : > { %v2727_v24 = vmul.f32 %v2683_v15, %v2683_v15 }
 0x16a   : > { %v3575_v21 = vpop.f32.mrf.mxu1 }
 0x16b   : > { %v2730_v55 = vmul.f32 %v3575_v21, %v3575_v21 }
 0x16c   : > { %v2686_v27 = vpop.f32.mrf.mxu1 }
 0x16d   : > { %v2714_v38 = vadd.f32 %v2686_v27, %v2683_v15  ;;  %v2728_v30 = vmul.f32 %v2686_v27, %v2686_v27  ;;  %v1366_v15 = vadd.f32 %v4353_v9, %v1196_v28  ;;  %v985_v27 = vadd.f32 %v4341_v11, %v4349_v43 }
 0x16e   : > { %v3578_v32 = vpop.f32.mrf.mxu1  ;;  %v1364_v9 = vadd.f32 %v4357_v25, %v1194_v46  ;;  %v1198_v11 = vadd.f32 %v4375_v42, %v977_v19  ;;  %v1645_v43 = vadd.f32 %v4381_v51, %v4359_v33  ;;  %v4521_v46 = vld [vmem:[#allocation4_spill] sm:$0xff]  ;;  %v4523_v19 = vld [vmem:[#allocation5_spill] sm:$0xff] }
 0x16f   : > { %v2715_v5 = vadd.f32 %v3574_v63, %v2714_v38  ;;  %v2735_v4 = vadd.f32 %v2728_v30, %v2727_v24  ;;  %v1200_v2 = vadd.f32 %v4371_v41, %v985_v27 }
 0x170   : > { %v2699_v23 = vpop.f32.mrf.mxu1  ;;  %v1368_v42 = vadd.f32 %v4367_v39, %v1198_v11  ;;  %v1855_v33 = vadd.f32 %v4373_v45, %v1645_v43 }
 0x171   : > { %v2736_v47 = vadd.f32 %v2735_v4, %v2729_v29  ;;  %v2716_v61 = vadd.f32 %v3575_v21, %v2715_v5  ;;  %v2731_v17 = vmul.f32 %v2699_v23, %v2699_v23  ;;  %v1647_v4 = vadd.f32 %v3468_v48, %v4355_v31 }
 0x172   : > { %v3579_v26 = vpop.f32.mrf.mxu1  ;;  %v1648_v5 = vadd.f32 %v3469_v56, %v1366_v15  ;;  %v2733_v29 = vmul.f32 %v3578_v32, %v3578_v32  ;;  %v1367_v31 = vadd.f32 %v4363_v34, %v1197_v13  ;;  %v1646_v48 = vadd.f32 %v4387_v35, %v1364_v9 }
 0x173   : > { %v2717_v63 = vadd.f32 %v2716_v61, %v2699_v23  ;;  %v2737_v24 = vadd.f32 %v2736_v47, %v2730_v55  ;;  %v3521_v61 = vpop.f32.mrf.mxu0  ;;  %v2734_v14 = vmul.f32 %v3579_v26, %v3579_v26  ;;  %v1857_v56 = vadd.f32 %v4369_v40, %v1647_v4 }
 0x174   : > { %v2702_v21 = vpop.f32.mrf.mxu1  ;;  %v1370_v41 = vadd.f32 %v4365_v36, %v1200_v2  ;;  %v1649_v51 = vadd.f32 %v4395_v62, %v1367_v31  ;;  %v1651_v40 = vadd.f32 %v4391_v60, %v4361_v59  ;;  %v2026_v36 = vadd.f32 %v4415_v12, %v1855_v33 }
 0x175   : > { %v2738_v10 = vadd.f32 %v2737_v24, %v2731_v17  ;;  %v2718_v18 = vadd.f32 %v2717_v63, %v2702_v21  ;;  %v2732_v54 = vmul.f32 %v2702_v21, %v2702_v21  ;;  %v1858_v17 = vadd.f32 %v4377_v44, %v1648_v5  ;;  %v2014_v23 = vpop.f32.mrf.mxu0  ;;  %v4522_v24 = vld [vmem:[#allocation3_spill] sm:$0xff] }
 0x176   : > { %v2028_v38 = vadd.f32 %v4409_v1, %v1857_v56  ;;  %v1856_v44 = vadd.f32 %v4379_v50, %v1646_v48  ;;  %v1652_v28 = vadd.f32 %v4401_v8, %v1370_v41  ;;  %v1859_v62 = vadd.f32 %v4385_v57, %v1649_v51  ;;  %v4526_v48 = vld [vmem:[#allocation8_spill] sm:$0xff]  ;;  %v4527_v51 = vld [vmem:[#allocation9_spill] sm:$0xff] }
 0x177   : > { %v2719_v53 = vadd.f32 %v3578_v32, %v2718_v18  ;;  %v2739_v16 = vadd.f32 %v2738_v10, %v2732_v54  ;;  %v2029_v34 = vadd.f32 %v3517_v52, %v1858_v17  ;;  %v1650_v55 = vadd.f32 %v4407_v0, %v1368_v42  ;;  %v4524_v18 = vld [vmem:[#allocation7_spill] sm:$0xff] }
 0x178   : > { %v2027_v1 = vadd.f32 %v4421_v20, %v1856_v44  ;;  %v2310_v7 = vadd.f32 %v4397_v3, %v2028_v38  ;;  %v1861_v8 = vadd.f32 %v4383_v49, %v1651_v40  ;;  %v1862_v12 = vadd.f32 %v4389_v58, %v1652_v28 }
 0x179   : > { %v2720_v25 = vadd.f32 %v3579_v26, %v2719_v53  ;;  %v2740_v47 = vadd.f32 %v2739_v16, %v2733_v29  ;;  %v2311_v59 = vadd.f32 %v4403_v6, %v2029_v34  ;;  %v2308_v15 = vadd.f32 %v4521_v46, %v2026_v36 }
 0x17a   : > { %v2030_v26 = vadd.f32 %v2011_v22, %v1859_v62  ;;  %v1860_v3 = vadd.f32 %v4522_v24, %v1650_v55  ;;  %v2309_v6 = vadd.f32 %v4523_v19, %v2027_v1  ;;  %v2032_v13 = vadd.f32 %v4425_v37, %v1861_v8 }
 0x17b   : > { %v2721_v30 = vrot.slane %v2720_v25, 4  ;;  %v2741_v35 = vadd.f32 %v2740_v47, %v2734_v14  ;;  %v2033_v58 = vadd.f32 %v3521_v61, %v1862_v12  ;;  %v4525_v61 = vld [vmem:[#allocation6_spill] sm:$0xff] }
 0x17c   : > { %v3564_v39 = vpop.f32.mrf.mxu0  ;;  %v2312_v54 = vadd.f32 %v4524_v18, %v2030_v26  ;;  %v2031_v37 = vadd.f32 %v2014_v23, %v1860_v3  ;;  %v2314_v31 = vadd.f32 %v4525_v61, %v2032_v13 }
 0x17d   : > { %v2722_v32 = vadd.f32 %v2721_v30, %v2720_v25  ;;  %v2742_v45 = vrot.slane %v2741_v35, 4  ;;  %v2520_v20 = vadd.f32 %v3564_v39, %v2310_v7  ;;  %v2315_v56 = vadd.f32 %v4526_v48, %v2033_v58 }
 0x17e   : > { %v2487_v52 = vpop.f32.mrf.mxu0  ;;  %v2313_v23 = vadd.f32 %v4527_v51, %v2031_v37 }
 0x17f   : > { %v2723_v50 = vrot.slane %v2722_v32, 2  ;;  %v2743_v60 = vadd.f32 %v2742_v45, %v2741_v35  ;;  %v2518_v4 = vadd.f32 %v2487_v52, %v2308_v15  ;;  %v2581_v25 = vmul.f32 %v2520_v20, %v2520_v20 }
 0x180   : > { %v3565_v57 = vpop.f32.mrf.mxu0 }
 0x181   : > { %v2724_v0 = vadd.f32 %v2723_v50, %v2722_v32  ;;  %v2744_v27 = vrot.slane %v2743_v60, 2  ;;  %v2521_v63 = vadd.f32 %v3565_v57, %v2311_v59  ;;  %v2579_v11 = vmul.f32 %v2518_v4, %v2518_v4 }
 0x182   : > { %v2490_v49 = vpop.f32.mrf.mxu0 }
 0x183   : > { %v2725_v22 = vrot.slane %v2724_v0, 1  ;;  %v2745_v5 = vadd.f32 %v2744_v27, %v2743_v60  ;;  %v3223_v21 = vpack.c.bf16 %v2521_v63, %v2520_v20  ;;  %v2519_v29 = vadd.f32 %v2490_v49, %v2309_v6 }
 0x184   : > { %v3568_v10 = vpop.f32.mrf.mxu0  ;;  %v2582_v35 = vmul.f32 %v2521_v63, %v2521_v63 }
 0x185   : > { %v2726_v9 = vadd.f32 %v2725_v22, %v2724_v0  ;;  %v2746_v2 = vrot.slane %v2745_v5, 1  ;;  %3238 = vst [vmem:[%s4471_s23 + $0x8] sm:$0xff] %v3223_v21   ;;  %v3218_v43 = vpack.c.bf16 %v2519_v29, %v2518_v4  ;;  %v2566_v14 = vadd.f32 %v2519_v29, %v2518_v4 }
 0x186   : > { %v2580_v53 = vmul.f32 %v2519_v29, %v2519_v29  ;;  %v2503_v16 = vpop.f32.mrf.mxu0  ;;  %v2524_v34 = vadd.f32 %v3568_v10, %v2314_v31 }
 0x187   : > { %v2747_v17 = vadd.f32 %v2746_v2, %v2745_v5  ;;  %3219 = vst [vmem:[%s4471_s23] sm:$0xff] %v3218_v43   ;;  %v2567_v47 = vadd.f32 %v2566_v14, %v2520_v20  ;;  %v2522_v42 = vadd.f32 %v2503_v16, %v2312_v54 }
 0x188   : > { %v2587_v41 = vadd.f32 %v2580_v53, %v2579_v11  ;;  %v3569_v33 = vpop.f32.mrf.mxu0  ;;  %v2585_v59 = vmul.f32 %v2524_v34, %v2524_v34 }
 0x189   : > { %v2748_v38 = vsel %vm510_vm1, %v2726_v9, %v2747_v17  ;;  %v2525_v30 = vadd.f32 %v3569_v33, %v2315_v56  ;;  %v2568_v44 = vadd.f32 %v2567_v47, %v2521_v63  ;;  %v2583_v45 = vmul.f32 %v2522_v42, %v2522_v42 }
 0x18a   : > { %2749 = vst [vmem:[%s319_s28] sm:$0x3] %v2748_v38  ;;  %v2588_v40 = vadd.f32 %v2587_v41, %v2581_v25  ;;  %v2506_v28 = vpop.f32.mrf.mxu0 }
 0x18b   : > { %v3233_v36 = vpack.c.bf16 %v2525_v30, %v2524_v34  ;;  %v2523_v39 = vadd.f32 %v2506_v28, %v2313_v23  ;;  %v2569_v32 = vadd.f32 %v2568_v44, %v2522_v42  ;;  %v2586_v8 = vmul.f32 %v2525_v30, %v2525_v30 }
 0x18c   : > { %v2589_v62 = vadd.f32 %v2588_v40, %v2582_v35 }
 0x18d   : > { %3240 = vst [vmem:[%s4471_s23 + $0x18] sm:$0xff] %v3233_v36   ;;  %v3228_v55 = vpack.c.bf16 %v2523_v39, %v2522_v42  ;;  %v2584_v1 = vmul.f32 %v2523_v39, %v2523_v39  ;;  %v2570_v7 = vadd.f32 %v2569_v32, %v2523_v39 }
 0x18e   : > { %v2590_v52 = vadd.f32 %v2589_v62, %v2583_v45 }
 0x18f   : > { %3239 = vst [vmem:[%s4471_s23 + $0x10] sm:$0xff] %v3228_v55   ;;  %v2571_v50 = vadd.f32 %v2570_v7, %v2524_v34 }
 0x190   : > { %v2591_v60 = vadd.f32 %v2590_v52, %v2584_v1 }
 0x191   : > { %v2572_v12 = vadd.f32 %v2571_v50, %v2525_v30 }
 0x192   : > { %v2592_v46 = vadd.f32 %v2591_v60, %v2585_v59 }
 0x193   : > { %v2573_v15 = vrot.slane %v2572_v12, 4 }
 0x194   : > { %v2593_v26 = vadd.f32 %v2592_v46, %v2586_v8 }
 0x195   : > { %v2574_v57 = vadd.f32 %v2573_v15, %v2572_v12 }
 0x196   : > { %v2594_v0 = vrot.slane %v2593_v26, 4 }
 0x197   : > { %v2575_v27 = vrot.slane %v2574_v57, 2 }
 0x198   : > { %v2595_v20 = vadd.f32 %v2594_v0, %v2593_v26 }
 0x199   : > { %v2576_v63 = vadd.f32 %v2575_v27, %v2574_v57 }
 0x19a   : > { %v2596_v24 = vrot.slane %v2595_v20, 2 }
 0x19b   : > { %v2577_v3 = vrot.slane %v2576_v63, 1 }
 0x19c   : > { %v2597_v19 = vadd.f32 %v2596_v24, %v2595_v20 }
 0x19d   : > { %v2578_v13 = vadd.f32 %v2577_v3, %v2576_v63 }
 0x19e   : > { %v2598_v6 = vrot.slane %v2597_v19, 1 }
 0x1a0   : > { %v2599_v4 = vadd.f32 %v2598_v6, %v2597_v19 }
 0x1a2   : > { %v2601_v49 = vsel %vm510_vm1, %v2578_v13, %v2599_v4 }
 0x1a3   : > { %2602 = vst [vmem:[%s315_s8] sm:$0x3] %v2601_v49 }
 0x1a4 PF: > { %s18_s24 = sadd.s32 1, %s3684_s24  }
 0x1a5   : > { %p15_p4 = scmp.ge.s32.totalorder %s18_s24, 4  }
 0x1a7   :  { %17 = sbr.rel (!%p15_p4) target bundleno = 1 (0x1), region = 107 }

</bundles_post_ra>
